<compile_context>
chip_gen: v7x
topology: tpu7x:2x2x1
jax: 0.10.0
libtpu: 0.0.40
codegen_flags: <defaults>
</compile_context>

<pallas_src>
import jax
import jax.numpy as jnp
from jax.experimental import pallas as pl
from jax.experimental.pallas import tpu as pltpu
import numpy as np

_SUBLANE = 8
_LANE = 128


# -----------------------------------------------------------------------------
# Kernel
# -----------------------------------------------------------------------------
def keypress_lstm_kernel(
    x_ref,       # (T*B, I)    time-major flattened input (row = t*B + b)
    wih0_ref,    # (I,  4*Hp)  layer-0 input->hidden, gate-padded
    whh0_ref,    # (Hp, 4*Hp)  layer-0 hidden->hidden, gate-padded
    b0_ref,      # (1,  4*Hp)  layer-0 combined bias (b_ih + b_hh), gate-padded
    wih1_ref,    # (Hp, 4*Hp)  layer-1 input->hidden
    whh1_ref,    # (Hp, 4*Hp)  layer-1 hidden->hidden
    b1_ref,      # (1,  4*Hp)  layer-1 combined bias
    wf1_ref,     # (Hp,  F1p)  fc1 (zero padded)
    bf1_ref,     # (1,   F1p)
    wf2_ref,     # (F1p, F2p)  fc2
    bf2_ref,     # (1,   F2p)
    wf3_ref,     # (F2p, 1)    fc3
    bf3_ref,     # (1, 1)
    out_ref,     # (B, 1)
    h0_scr,      # (T*B, Hp)   VMEM scratch: layer-0 hidden states for all t
):
    TB = x_ref.shape[0]
    B = out_ref.shape[0]
    T = TB // B
    Hp = whh0_ref.shape[0]
    f32 = jnp.float32

    # Hoisted loads of the recurrent weights (reused every unrolled step).
    whh0 = whh0_ref[...]
    whh1 = whh1_ref[...]

    def lstm_gates(g, c):
        # PyTorch gate order: i, f, g, o. Each gate occupies a full 128-lane
        # aligned block of width Hp, so these are clean full-vreg slices.
        i_g = jax.nn.sigmoid(g[:, 0 * Hp:1 * Hp])
        f_g = jax.nn.sigmoid(g[:, 1 * Hp:2 * Hp])
        g_g = jnp.tanh(g[:, 2 * Hp:3 * Hp])
        o_g = jax.nn.sigmoid(g[:, 3 * Hp:4 * Hp])
        c_new = f_g * c + i_g * g_g
        h_new = o_g * jnp.tanh(c_new)
        return h_new, c_new

    # ---- Phase 1: layer-0 input projection for ALL timesteps in one matmul
    #      (off the serial recurrence path).
    g0_all = (
        jnp.dot(x_ref[...], wih0_ref[...], preferred_element_type=f32)
        + b0_ref[...]
    )

    # ---- Phase 2: layer-0 recurrence. Only h0 @ Whh0 remains per step.
    #      T is small & static -> full static unroll.
    h0 = jnp.zeros((B, Hp), f32)
    c0 = jnp.zeros((B, Hp), f32)
    for t in range(T):
        g = g0_all[t * B:(t + 1) * B, :] + jnp.dot(
            h0, whh0, preferred_element_type=f32)
        h0, c0 = lstm_gates(g, c0)
        h0_scr[t * B:(t + 1) * B, :] = h0

    # ---- Phase 3: layer-1 input projection for ALL timesteps in one matmul.
    g1_all = (
        jnp.dot(h0_scr[...], wih1_ref[...], preferred_element_type=f32)
        + b1_ref[...]
    )

    # ---- Phase 4: layer-1 recurrence. Only h1 @ Whh1 per step; only the last
    #      hidden state is needed downstream.
    h1 = jnp.zeros((B, Hp), f32)
    c1 = jnp.zeros((B, Hp), f32)
    for t in range(T):
        g = g1_all[t * B:(t + 1) * B, :] + jnp.dot(
            h1, whh1, preferred_element_type=f32)
        h1, c1 = lstm_gates(g, c1)

    # ---- MLP head: Linear -> ReLU -> Linear -> ReLU -> Linear -> Sigmoid.
    z1 = jnp.maximum(
        jnp.dot(h1, wf1_ref[...], preferred_element_type=f32) + bf1_ref[...], 0.0)
    z2 = jnp.maximum(
        jnp.dot(z1, wf2_ref[...], preferred_element_type=f32) + bf2_ref[...], 0.0)
    z3 = jnp.dot(z2, wf3_ref[...], preferred_element_type=f32) + bf3_ref[...]
    out_ref[...] = jax.nn.sigmoid(z3)


# -----------------------------------------------------------------------------
# Wrapper-side weight packing (one-time): 128-lane-aligned gate / feature pads
# -----------------------------------------------------------------------------
def _round_up(n, m):
    return ((n + m - 1) // m) * m


def _pad_gate_cols(w, H, Hp):
    """(in, 4H) -> (in, 4Hp): place each gate block at a 128-lane-aligned offset."""
    out = jnp.zeros((w.shape[0], 4 * Hp), w.dtype)
    for g in range(4):
        out = out.at[:, g * Hp:g * Hp + H].set(w[:, g * H:(g + 1) * H])
    return out


def _pad_to(w, shape):
    out = jnp.zeros(shape, w.dtype)
    return out.at[:w.shape[0], :w.shape[1]].set(w)


def pack_params(params):
    """Zero-pad all weights so gates / features sit on 128-lane-aligned tiles."""
    H = params["whh0"].shape[0]
    Hp = _round_up(max(H, _LANE), _LANE)
    F1 = params["wf1"].shape[1]
    F2 = params["wf2"].shape[1]
    F1p = _round_up(max(F1, _LANE), _LANE)
    F2p = _round_up(max(F2, _LANE), _LANE)

    return dict(
        Hp=Hp,
        wih0=_pad_gate_cols(params["wih0"], H, Hp),
        whh0=_pad_gate_cols(_pad_to(params["whh0"], (Hp, 4 * H)), H, Hp),
        b0=_pad_gate_cols(params["b0"], H, Hp),
        wih1=_pad_gate_cols(_pad_to(params["wih1"], (Hp, 4 * H)), H, Hp),
        whh1=_pad_gate_cols(_pad_to(params["whh1"], (Hp, 4 * H)), H, Hp),
        b1=_pad_gate_cols(params["b1"], H, Hp),
        wf1=_pad_to(params["wf1"], (Hp, F1p)),
        bf1=_pad_to(params["bf1"], (1, F1p)),
        wf2=_pad_to(params["wf2"], (F1p, F2p)),
        bf2=_pad_to(params["bf2"], (1, F2p)),
        wf3=_pad_to(params["wf3"], (F2p, 1)),
        bf3=params["bf3"],
    )


def keypress_lstm_forward(x, packed):
    """x: (B, T, I) batch_first float32, like the PyTorch module."""
    B, T, I = x.shape
    Hp = packed["Hp"]

    # Pad batch up to a full sublane tile so state tensors are whole vregs.
    Bp = _round_up(B, _SUBLANE)
    if Bp != B:
        x = jnp.pad(x, ((0, Bp - B), (0, 0), (0, 0)))

    # Time-major, flattened to 2-D: the whole layer-0 input projection becomes
    # a single (T*Bp, I) @ (I, 4Hp) matmul inside the kernel (row = t*Bp + b).
    x_tm = jnp.transpose(x, (1, 0, 2)).reshape(T * Bp, I)

    args = (
        x_tm,
        packed["wih0"], packed["whh0"], packed["b0"],
        packed["wih1"], packed["whh1"], packed["b1"],
        packed["wf1"], packed["bf1"],
        packed["wf2"], packed["bf2"],
        packed["wf3"], packed["bf3"],
    )

    vmem = pl.BlockSpec(memory_space=pltpu.MemorySpace.VMEM)
    out = pl.pallas_call(
        keypress_lstm_kernel,
        out_shape=jax.ShapeDtypeStruct((Bp, 1), jnp.float32),
        in_specs=[vmem] * len(args),
        out_specs=vmem,
        scratch_shapes=[pltpu.VMEM((T * Bp, Hp), jnp.float32)],
    )(*args)
    return out[:B]


# -----------------------------------------------------------------------------
# Synthetic parameters + pure-JAX reference (PyTorch eval-mode semantics)
# -----------------------------------------------------------------------------
def make_params(key, input_size, hidden_size):
    H = hidden_size
    ks = jax.random.split(key, 16)
    scale = 1.0 / np.sqrt(H)

    def u(k, shape):
        return jax.random.uniform(k, shape, jnp.float32, -scale, scale)

    # PyTorch stores W_ih: (4H, in), W_hh: (4H, H); transpose for x @ W.
    wih0 = u(ks[0], (4 * H, input_size)).T
    whh0 = u(ks[1], (4 * H, H)).T
    b0 = (u(ks[2], (4 * H,)) + u(ks[3], (4 * H,))).reshape(1, 4 * H)
    wih1 = u(ks[4], (4 * H, H)).T
    whh1 = u(ks[5], (4 * H, H)).T
    b1 = (u(ks[6], (4 * H,)) + u(ks[7], (4 * H,))).reshape(1, 4 * H)

    wf1 = u(ks[8], (H // 2, H)).T
    bf1 = u(ks[9], (H // 2,)).reshape(1, -1)
    wf2 = u(ks[10], (H // 4, H // 2)).T
    bf2 = u(ks[11], (H // 4,)).reshape(1, -1)
    wf3 = u(ks[12], (1, H // 4)).T
    bf3 = u(ks[13], (1,)).reshape(1, -1)

    return dict(wih0=wih0, whh0=whh0, b0=b0, wih1=wih1, whh1=whh1, b1=b1,
                wf1=wf1, bf1=bf1, wf2=wf2, bf2=bf2, wf3=wf3, bf3=bf3)


def reference_forward(x, params):
    B, T, I = x.shape
    H = params["whh0"].shape[0]

    def cell(x_in, h, c, wih, whh, b):
        g = x_in @ wih + h @ whh + b
        i_g = jax.nn.sigmoid(g[:, 0 * H:1 * H])
        f_g = jax.nn.sigmoid(g[:, 1 * H:2 * H])
        g_g = jnp.tanh(g[:, 2 * H:3 * H])
        o_g = jax.nn.sigmoid(g[:, 3 * H:4 * H])
        c_n = f_g * c + i_g * g_g
        return o_g * jnp.tanh(c_n), c_n

    h0 = c0 = h1 = c1 = jnp.zeros((B, H), jnp.float32)
    for t in range(T):
        xt = x[:, t, :]
        h0, c0 = cell(xt, h0, c0, params["wih0"], params["whh0"], params["b0"])
        h1, c1 = cell(h0, h1, c1, params["wih1"], params["whh1"], params["b1"])

    z1 = jnp.maximum(h1 @ params["wf1"] + params["bf1"], 0.0)
    z2 = jnp.maximum(z1 @ params["wf2"] + params["bf2"], 0.0)
    z3 = z2 @ params["wf3"] + params["bf3"]
    return jax.nn.sigmoid(z3)


if __name__ == "__main__":
    # batch, seq, input_size, hidden_size (B=8 fills a full sublane tile)
    B, T, I, H = 8, 8, 16, 32

    key = jax.random.PRNGKey(0)
    kx, kp = jax.random.split(key)
    x = jax.random.normal(kx, (B, T, I), jnp.float32)
    params = make_params(kp, input_size=I, hidden_size=H)
    packed = pack_params(params)

    out = keypress_lstm_forward(x, packed)
    out = jax.block_until_ready(out)

    ref = reference_forward(x, params)
    np.testing.assert_allclose(np.asarray(out), np.asarray(ref),
                               rtol=1e-3, atol=1e-3)
    assert out.shape == (B, 1)

    print("KERNEL_OK")
</pallas_src>

<mosaic_0001>
module attributes {stable_mosaic.version = 11 : i64} {
  func.func @keypress_lstm_kernel(%arg0: memref<64x16xf32, #tpu.memory_space<vmem>>, %arg1: memref<16x512xf32, #tpu.memory_space<vmem>>, %arg2: memref<128x512xf32, #tpu.memory_space<vmem>>, %arg3: memref<1x512xf32, #tpu.memory_space<vmem>>, %arg4: memref<128x512xf32, #tpu.memory_space<vmem>>, %arg5: memref<128x512xf32, #tpu.memory_space<vmem>>, %arg6: memref<1x512xf32, #tpu.memory_space<vmem>>, %arg7: memref<128x128xf32, #tpu.memory_space<vmem>>, %arg8: memref<1x128xf32, #tpu.memory_space<vmem>>, %arg9: memref<128x128xf32, #tpu.memory_space<vmem>>, %arg10: memref<1x128xf32, #tpu.memory_space<vmem>>, %arg11: memref<128x1xf32, #tpu.memory_space<vmem>>, %arg12: memref<1x1xf32, #tpu.memory_space<vmem>>, %arg13: memref<8x1xf32, #tpu.memory_space<vmem>>, %arg14: memref<64x128xf32, #tpu.memory_space<vmem>>) attributes {dimension_semantics = [], scalar_prefetch = 0 : i64, scratch_operands = 1 : i64, tpu.core_type = #tpu.core_type<tc>} {
    %c0 = arith.constant 0 : index
    %c0_0 = arith.constant 0 : index
    %0 = vector.load %arg2[%c0, %c0_0] : memref<128x512xf32, #tpu.memory_space<vmem>>, vector<128x512xf32>
    %c0_1 = arith.constant 0 : index
    %c0_2 = arith.constant 0 : index
    %1 = vector.load %arg5[%c0_1, %c0_2] : memref<128x512xf32, #tpu.memory_space<vmem>>, vector<128x512xf32>
    %c0_3 = arith.constant 0 : index
    %c0_4 = arith.constant 0 : index
    %2 = vector.load %arg0[%c0_3, %c0_4] : memref<64x16xf32, #tpu.memory_space<vmem>>, vector<64x16xf32>
    %c0_5 = arith.constant 0 : index
    %c0_6 = arith.constant 0 : index
    %3 = vector.load %arg1[%c0_5, %c0_6] : memref<16x512xf32, #tpu.memory_space<vmem>>, vector<16x512xf32>
    %cst = arith.constant dense<0.000000e+00> : vector<64x512xf32>
    %4 = tpu.matmul %2, %3, %cst {dimension_numbers = #tpu.dot_dimension_numbers<[1], [0], [0], [1], [0, 0, 1, 1], [], []>} : vector<64x16xf32>, vector<16x512xf32>, vector<64x512xf32> -> vector<64x512xf32>
    %c0_7 = arith.constant 0 : index
    %c0_8 = arith.constant 0 : index
    %5 = vector.load %arg3[%c0_7, %c0_8] : memref<1x512xf32, #tpu.memory_space<vmem>>, vector<1x512xf32>
    %6 = vector.broadcast %5 : vector<1x512xf32> to vector<64x512xf32>
    %7 = arith.addf %4, %6 : vector<64x512xf32>
    %cst_9 = arith.constant 0.000000e+00 : f32
    %8 = vector.broadcast %cst_9 : f32 to vector<8x128xf32>
    %cst_10 = arith.constant 0.000000e+00 : f32
    %9 = vector.broadcast %cst_10 : f32 to vector<8x128xf32>
    %10 = vector.extract_strided_slice %7 {offsets = [0, 0], sizes = [8, 512], strides = [1, 1]} : vector<64x512xf32> to vector<8x512xf32>
    %cst_11 = arith.constant dense<0.000000e+00> : vector<8x512xf32>
    %11 = tpu.matmul %8, %0, %cst_11 {dimension_numbers = #tpu.dot_dimension_numbers<[1], [0], [0], [1], [0, 0, 1, 1], [], []>} : vector<8x128xf32>, vector<128x512xf32>, vector<8x512xf32> -> vector<8x512xf32>
    %12 = arith.addf %10, %11 : vector<8x512xf32>
    %13 = vector.extract_strided_slice %12 {offsets = [0, 0], sizes = [8, 128], strides = [1, 1]} : vector<8x512xf32> to vector<8x128xf32>
    %14 = arith.negf %13 : vector<8x128xf32>
    %15 = math.exp %14 : vector<8x128xf32>
    %cst_12 = arith.constant 1.000000e+00 : f32
    %16 = vector.broadcast %cst_12 : f32 to vector<8x128xf32>
    %17 = arith.addf %16, %15 : vector<8x128xf32>
    %18 = arith.divf %16, %17 : vector<8x128xf32>
    %19 = vector.extract_strided_slice %12 {offsets = [0, 128], sizes = [8, 128], strides = [1, 1]} : vector<8x512xf32> to vector<8x128xf32>
    %20 = arith.negf %19 : vector<8x128xf32>
    %21 = math.exp %20 : vector<8x128xf32>
    %cst_13 = arith.constant 1.000000e+00 : f32
    %22 = vector.broadcast %cst_13 : f32 to vector<8x128xf32>
    %23 = arith.addf %22, %21 : vector<8x128xf32>
    %24 = arith.divf %22, %23 : vector<8x128xf32>
    %25 = vector.extract_strided_slice %12 {offsets = [0, 256], sizes = [8, 128], strides = [1, 1]} : vector<8x512xf32> to vector<8x128xf32>
    %26 = math.tanh %25 : vector<8x128xf32>
    %27 = vector.extract_strided_slice %12 {offsets = [0, 384], sizes = [8, 128], strides = [1, 1]} : vector<8x512xf32> to vector<8x128xf32>
    %28 = arith.negf %27 : vector<8x128xf32>
    %29 = math.exp %28 : vector<8x128xf32>
    %cst_14 = arith.constant 1.000000e+00 : f32
    %30 = vector.broadcast %cst_14 : f32 to vector<8x128xf32>
    %31 = arith.addf %30, %29 : vector<8x128xf32>
    %32 = arith.divf %30, %31 : vector<8x128xf32>
    %33 = arith.mulf %24, %9 : vector<8x128xf32>
    %34 = arith.mulf %18, %26 : vector<8x128xf32>
    %35 = arith.addf %33, %34 : vector<8x128xf32>
    %36 = math.tanh %35 : vector<8x128xf32>
    %37 = arith.mulf %32, %36 : vector<8x128xf32>
    %c0_15 = arith.constant 0 : index
    %c0_16 = arith.constant 0 : index
    %38 = vector.load %arg14[%c0_15, %c0_16] : memref<64x128xf32, #tpu.memory_space<vmem>>, vector<8x128xf32>
    tpu.vector_store %arg14[%c0_15, %c0_16], %37 {strides = array<i32>} : memref<64x128xf32, #tpu.memory_space<vmem>>, vector<8x128xf32>,
    %39 = vector.extract_strided_slice %7 {offsets = [8, 0], sizes = [8, 512], strides = [1, 1]} : vector<64x512xf32> to vector<8x512xf32>
    %cst_17 = arith.constant dense<0.000000e+00> : vector<8x512xf32>
    %40 = tpu.matmul %37, %0, %cst_17 {dimension_numbers = #tpu.dot_dimension_numbers<[1], [0], [0], [1], [0, 0, 1, 1], [], []>} : vector<8x128xf32>, vector<128x512xf32>, vector<8x512xf32> -> vector<8x512xf32>
    %41 = arith.addf %39, %40 : vector<8x512xf32>
    %42 = vector.extract_strided_slice %41 {offsets = [0, 0], sizes = [8, 128], strides = [1, 1]} : vector<8x512xf32> to vector<8x128xf32>
    %43 = arith.negf %42 : vector<8x128xf32>
    %44 = math.exp %43 : vector<8x128xf32>
    %cst_18 = arith.constant 1.000000e+00 : f32
    %45 = vector.broadcast %cst_18 : f32 to vector<8x128xf32>
    %46 = arith.addf %45, %44 : vector<8x128xf32>
    %47 = arith.divf %45, %46 : vector<8x128xf32>
    %48 = vector.extract_strided_slice %41 {offsets = [0, 128], sizes = [8, 128], strides = [1, 1]} : vector<8x512xf32> to vector<8x128xf32>
    %49 = arith.negf %48 : vector<8x128xf32>
    %50 = math.exp %49 : vector<8x128xf32>
    %cst_19 = arith.constant 1.000000e+00 : f32
    %51 = vector.broadcast %cst_19 : f32 to vector<8x128xf32>
    %52 = arith.addf %51, %50 : vector<8x128xf32>
    %53 = arith.divf %51, %52 : vector<8x128xf32>
    %54 = vector.extract_strided_slice %41 {offsets = [0, 256], sizes = [8, 128], strides = [1, 1]} : vector<8x512xf32> to vector<8x128xf32>
    %55 = math.tanh %54 : vector<8x128xf32>
    %56 = vector.extract_strided_slice %41 {offsets = [0, 384], sizes = [8, 128], strides = [1, 1]} : vector<8x512xf32> to vector<8x128xf32>
    %57 = arith.negf %56 : vector<8x128xf32>
    %58 = math.exp %57 : vector<8x128xf32>
    %cst_20 = arith.constant 1.000000e+00 : f32
    %59 = vector.broadcast %cst_20 : f32 to vector<8x128xf32>
    %60 = arith.addf %59, %58 : vector<8x128xf32>
    %61 = arith.divf %59, %60 : vector<8x128xf32>
    %62 = arith.mulf %53, %35 : vector<8x128xf32>
    %63 = arith.mulf %47, %55 : vector<8x128xf32>
    %64 = arith.addf %62, %63 : vector<8x128xf32>
    %65 = math.tanh %64 : vector<8x128xf32>
    %66 = arith.mulf %61, %65 : vector<8x128xf32>
    %c8 = arith.constant 8 : index
    %c0_21 = arith.constant 0 : index
    %67 = vector.load %arg14[%c8, %c0_21] : memref<64x128xf32, #tpu.memory_space<vmem>>, vector<8x128xf32>
    tpu.vector_store %arg14[%c8, %c0_21], %66 {strides = array<i32>} : memref<64x128xf32, #tpu.memory_space<vmem>>, vector<8x128xf32>,
    %68 = vector.extract_strided_slice %7 {offsets = [16, 0], sizes = [8, 512], strides = [1, 1]} : vector<64x512xf32> to vector<8x512xf32>
    %cst_22 = arith.constant dense<0.000000e+00> : vector<8x512xf32>
    %69 = tpu.matmul %66, %0, %cst_22 {dimension_numbers = #tpu.dot_dimension_numbers<[1], [0], [0], [1], [0, 0, 1, 1], [], []>} : vector<8x128xf32>, vector<128x512xf32>, vector<8x512xf32> -> vector<8x512xf32>
    %70 = arith.addf %68, %69 : vector<8x512xf32>
    %71 = vector.extract_strided_slice %70 {offsets = [0, 0], sizes = [8, 128], strides = [1, 1]} : vector<8x512xf32> to vector<8x128xf32>
    %72 = arith.negf %71 : vector<8x128xf32>
    %73 = math.exp %72 : vector<8x128xf32>
    %cst_23 = arith.constant 1.000000e+00 : f32
    %74 = vector.broadcast %cst_23 : f32 to vector<8x128xf32>
    %75 = arith.addf %74, %73 : vector<8x128xf32>
    %76 = arith.divf %74, %75 : vector<8x128xf32>
    %77 = vector.extract_strided_slice %70 {offsets = [0, 128], sizes = [8, 128], strides = [1, 1]} : vector<8x512xf32> to vector<8x128xf32>
    %78 = arith.negf %77 : vector<8x128xf32>
    %79 = math.exp %78 : vector<8x128xf32>
    %cst_24 = arith.constant 1.000000e+00 : f32
    %80 = vector.broadcast %cst_24 : f32 to vector<8x128xf32>
    %81 = arith.addf %80, %79 : vector<8x128xf32>
    %82 = arith.divf %80, %81 : vector<8x128xf32>
    %83 = vector.extract_strided_slice %70 {offsets = [0, 256], sizes = [8, 128], strides = [1, 1]} : vector<8x512xf32> to vector<8x128xf32>
    %84 = math.tanh %83 : vector<8x128xf32>
    %85 = vector.extract_strided_slice %70 {offsets = [0, 384], sizes = [8, 128], strides = [1, 1]} : vector<8x512xf32> to vector<8x128xf32>
    %86 = arith.negf %85 : vector<8x128xf32>
    %87 = math.exp %86 : vector<8x128xf32>
    %cst_25 = arith.constant 1.000000e+00 : f32
    %88 = vector.broadcast %cst_25 : f32 to vector<8x128xf32>
    %89 = arith.addf %88, %87 : vector<8x128xf32>
    %90 = arith.divf %88, %89 : vector<8x128xf32>
    %91 = arith.mulf %82, %64 : vector<8x128xf32>
    %92 = arith.mulf %76, %84 : vector<8x128xf32>
    %93 = arith.addf %91, %92 : vector<8x128xf32>
    %94 = math.tanh %93 : vector<8x128xf32>
    %95 = arith.mulf %90, %94 : vector<8x128xf32>
    %c16 = arith.constant 16 : index
    %c0_26 = arith.constant 0 : index
    %96 = vector.load %arg14[%c16, %c0_26] : memref<64x128xf32, #tpu.memory_space<vmem>>, vector<8x128xf32>
    tpu.vector_store %arg14[%c16, %c0_26], %95 {strides = array<i32>} : memref<64x128xf32, #tpu.memory_space<vmem>>, vector<8x128xf32>,
    %97 = vector.extract_strided_slice %7 {offsets = [24, 0], sizes = [8, 512], strides = [1, 1]} : vector<64x512xf32> to vector<8x512xf32>
    %cst_27 = arith.constant dense<0.000000e+00> : vector<8x512xf32>
    %98 = tpu.matmul %95, %0, %cst_27 {dimension_numbers = #tpu.dot_dimension_numbers<[1], [0], [0], [1], [0, 0, 1, 1], [], []>} : vector<8x128xf32>, vector<128x512xf32>, vector<8x512xf32> -> vector<8x512xf32>
    %99 = arith.addf %97, %98 : vector<8x512xf32>
    %100 = vector.extract_strided_slice %99 {offsets = [0, 0], sizes = [8, 128], strides = [1, 1]} : vector<8x512xf32> to vector<8x128xf32>
    %101 = arith.negf %100 : vector<8x128xf32>
    %102 = math.exp %101 : vector<8x128xf32>
    %cst_28 = arith.constant 1.000000e+00 : f32
    %103 = vector.broadcast %cst_28 : f32 to vector<8x128xf32>
    %104 = arith.addf %103, %102 : vector<8x128xf32>
    %105 = arith.divf %103, %104 : vector<8x128xf32>
    %106 = vector.extract_strided_slice %99 {offsets = [0, 128], sizes = [8, 128], strides = [1, 1]} : vector<8x512xf32> to vector<8x128xf32>
    %107 = arith.negf %106 : vector<8x128xf32>
    %108 = math.exp %107 : vector<8x128xf32>
    %cst_29 = arith.constant 1.000000e+00 : f32
    %109 = vector.broadcast %cst_29 : f32 to vector<8x128xf32>
    %110 = arith.addf %109, %108 : vector<8x128xf32>
    %111 = arith.divf %109, %110 : vector<8x128xf32>
    %112 = vector.extract_strided_slice %99 {offsets = [0, 256], sizes = [8, 128], strides = [1, 1]} : vector<8x512xf32> to vector<8x128xf32>
    %113 = math.tanh %112 : vector<8x128xf32>
    %114 = vector.extract_strided_slice %99 {offsets = [0, 384], sizes = [8, 128], strides = [1, 1]} : vector<8x512xf32> to vector<8x128xf32>
    %115 = arith.negf %114 : vector<8x128xf32>
    %116 = math.exp %115 : vector<8x128xf32>
    %cst_30 = arith.constant 1.000000e+00 : f32
    %117 = vector.broadcast %cst_30 : f32 to vector<8x128xf32>
    %118 = arith.addf %117, %116 : vector<8x128xf32>
    %119 = arith.divf %117, %118 : vector<8x128xf32>
    %120 = arith.mulf %111, %93 : vector<8x128xf32>
    %121 = arith.mulf %105, %113 : vector<8x128xf32>
    %122 = arith.addf %120, %121 : vector<8x128xf32>
    %123 = math.tanh %122 : vector<8x128xf32>
    %124 = arith.mulf %119, %123 : vector<8x128xf32>
    %c24 = arith.constant 24 : index
    %c0_31 = arith.constant 0 : index
    %125 = vector.load %arg14[%c24, %c0_31] : memref<64x128xf32, #tpu.memory_space<vmem>>, vector<8x128xf32>
    tpu.vector_store %arg14[%c24, %c0_31], %124 {strides = array<i32>} : memref<64x128xf32, #tpu.memory_space<vmem>>, vector<8x128xf32>,
    %126 = vector.extract_strided_slice %7 {offsets = [32, 0], sizes = [8, 512], strides = [1, 1]} : vector<64x512xf32> to vector<8x512xf32>
    %cst_32 = arith.constant dense<0.000000e+00> : vector<8x512xf32>
    %127 = tpu.matmul %124, %0, %cst_32 {dimension_numbers = #tpu.dot_dimension_numbers<[1], [0], [0], [1], [0, 0, 1, 1], [], []>} : vector<8x128xf32>, vector<128x512xf32>, vector<8x512xf32> -> vector<8x512xf32>
    %128 = arith.addf %126, %127 : vector<8x512xf32>
    %129 = vector.extract_strided_slice %128 {offsets = [0, 0], sizes = [8, 128], strides = [1, 1]} : vector<8x512xf32> to vector<8x128xf32>
    %130 = arith.negf %129 : vector<8x128xf32>
    %131 = math.exp %130 : vector<8x128xf32>
    %cst_33 = arith.constant 1.000000e+00 : f32
    %132 = vector.broadcast %cst_33 : f32 to vector<8x128xf32>
    %133 = arith.addf %132, %131 : vector<8x128xf32>
    %134 = arith.divf %132, %133 : vector<8x128xf32>
    %135 = vector.extract_strided_slice %128 {offsets = [0, 128], sizes = [8, 128], strides = [1, 1]} : vector<8x512xf32> to vector<8x128xf32>
    %136 = arith.negf %135 : vector<8x128xf32>
    %137 = math.exp %136 : vector<8x128xf32>
    %cst_34 = arith.constant 1.000000e+00 : f32
    %138 = vector.broadcast %cst_34 : f32 to vector<8x128xf32>
    %139 = arith.addf %138, %137 : vector<8x128xf32>
    %140 = arith.divf %138, %139 : vector<8x128xf32>
    %141 = vector.extract_strided_slice %128 {offsets = [0, 256], sizes = [8, 128], strides = [1, 1]} : vector<8x512xf32> to vector<8x128xf32>
    %142 = math.tanh %141 : vector<8x128xf32>
    %143 = vector.extract_strided_slice %128 {offsets = [0, 384], sizes = [8, 128], strides = [1, 1]} : vector<8x512xf32> to vector<8x128xf32>
    %144 = arith.negf %143 : vector<8x128xf32>
    %145 = math.exp %144 : vector<8x128xf32>
    %cst_35 = arith.constant 1.000000e+00 : f32
    %146 = vector.broadcast %cst_35 : f32 to vector<8x128xf32>
    %147 = arith.addf %146, %145 : vector<8x128xf32>
    %148 = arith.divf %146, %147 : vector<8x128xf32>
    %149 = arith.mulf %140, %122 : vector<8x128xf32>
    %150 = arith.mulf %134, %142 : vector<8x128xf32>
    %151 = arith.addf %149, %150 : vector<8x128xf32>
    %152 = math.tanh %151 : vector<8x128xf32>
    %153 = arith.mulf %148, %152 : vector<8x128xf32>
    %c32 = arith.constant 32 : index
    %c0_36 = arith.constant 0 : index
    %154 = vector.load %arg14[%c32, %c0_36] : memref<64x128xf32, #tpu.memory_space<vmem>>, vector<8x128xf32>
    tpu.vector_store %arg14[%c32, %c0_36], %153 {strides = array<i32>} : memref<64x128xf32, #tpu.memory_space<vmem>>, vector<8x128xf32>,
    %155 = vector.extract_strided_slice %7 {offsets = [40, 0], sizes = [8, 512], strides = [1, 1]} : vector<64x512xf32> to vector<8x512xf32>
    %cst_37 = arith.constant dense<0.000000e+00> : vector<8x512xf32>
    %156 = tpu.matmul %153, %0, %cst_37 {dimension_numbers = #tpu.dot_dimension_numbers<[1], [0], [0], [1], [0, 0, 1, 1], [], []>} : vector<8x128xf32>, vector<128x512xf32>, vector<8x512xf32> -> vector<8x512xf32>
    %157 = arith.addf %155, %156 : vector<8x512xf32>
    %158 = vector.extract_strided_slice %157 {offsets = [0, 0], sizes = [8, 128], strides = [1, 1]} : vector<8x512xf32> to vector<8x128xf32>
    %159 = arith.negf %158 : vector<8x128xf32>
    %160 = math.exp %159 : vector<8x128xf32>
    %cst_38 = arith.constant 1.000000e+00 : f32
    %161 = vector.broadcast %cst_38 : f32 to vector<8x128xf32>
    %162 = arith.addf %161, %160 : vector<8x128xf32>
    %163 = arith.divf %161, %162 : vector<8x128xf32>
    %164 = vector.extract_strided_slice %157 {offsets = [0, 128], sizes = [8, 128], strides = [1, 1]} : vector<8x512xf32> to vector<8x128xf32>
    %165 = arith.negf %164 : vector<8x128xf32>
    %166 = math.exp %165 : vector<8x128xf32>
    %cst_39 = arith.constant 1.000000e+00 : f32
    %167 = vector.broadcast %cst_39 : f32 to vector<8x128xf32>
    %168 = arith.addf %167, %166 : vector<8x128xf32>
    %169 = arith.divf %167, %168 : vector<8x128xf32>
    %170 = vector.extract_strided_slice %157 {offsets = [0, 256], sizes = [8, 128], strides = [1, 1]} : vector<8x512xf32> to vector<8x128xf32>
    %171 = math.tanh %170 : vector<8x128xf32>
    %172 = vector.extract_strided_slice %157 {offsets = [0, 384], sizes = [8, 128], strides = [1, 1]} : vector<8x512xf32> to vector<8x128xf32>
    %173 = arith.negf %172 : vector<8x128xf32>
    %174 = math.exp %173 : vector<8x128xf32>
    %cst_40 = arith.constant 1.000000e+00 : f32
    %175 = vector.broadcast %cst_40 : f32 to vector<8x128xf32>
    %176 = arith.addf %175, %174 : vector<8x128xf32>
    %177 = arith.divf %175, %176 : vector<8x128xf32>
    %178 = arith.mulf %169, %151 : vector<8x128xf32>
    %179 = arith.mulf %163, %171 : vector<8x128xf32>
    %180 = arith.addf %178, %179 : vector<8x128xf32>
    %181 = math.tanh %180 : vector<8x128xf32>
    %182 = arith.mulf %177, %181 : vector<8x128xf32>
    %c40 = arith.constant 40 : index
    %c0_41 = arith.constant 0 : index
    %183 = vector.load %arg14[%c40, %c0_41] : memref<64x128xf32, #tpu.memory_space<vmem>>, vector<8x128xf32>
    tpu.vector_store %arg14[%c40, %c0_41], %182 {strides = array<i32>} : memref<64x128xf32, #tpu.memory_space<vmem>>, vector<8x128xf32>,
    %184 = vector.extract_strided_slice %7 {offsets = [48, 0], sizes = [8, 512], strides = [1, 1]} : vector<64x512xf32> to vector<8x512xf32>
    %cst_42 = arith.constant dense<0.000000e+00> : vector<8x512xf32>
    %185 = tpu.matmul %182, %0, %cst_42 {dimension_numbers = #tpu.dot_dimension_numbers<[1], [0], [0], [1], [0, 0, 1, 1], [], []>} : vector<8x128xf32>, vector<128x512xf32>, vector<8x512xf32> -> vector<8x512xf32>
    %186 = arith.addf %184, %185 : vector<8x512xf32>
    %187 = vector.extract_strided_slice %186 {offsets = [0, 0], sizes = [8, 128], strides = [1, 1]} : vector<8x512xf32> to vector<8x128xf32>
    %188 = arith.negf %187 : vector<8x128xf32>
    %189 = math.exp %188 : vector<8x128xf32>
    %cst_43 = arith.constant 1.000000e+00 : f32
    %190 = vector.broadcast %cst_43 : f32 to vector<8x128xf32>
    %191 = arith.addf %190, %189 : vector<8x128xf32>
    %192 = arith.divf %190, %191 : vector<8x128xf32>
    %193 = vector.extract_strided_slice %186 {offsets = [0, 128], sizes = [8, 128], strides = [1, 1]} : vector<8x512xf32> to vector<8x128xf32>
    %194 = arith.negf %193 : vector<8x128xf32>
    %195 = math.exp %194 : vector<8x128xf32>
    %cst_44 = arith.constant 1.000000e+00 : f32
    %196 = vector.broadcast %cst_44 : f32 to vector<8x128xf32>
    %197 = arith.addf %196, %195 : vector<8x128xf32>
    %198 = arith.divf %196, %197 : vector<8x128xf32>
    %199 = vector.extract_strided_slice %186 {offsets = [0, 256], sizes = [8, 128], strides = [1, 1]} : vector<8x512xf32> to vector<8x128xf32>
    %200 = math.tanh %199 : vector<8x128xf32>
    %201 = vector.extract_strided_slice %186 {offsets = [0, 384], sizes = [8, 128], strides = [1, 1]} : vector<8x512xf32> to vector<8x128xf32>
    %202 = arith.negf %201 : vector<8x128xf32>
    %203 = math.exp %202 : vector<8x128xf32>
    %cst_45 = arith.constant 1.000000e+00 : f32
    %204 = vector.broadcast %cst_45 : f32 to vector<8x128xf32>
    %205 = arith.addf %204, %203 : vector<8x128xf32>
    %206 = arith.divf %204, %205 : vector<8x128xf32>
    %207 = arith.mulf %198, %180 : vector<8x128xf32>
    %208 = arith.mulf %192, %200 : vector<8x128xf32>
    %209 = arith.addf %207, %208 : vector<8x128xf32>
    %210 = math.tanh %209 : vector<8x128xf32>
    %211 = arith.mulf %206, %210 : vector<8x128xf32>
    %c48 = arith.constant 48 : index
    %c0_46 = arith.constant 0 : index
    %212 = vector.load %arg14[%c48, %c0_46] : memref<64x128xf32, #tpu.memory_space<vmem>>, vector<8x128xf32>
    tpu.vector_store %arg14[%c48, %c0_46], %211 {strides = array<i32>} : memref<64x128xf32, #tpu.memory_space<vmem>>, vector<8x128xf32>,
    %213 = vector.extract_strided_slice %7 {offsets = [56, 0], sizes = [8, 512], strides = [1, 1]} : vector<64x512xf32> to vector<8x512xf32>
    %cst_47 = arith.constant dense<0.000000e+00> : vector<8x512xf32>
    %214 = tpu.matmul %211, %0, %cst_47 {dimension_numbers = #tpu.dot_dimension_numbers<[1], [0], [0], [1], [0, 0, 1, 1], [], []>} : vector<8x128xf32>, vector<128x512xf32>, vector<8x512xf32> -> vector<8x512xf32>
    %215 = arith.addf %213, %214 : vector<8x512xf32>
    %216 = vector.extract_strided_slice %215 {offsets = [0, 0], sizes = [8, 128], strides = [1, 1]} : vector<8x512xf32> to vector<8x128xf32>
    %217 = arith.negf %216 : vector<8x128xf32>
    %218 = math.exp %217 : vector<8x128xf32>
    %cst_48 = arith.constant 1.000000e+00 : f32
    %219 = vector.broadcast %cst_48 : f32 to vector<8x128xf32>
    %220 = arith.addf %219, %218 : vector<8x128xf32>
    %221 = arith.divf %219, %220 : vector<8x128xf32>
    %222 = vector.extract_strided_slice %215 {offsets = [0, 128], sizes = [8, 128], strides = [1, 1]} : vector<8x512xf32> to vector<8x128xf32>
    %223 = arith.negf %222 : vector<8x128xf32>
    %224 = math.exp %223 : vector<8x128xf32>
    %cst_49 = arith.constant 1.000000e+00 : f32
    %225 = vector.broadcast %cst_49 : f32 to vector<8x128xf32>
    %226 = arith.addf %225, %224 : vector<8x128xf32>
    %227 = arith.divf %225, %226 : vector<8x128xf32>
    %228 = vector.extract_strided_slice %215 {offsets = [0, 256], sizes = [8, 128], strides = [1, 1]} : vector<8x512xf32> to vector<8x128xf32>
    %229 = math.tanh %228 : vector<8x128xf32>
    %230 = vector.extract_strided_slice %215 {offsets = [0, 384], sizes = [8, 128], strides = [1, 1]} : vector<8x512xf32> to vector<8x128xf32>
    %231 = arith.negf %230 : vector<8x128xf32>
    %232 = math.exp %231 : vector<8x128xf32>
    %cst_50 = arith.constant 1.000000e+00 : f32
    %233 = vector.broadcast %cst_50 : f32 to vector<8x128xf32>
    %234 = arith.addf %233, %232 : vector<8x128xf32>
    %235 = arith.divf %233, %234 : vector<8x128xf32>
    %236 = arith.mulf %227, %209 : vector<8x128xf32>
    %237 = arith.mulf %221, %229 : vector<8x128xf32>
    %238 = arith.addf %236, %237 : vector<8x128xf32>
    %239 = math.tanh %238 : vector<8x128xf32>
    %240 = arith.mulf %235, %239 : vector<8x128xf32>
    %c56 = arith.constant 56 : index
    %c0_51 = arith.constant 0 : index
    %241 = vector.load %arg14[%c56, %c0_51] : memref<64x128xf32, #tpu.memory_space<vmem>>, vector<8x128xf32>
    tpu.vector_store %arg14[%c56, %c0_51], %240 {strides = array<i32>} : memref<64x128xf32, #tpu.memory_space<vmem>>, vector<8x128xf32>,
    %c0_52 = arith.constant 0 : index
    %c0_53 = arith.constant 0 : index
    %242 = vector.load %arg14[%c0_52, %c0_53] : memref<64x128xf32, #tpu.memory_space<vmem>>, vector<64x128xf32>
    %c0_54 = arith.constant 0 : index
    %c0_55 = arith.constant 0 : index
    %243 = vector.load %arg4[%c0_54, %c0_55] : memref<128x512xf32, #tpu.memory_space<vmem>>, vector<128x512xf32>
    %cst_56 = arith.constant dense<0.000000e+00> : vector<64x512xf32>
    %244 = tpu.matmul %242, %243, %cst_56 {dimension_numbers = #tpu.dot_dimension_numbers<[1], [0], [0], [1], [0, 0, 1, 1], [], []>} : vector<64x128xf32>, vector<128x512xf32>, vector<64x512xf32> -> vector<64x512xf32>
    %c0_57 = arith.constant 0 : index
    %c0_58 = arith.constant 0 : index
    %245 = vector.load %arg6[%c0_57, %c0_58] : memref<1x512xf32, #tpu.memory_space<vmem>>, vector<1x512xf32>
    %246 = vector.broadcast %245 : vector<1x512xf32> to vector<64x512xf32>
    %247 = arith.addf %244, %246 : vector<64x512xf32>
    %cst_59 = arith.constant 0.000000e+00 : f32
    %248 = vector.broadcast %cst_59 : f32 to vector<8x128xf32>
    %cst_60 = arith.constant 0.000000e+00 : f32
    %249 = vector.broadcast %cst_60 : f32 to vector<8x128xf32>
    %250 = vector.extract_strided_slice %247 {offsets = [0, 0], sizes = [8, 512], strides = [1, 1]} : vector<64x512xf32> to vector<8x512xf32>
    %cst_61 = arith.constant dense<0.000000e+00> : vector<8x512xf32>
    %251 = tpu.matmul %248, %1, %cst_61 {dimension_numbers = #tpu.dot_dimension_numbers<[1], [0], [0], [1], [0, 0, 1, 1], [], []>} : vector<8x128xf32>, vector<128x512xf32>, vector<8x512xf32> -> vector<8x512xf32>
    %252 = arith.addf %250, %251 : vector<8x512xf32>
    %253 = vector.extract_strided_slice %252 {offsets = [0, 0], sizes = [8, 128], strides = [1, 1]} : vector<8x512xf32> to vector<8x128xf32>
    %254 = arith.negf %253 : vector<8x128xf32>
    %255 = math.exp %254 : vector<8x128xf32>
    %cst_62 = arith.constant 1.000000e+00 : f32
    %256 = vector.broadcast %cst_62 : f32 to vector<8x128xf32>
    %257 = arith.addf %256, %255 : vector<8x128xf32>
    %258 = arith.divf %256, %257 : vector<8x128xf32>
    %259 = vector.extract_strided_slice %252 {offsets = [0, 128], sizes = [8, 128], strides = [1, 1]} : vector<8x512xf32> to vector<8x128xf32>
    %260 = arith.negf %259 : vector<8x128xf32>
    %261 = math.exp %260 : vector<8x128xf32>
    %cst_63 = arith.constant 1.000000e+00 : f32
    %262 = vector.broadcast %cst_63 : f32 to vector<8x128xf32>
    %263 = arith.addf %262, %261 : vector<8x128xf32>
    %264 = arith.divf %262, %263 : vector<8x128xf32>
    %265 = vector.extract_strided_slice %252 {offsets = [0, 256], sizes = [8, 128], strides = [1, 1]} : vector<8x512xf32> to vector<8x128xf32>
    %266 = math.tanh %265 : vector<8x128xf32>
    %267 = vector.extract_strided_slice %252 {offsets = [0, 384], sizes = [8, 128], strides = [1, 1]} : vector<8x512xf32> to vector<8x128xf32>
    %268 = arith.negf %267 : vector<8x128xf32>
    %269 = math.exp %268 : vector<8x128xf32>
    %cst_64 = arith.constant 1.000000e+00 : f32
    %270 = vector.broadcast %cst_64 : f32 to vector<8x128xf32>
    %271 = arith.addf %270, %269 : vector<8x128xf32>
    %272 = arith.divf %270, %271 : vector<8x128xf32>
    %273 = arith.mulf %264, %249 : vector<8x128xf32>
    %274 = arith.mulf %258, %266 : vector<8x128xf32>
    %275 = arith.addf %273, %274 : vector<8x128xf32>
    %276 = math.tanh %275 : vector<8x128xf32>
    %277 = arith.mulf %272, %276 : vector<8x128xf32>
    %278 = vector.extract_strided_slice %247 {offsets = [8, 0], sizes = [8, 512], strides = [1, 1]} : vector<64x512xf32> to vector<8x512xf32>
    %cst_65 = arith.constant dense<0.000000e+00> : vector<8x512xf32>
    %279 = tpu.matmul %277, %1, %cst_65 {dimension_numbers = #tpu.dot_dimension_numbers<[1], [0], [0], [1], [0, 0, 1, 1], [], []>} : vector<8x128xf32>, vector<128x512xf32>, vector<8x512xf32> -> vector<8x512xf32>
    %280 = arith.addf %278, %279 : vector<8x512xf32>
    %281 = vector.extract_strided_slice %280 {offsets = [0, 0], sizes = [8, 128], strides = [1, 1]} : vector<8x512xf32> to vector<8x128xf32>
    %282 = arith.negf %281 : vector<8x128xf32>
    %283 = math.exp %282 : vector<8x128xf32>
    %cst_66 = arith.constant 1.000000e+00 : f32
    %284 = vector.broadcast %cst_66 : f32 to vector<8x128xf32>
    %285 = arith.addf %284, %283 : vector<8x128xf32>
    %286 = arith.divf %284, %285 : vector<8x128xf32>
    %287 = vector.extract_strided_slice %280 {offsets = [0, 128], sizes = [8, 128], strides = [1, 1]} : vector<8x512xf32> to vector<8x128xf32>
    %288 = arith.negf %287 : vector<8x128xf32>
    %289 = math.exp %288 : vector<8x128xf32>
    %cst_67 = arith.constant 1.000000e+00 : f32
    %290 = vector.broadcast %cst_67 : f32 to vector<8x128xf32>
    %291 = arith.addf %290, %289 : vector<8x128xf32>
    %292 = arith.divf %290, %291 : vector<8x128xf32>
    %293 = vector.extract_strided_slice %280 {offsets = [0, 256], sizes = [8, 128], strides = [1, 1]} : vector<8x512xf32> to vector<8x128xf32>
    %294 = math.tanh %293 : vector<8x128xf32>
    %295 = vector.extract_strided_slice %280 {offsets = [0, 384], sizes = [8, 128], strides = [1, 1]} : vector<8x512xf32> to vector<8x128xf32>
    %296 = arith.negf %295 : vector<8x128xf32>
    %297 = math.exp %296 : vector<8x128xf32>
    %cst_68 = arith.constant 1.000000e+00 : f32
    %298 = vector.broadcast %cst_68 : f32 to vector<8x128xf32>
    %299 = arith.addf %298, %297 : vector<8x128xf32>
    %300 = arith.divf %298, %299 : vector<8x128xf32>
    %301 = arith.mulf %292, %275 : vector<8x128xf32>
    %302 = arith.mulf %286, %294 : vector<8x128xf32>
    %303 = arith.addf %301, %302 : vector<8x128xf32>
    %304 = math.tanh %303 : vector<8x128xf32>
    %305 = arith.mulf %300, %304 : vector<8x128xf32>
    %306 = vector.extract_strided_slice %247 {offsets = [16, 0], sizes = [8, 512], strides = [1, 1]} : vector<64x512xf32> to vector<8x512xf32>
    %cst_69 = arith.constant dense<0.000000e+00> : vector<8x512xf32>
    %307 = tpu.matmul %305, %1, %cst_69 {dimension_numbers = #tpu.dot_dimension_numbers<[1], [0], [0], [1], [0, 0, 1, 1], [], []>} : vector<8x128xf32>, vector<128x512xf32>, vector<8x512xf32> -> vector<8x512xf32>
    %308 = arith.addf %306, %307 : vector<8x512xf32>
    %309 = vector.extract_strided_slice %308 {offsets = [0, 0], sizes = [8, 128], strides = [1, 1]} : vector<8x512xf32> to vector<8x128xf32>
    %310 = arith.negf %309 : vector<8x128xf32>
    %311 = math.exp %310 : vector<8x128xf32>
    %cst_70 = arith.constant 1.000000e+00 : f32
    %312 = vector.broadcast %cst_70 : f32 to vector<8x128xf32>
    %313 = arith.addf %312, %311 : vector<8x128xf32>
    %314 = arith.divf %312, %313 : vector<8x128xf32>
    %315 = vector.extract_strided_slice %308 {offsets = [0, 128], sizes = [8, 128], strides = [1, 1]} : vector<8x512xf32> to vector<8x128xf32>
    %316 = arith.negf %315 : vector<8x128xf32>
    %317 = math.exp %316 : vector<8x128xf32>
    %cst_71 = arith.constant 1.000000e+00 : f32
    %318 = vector.broadcast %cst_71 : f32 to vector<8x128xf32>
    %319 = arith.addf %318, %317 : vector<8x128xf32>
    %320 = arith.divf %318, %319 : vector<8x128xf32>
    %321 = vector.extract_strided_slice %308 {offsets = [0, 256], sizes = [8, 128], strides = [1, 1]} : vector<8x512xf32> to vector<8x128xf32>
    %322 = math.tanh %321 : vector<8x128xf32>
    %323 = vector.extract_strided_slice %308 {offsets = [0, 384], sizes = [8, 128], strides = [1, 1]} : vector<8x512xf32> to vector<8x128xf32>
    %324 = arith.negf %323 : vector<8x128xf32>
    %325 = math.exp %324 : vector<8x128xf32>
    %cst_72 = arith.constant 1.000000e+00 : f32
    %326 = vector.broadcast %cst_72 : f32 to vector<8x128xf32>
    %327 = arith.addf %326, %325 : vector<8x128xf32>
    %328 = arith.divf %326, %327 : vector<8x128xf32>
    %329 = arith.mulf %320, %303 : vector<8x128xf32>
    %330 = arith.mulf %314, %322 : vector<8x128xf32>
    %331 = arith.addf %329, %330 : vector<8x128xf32>
    %332 = math.tanh %331 : vector<8x128xf32>
    %333 = arith.mulf %328, %332 : vector<8x128xf32>
    %334 = vector.extract_strided_slice %247 {offsets = [24, 0], sizes = [8, 512], strides = [1, 1]} : vector<64x512xf32> to vector<8x512xf32>
    %cst_73 = arith.constant dense<0.000000e+00> : vector<8x512xf32>
    %335 = tpu.matmul %333, %1, %cst_73 {dimension_numbers = #tpu.dot_dimension_numbers<[1], [0], [0], [1], [0, 0, 1, 1], [], []>} : vector<8x128xf32>, vector<128x512xf32>, vector<8x512xf32> -> vector<8x512xf32>
    %336 = arith.addf %334, %335 : vector<8x512xf32>
    %337 = vector.extract_strided_slice %336 {offsets = [0, 0], sizes = [8, 128], strides = [1, 1]} : vector<8x512xf32> to vector<8x128xf32>
    %338 = arith.negf %337 : vector<8x128xf32>
    %339 = math.exp %338 : vector<8x128xf32>
    %cst_74 = arith.constant 1.000000e+00 : f32
    %340 = vector.broadcast %cst_74 : f32 to vector<8x128xf32>
    %341 = arith.addf %340, %339 : vector<8x128xf32>
    %342 = arith.divf %340, %341 : vector<8x128xf32>
    %343 = vector.extract_strided_slice %336 {offsets = [0, 128], sizes = [8, 128], strides = [1, 1]} : vector<8x512xf32> to vector<8x128xf32>
    %344 = arith.negf %343 : vector<8x128xf32>
    %345 = math.exp %344 : vector<8x128xf32>
    %cst_75 = arith.constant 1.000000e+00 : f32
    %346 = vector.broadcast %cst_75 : f32 to vector<8x128xf32>
    %347 = arith.addf %346, %345 : vector<8x128xf32>
    %348 = arith.divf %346, %347 : vector<8x128xf32>
    %349 = vector.extract_strided_slice %336 {offsets = [0, 256], sizes = [8, 128], strides = [1, 1]} : vector<8x512xf32> to vector<8x128xf32>
    %350 = math.tanh %349 : vector<8x128xf32>
    %351 = vector.extract_strided_slice %336 {offsets = [0, 384], sizes = [8, 128], strides = [1, 1]} : vector<8x512xf32> to vector<8x128xf32>
    %352 = arith.negf %351 : vector<8x128xf32>
    %353 = math.exp %352 : vector<8x128xf32>
    %cst_76 = arith.constant 1.000000e+00 : f32
    %354 = vector.broadcast %cst_76 : f32 to vector<8x128xf32>
    %355 = arith.addf %354, %353 : vector<8x128xf32>
    %356 = arith.divf %354, %355 : vector<8x128xf32>
    %357 = arith.mulf %348, %331 : vector<8x128xf32>
    %358 = arith.mulf %342, %350 : vector<8x128xf32>
    %359 = arith.addf %357, %358 : vector<8x128xf32>
    %360 = math.tanh %359 : vector<8x128xf32>
    %361 = arith.mulf %356, %360 : vector<8x128xf32>
    %362 = vector.extract_strided_slice %247 {offsets = [32, 0], sizes = [8, 512], strides = [1, 1]} : vector<64x512xf32> to vector<8x512xf32>
    %cst_77 = arith.constant dense<0.000000e+00> : vector<8x512xf32>
    %363 = tpu.matmul %361, %1, %cst_77 {dimension_numbers = #tpu.dot_dimension_numbers<[1], [0], [0], [1], [0, 0, 1, 1], [], []>} : vector<8x128xf32>, vector<128x512xf32>, vector<8x512xf32> -> vector<8x512xf32>
    %364 = arith.addf %362, %363 : vector<8x512xf32>
    %365 = vector.extract_strided_slice %364 {offsets = [0, 0], sizes = [8, 128], strides = [1, 1]} : vector<8x512xf32> to vector<8x128xf32>
    %366 = arith.negf %365 : vector<8x128xf32>
    %367 = math.exp %366 : vector<8x128xf32>
    %cst_78 = arith.constant 1.000000e+00 : f32
    %368 = vector.broadcast %cst_78 : f32 to vector<8x128xf32>
    %369 = arith.addf %368, %367 : vector<8x128xf32>
    %370 = arith.divf %368, %369 : vector<8x128xf32>
    %371 = vector.extract_strided_slice %364 {offsets = [0, 128], sizes = [8, 128], strides = [1, 1]} : vector<8x512xf32> to vector<8x128xf32>
    %372 = arith.negf %371 : vector<8x128xf32>
    %373 = math.exp %372 : vector<8x128xf32>
    %cst_79 = arith.constant 1.000000e+00 : f32
    %374 = vector.broadcast %cst_79 : f32 to vector<8x128xf32>
    %375 = arith.addf %374, %373 : vector<8x128xf32>
    %376 = arith.divf %374, %375 : vector<8x128xf32>
    %377 = vector.extract_strided_slice %364 {offsets = [0, 256], sizes = [8, 128], strides = [1, 1]} : vector<8x512xf32> to vector<8x128xf32>
    %378 = math.tanh %377 : vector<8x128xf32>
    %379 = vector.extract_strided_slice %364 {offsets = [0, 384], sizes = [8, 128], strides = [1, 1]} : vector<8x512xf32> to vector<8x128xf32>
    %380 = arith.negf %379 : vector<8x128xf32>
    %381 = math.exp %380 : vector<8x128xf32>
    %cst_80 = arith.constant 1.000000e+00 : f32
    %382 = vector.broadcast %cst_80 : f32 to vector<8x128xf32>
    %383 = arith.addf %382, %381 : vector<8x128xf32>
    %384 = arith.divf %382, %383 : vector<8x128xf32>
    %385 = arith.mulf %376, %359 : vector<8x128xf32>
    %386 = arith.mulf %370, %378 : vector<8x128xf32>
    %387 = arith.addf %385, %386 : vector<8x128xf32>
    %388 = math.tanh %387 : vector<8x128xf32>
    %389 = arith.mulf %384, %388 : vector<8x128xf32>
    %390 = vector.extract_strided_slice %247 {offsets = [40, 0], sizes = [8, 512], strides = [1, 1]} : vector<64x512xf32> to vector<8x512xf32>
    %cst_81 = arith.constant dense<0.000000e+00> : vector<8x512xf32>
    %391 = tpu.matmul %389, %1, %cst_81 {dimension_numbers = #tpu.dot_dimension_numbers<[1], [0], [0], [1], [0, 0, 1, 1], [], []>} : vector<8x128xf32>, vector<128x512xf32>, vector<8x512xf32> -> vector<8x512xf32>
    %392 = arith.addf %390, %391 : vector<8x512xf32>
    %393 = vector.extract_strided_slice %392 {offsets = [0, 0], sizes = [8, 128], strides = [1, 1]} : vector<8x512xf32> to vector<8x128xf32>
    %394 = arith.negf %393 : vector<8x128xf32>
    %395 = math.exp %394 : vector<8x128xf32>
    %cst_82 = arith.constant 1.000000e+00 : f32
    %396 = vector.broadcast %cst_82 : f32 to vector<8x128xf32>
    %397 = arith.addf %396, %395 : vector<8x128xf32>
    %398 = arith.divf %396, %397 : vector<8x128xf32>
    %399 = vector.extract_strided_slice %392 {offsets = [0, 128], sizes = [8, 128], strides = [1, 1]} : vector<8x512xf32> to vector<8x128xf32>
    %400 = arith.negf %399 : vector<8x128xf32>
    %401 = math.exp %400 : vector<8x128xf32>
    %cst_83 = arith.constant 1.000000e+00 : f32
    %402 = vector.broadcast %cst_83 : f32 to vector<8x128xf32>
    %403 = arith.addf %402, %401 : vector<8x128xf32>
    %404 = arith.divf %402, %403 : vector<8x128xf32>
    %405 = vector.extract_strided_slice %392 {offsets = [0, 256], sizes = [8, 128], strides = [1, 1]} : vector<8x512xf32> to vector<8x128xf32>
    %406 = math.tanh %405 : vector<8x128xf32>
    %407 = vector.extract_strided_slice %392 {offsets = [0, 384], sizes = [8, 128], strides = [1, 1]} : vector<8x512xf32> to vector<8x128xf32>
    %408 = arith.negf %407 : vector<8x128xf32>
    %409 = math.exp %408 : vector<8x128xf32>
    %cst_84 = arith.constant 1.000000e+00 : f32
    %410 = vector.broadcast %cst_84 : f32 to vector<8x128xf32>
    %411 = arith.addf %410, %409 : vector<8x128xf32>
    %412 = arith.divf %410, %411 : vector<8x128xf32>
    %413 = arith.mulf %404, %387 : vector<8x128xf32>
    %414 = arith.mulf %398, %406 : vector<8x128xf32>
    %415 = arith.addf %413, %414 : vector<8x128xf32>
    %416 = math.tanh %415 : vector<8x128xf32>
    %417 = arith.mulf %412, %416 : vector<8x128xf32>
    %418 = vector.extract_strided_slice %247 {offsets = [48, 0], sizes = [8, 512], strides = [1, 1]} : vector<64x512xf32> to vector<8x512xf32>
    %cst_85 = arith.constant dense<0.000000e+00> : vector<8x512xf32>
    %419 = tpu.matmul %417, %1, %cst_85 {dimension_numbers = #tpu.dot_dimension_numbers<[1], [0], [0], [1], [0, 0, 1, 1], [], []>} : vector<8x128xf32>, vector<128x512xf32>, vector<8x512xf32> -> vector<8x512xf32>
    %420 = arith.addf %418, %419 : vector<8x512xf32>
    %421 = vector.extract_strided_slice %420 {offsets = [0, 0], sizes = [8, 128], strides = [1, 1]} : vector<8x512xf32> to vector<8x128xf32>
    %422 = arith.negf %421 : vector<8x128xf32>
    %423 = math.exp %422 : vector<8x128xf32>
    %cst_86 = arith.constant 1.000000e+00 : f32
    %424 = vector.broadcast %cst_86 : f32 to vector<8x128xf32>
    %425 = arith.addf %424, %423 : vector<8x128xf32>
    %426 = arith.divf %424, %425 : vector<8x128xf32>
    %427 = vector.extract_strided_slice %420 {offsets = [0, 128], sizes = [8, 128], strides = [1, 1]} : vector<8x512xf32> to vector<8x128xf32>
    %428 = arith.negf %427 : vector<8x128xf32>
    %429 = math.exp %428 : vector<8x128xf32>
    %cst_87 = arith.constant 1.000000e+00 : f32
    %430 = vector.broadcast %cst_87 : f32 to vector<8x128xf32>
    %431 = arith.addf %430, %429 : vector<8x128xf32>
    %432 = arith.divf %430, %431 : vector<8x128xf32>
    %433 = vector.extract_strided_slice %420 {offsets = [0, 256], sizes = [8, 128], strides = [1, 1]} : vector<8x512xf32> to vector<8x128xf32>
    %434 = math.tanh %433 : vector<8x128xf32>
    %435 = vector.extract_strided_slice %420 {offsets = [0, 384], sizes = [8, 128], strides = [1, 1]} : vector<8x512xf32> to vector<8x128xf32>
    %436 = arith.negf %435 : vector<8x128xf32>
    %437 = math.exp %436 : vector<8x128xf32>
    %cst_88 = arith.constant 1.000000e+00 : f32
    %438 = vector.broadcast %cst_88 : f32 to vector<8x128xf32>
    %439 = arith.addf %438, %437 : vector<8x128xf32>
    %440 = arith.divf %438, %439 : vector<8x128xf32>
    %441 = arith.mulf %432, %415 : vector<8x128xf32>
    %442 = arith.mulf %426, %434 : vector<8x128xf32>
    %443 = arith.addf %441, %442 : vector<8x128xf32>
    %444 = math.tanh %443 : vector<8x128xf32>
    %445 = arith.mulf %440, %444 : vector<8x128xf32>
    %446 = vector.extract_strided_slice %247 {offsets = [56, 0], sizes = [8, 512], strides = [1, 1]} : vector<64x512xf32> to vector<8x512xf32>
    %cst_89 = arith.constant dense<0.000000e+00> : vector<8x512xf32>
    %447 = tpu.matmul %445, %1, %cst_89 {dimension_numbers = #tpu.dot_dimension_numbers<[1], [0], [0], [1], [0, 0, 1, 1], [], []>} : vector<8x128xf32>, vector<128x512xf32>, vector<8x512xf32> -> vector<8x512xf32>
    %448 = arith.addf %446, %447 : vector<8x512xf32>
    %449 = vector.extract_strided_slice %448 {offsets = [0, 0], sizes = [8, 128], strides = [1, 1]} : vector<8x512xf32> to vector<8x128xf32>
    %450 = arith.negf %449 : vector<8x128xf32>
    %451 = math.exp %450 : vector<8x128xf32>
    %cst_90 = arith.constant 1.000000e+00 : f32
    %452 = vector.broadcast %cst_90 : f32 to vector<8x128xf32>
    %453 = arith.addf %452, %451 : vector<8x128xf32>
    %454 = arith.divf %452, %453 : vector<8x128xf32>
    %455 = vector.extract_strided_slice %448 {offsets = [0, 128], sizes = [8, 128], strides = [1, 1]} : vector<8x512xf32> to vector<8x128xf32>
    %456 = arith.negf %455 : vector<8x128xf32>
    %457 = math.exp %456 : vector<8x128xf32>
    %cst_91 = arith.constant 1.000000e+00 : f32
    %458 = vector.broadcast %cst_91 : f32 to vector<8x128xf32>
    %459 = arith.addf %458, %457 : vector<8x128xf32>
    %460 = arith.divf %458, %459 : vector<8x128xf32>
    %461 = vector.extract_strided_slice %448 {offsets = [0, 256], sizes = [8, 128], strides = [1, 1]} : vector<8x512xf32> to vector<8x128xf32>
    %462 = math.tanh %461 : vector<8x128xf32>
    %463 = vector.extract_strided_slice %448 {offsets = [0, 384], sizes = [8, 128], strides = [1, 1]} : vector<8x512xf32> to vector<8x128xf32>
    %464 = arith.negf %463 : vector<8x128xf32>
    %465 = math.exp %464 : vector<8x128xf32>
    %cst_92 = arith.constant 1.000000e+00 : f32
    %466 = vector.broadcast %cst_92 : f32 to vector<8x128xf32>
    %467 = arith.addf %466, %465 : vector<8x128xf32>
    %468 = arith.divf %466, %467 : vector<8x128xf32>
    %469 = arith.mulf %460, %443 : vector<8x128xf32>
    %470 = arith.mulf %454, %462 : vector<8x128xf32>
    %471 = arith.addf %469, %470 : vector<8x128xf32>
    %472 = math.tanh %471 : vector<8x128xf32>
    %473 = arith.mulf %468, %472 : vector<8x128xf32>
    %c0_93 = arith.constant 0 : index
    %c0_94 = arith.constant 0 : index
    %474 = vector.load %arg7[%c0_93, %c0_94] : memref<128x128xf32, #tpu.memory_space<vmem>>, vector<128x128xf32>
    %cst_95 = arith.constant dense<0.000000e+00> : vector<8x128xf32>
    %475 = tpu.matmul %473, %474, %cst_95 {dimension_numbers = #tpu.dot_dimension_numbers<[1], [0], [0], [1], [0, 0, 1, 1], [], []>} : vector<8x128xf32>, vector<128x128xf32>, vector<8x128xf32> -> vector<8x128xf32>
    %c0_96 = arith.constant 0 : index
    %c0_97 = arith.constant 0 : index
    %476 = vector.load %arg8[%c0_96, %c0_97] : memref<1x128xf32, #tpu.memory_space<vmem>>, vector<1x128xf32>
    %477 = vector.broadcast %476 : vector<1x128xf32> to vector<8x128xf32>
    %478 = arith.addf %475, %477 : vector<8x128xf32>
    %cst_98 = arith.constant 0.000000e+00 : f32
    %479 = vector.broadcast %cst_98 : f32 to vector<8x128xf32>
    %480 = arith.maximumf %478, %479 : vector<8x128xf32>
    %c0_99 = arith.constant 0 : index
    %c0_100 = arith.constant 0 : index
    %481 = vector.load %arg9[%c0_99, %c0_100] : memref<128x128xf32, #tpu.memory_space<vmem>>, vector<128x128xf32>
    %cst_101 = arith.constant dense<0.000000e+00> : vector<8x128xf32>
    %482 = tpu.matmul %480, %481, %cst_101 {dimension_numbers = #tpu.dot_dimension_numbers<[1], [0], [0], [1], [0, 0, 1, 1], [], []>} : vector<8x128xf32>, vector<128x128xf32>, vector<8x128xf32> -> vector<8x128xf32>
    %c0_102 = arith.constant 0 : index
    %c0_103 = arith.constant 0 : index
    %483 = vector.load %arg10[%c0_102, %c0_103] : memref<1x128xf32, #tpu.memory_space<vmem>>, vector<1x128xf32>
    %484 = vector.broadcast %483 : vector<1x128xf32> to vector<8x128xf32>
    %485 = arith.addf %482, %484 : vector<8x128xf32>
    %cst_104 = arith.constant 0.000000e+00 : f32
    %486 = vector.broadcast %cst_104 : f32 to vector<8x128xf32>
    %487 = arith.maximumf %485, %486 : vector<8x128xf32>
    %c0_105 = arith.constant 0 : index
    %c0_106 = arith.constant 0 : index
    %488 = vector.load %arg11[%c0_105, %c0_106] : memref<128x1xf32, #tpu.memory_space<vmem>>, vector<128x1xf32>
    %cst_107 = arith.constant dense<0.000000e+00> : vector<8x1xf32>
    %489 = tpu.matmul %487, %488, %cst_107 {dimension_numbers = #tpu.dot_dimension_numbers<[1], [0], [0], [1], [0, 0, 1, 1], [], []>} : vector<8x128xf32>, vector<128x1xf32>, vector<8x1xf32> -> vector<8x1xf32>
    %c0_108 = arith.constant 0 : index
    %c0_109 = arith.constant 0 : index
    %490 = vector.load %arg12[%c0_108, %c0_109] : memref<1x1xf32, #tpu.memory_space<vmem>>, vector<1x1xf32>
    %491 = vector.broadcast %490 : vector<1x1xf32> to vector<8x1xf32>
    %492 = arith.addf %489, %491 : vector<8x1xf32>
    %493 = arith.negf %492 : vector<8x1xf32>
    %494 = math.exp %493 : vector<8x1xf32>
    %cst_110 = arith.constant 1.000000e+00 : f32
    %495 = vector.broadcast %cst_110 : f32 to vector<8x1xf32>
    %496 = arith.addf %495, %494 : vector<8x1xf32>
    %497 = arith.divf %495, %496 : vector<8x1xf32>
    %c0_111 = arith.constant 0 : index
    %c0_112 = arith.constant 0 : index
    %498 = vector.load %arg13[%c0_111, %c0_112] : memref<8x1xf32, #tpu.memory_space<vmem>>, vector<8x1xf32>
    tpu.vector_store %arg13[%c0_111, %c0_112], %497 {strides = array<i32>} : memref<8x1xf32, #tpu.memory_space<vmem>>, vector<8x1xf32>,
    return
  }
}

</mosaic_0001>

<bundles_post_ra>
// kernel: tpu_custom_call.1
= control target key start
LH: loop header
LB: loop body
LE: loop exit
PB: predicated region body
PF: predicated region fallthrough
CT: control target
= control target key end

     0   :  { %s7015_s0 = inlined_call_operand.vmem [shape: f32[64,16], index: 0, kind: input, shape index: {}]   ;;  %s7016_s1 = inlined_call_operand.vmem [shape: f32[16,512], index: 1, kind: input, shape index: {}]   ;;  %s7017_s2 = inlined_call_operand.hbm [shape: f32[128,512], index: 2, kind: input, shape index: {}]   ;;  %s7018_s3 = inlined_call_operand.vmem [shape: f32[1,512], index: 3, kind: input, shape index: {}]   ;;  %s7019_s4 = inlined_call_operand.hbm [shape: f32[128,512], index: 4, kind: input, shape index: {}]   ;;  %s7020_s5 = inlined_call_operand.hbm [shape: f32[128,512], index: 5, kind: input, shape index: {}]   ;;  %s7021_s6 = inlined_call_operand.vmem [shape: f32[1,512], index: 6, kind: input, shape index: {}]   ;;  %s7022_s7 = inlined_call_operand.vmem [shape: f32[128,128], index: 7, kind: input, shape index: {}]   ;;  %s7023_s8 = inlined_call_operand.vmem [shape: f32[1,128], index: 8, kind: input, shape index: {}]   ;;  %s7024_s9 = inlined_call_operand.hbm [shape: f32[128,128], index: 9, kind: input, shape index: {}]   ;;  %s7025_s10 = inlined_call_operand.vmem [shape: f32[1,128], index: 10, kind: input, shape index: {}]   ;;  %s7026_s11 = inlined_call_operand.vmem [shape: f32[128,1], index: 11, kind: input, shape index: {}]   ;;  %s7027_s12 = inlined_call_operand.<no memory space> [shape: f32[1,1], index: 12, kind: input, shape index: {}]   ;;  %s7028_s13 = inlined_call_operand.vmem [shape: f32[8,1], index: 13, kind: output, shape index: {}]  }
   0x1   :  { %v18_v0 = vstv %s7027_s12 }
   0x2   :  { %19 = vst [vmem:[#allocation3] sm:$0x1] %v18_v0 }
   0x3   :  { %20 = vsyncpa [#allocation5], 0 }
   0x4   :  { %21 = vsyncpa [#allocation7], 0 }
   0x5   :  { %22 = vsyncpa [#allocation10], 0  ;;  %s5747_s27 = smov [#allocation6]   ;;  %s5748_s29 = smov [#allocation4]  }
   0x6   :  { %s46_s28 = sshll.u32 %s5747_s27, 4  ;;  %s32_s30 = sshll.u32 %s5748_s29, 4  ;;  %s47_s28 = int_to_ptr.vmem [resolvable:$true] %s46_s28  ;;  %s5831_s30 = int_to_ptr.vmem [resolvable:$true] %s32_s30 }
   0x7   :  { %s5653_s16 = scalar_lea.hbm %s7019_s4, 8192 }
   0x8   :  { %p5654_p0 = scmp.ne.s32.totalorder %s7019_s4, %s5653_s16  ;;  %p5657_p1 = scmp.lt.u32.totalorder %s5653_s16, %s7019_s4 }
   0xa   :  { %p5659_p2 = pnand %p5657_p1, %p5654_p0 }
   0xc   :  { %5662 = shalt.err (!%p5659_p2)
}
   0xd   :  { %s5663_s20 = scalar_lea.vmem %s47_s28, 8192  ;;  %p5668_p4 = scmp.lt.s32.totalorder %s47_s28, %s47_s28 }
   0xe   :  { %p5664_p3 = scmp.ne.s32.totalorder %s47_s28, %s5663_s20  ;;  %p5669_p5 = scmp.lt.s32.totalorder %s5663_s20, %s5663_s20 }
  0x10   :  { %p5670_p6 = por %p5669_p5, %p5668_p4 }
  0x12   :  { %p5671_p7 = pnand %p5670_p6, %p5664_p3 }
  0x14   :  { %5674 = shalt.err (!%p5671_p7)
}
  0x15   :  { %s5749_s21 = smov 512   ;;  %s5750_s22 = smov 32  }
  0x16   :  { %52 = dma.hbm_to_vmem [thread:$0]  %s7019_s4, 8192, %s47_s28, [#allocation7], %s5749_s21, %s5749_s21, %s5750_s22  }
  0x17   :  { %s5675_s27 = scalar_lea.hbm %s7017_s2, 8192 }
  0x18   :  { %p5676_p8 = scmp.ne.s32.totalorder %s7017_s2, %s5675_s27  ;;  %p5679_p9 = scmp.lt.u32.totalorder %s5675_s27, %s7017_s2 }
  0x1a   :  { %p5681_p10 = pnand %p5679_p9, %p5676_p8 }
  0x1c   :  { %5684 = shalt.err (!%p5681_p10)
}
  0x1d   :  { %s5685_s17 = scalar_lea.vmem %s5831_s30, 8192  ;;  %p5690_p12 = scmp.lt.s32.totalorder %s5831_s30, %s5831_s30 }
  0x1e   :  { %p5686_p11 = scmp.ne.s32.totalorder %s5831_s30, %s5685_s17  ;;  %p5691_p13 = scmp.lt.s32.totalorder %s5685_s17, %s5685_s17 }
  0x20   :  { %p5692_p0 = por %p5691_p13, %p5690_p12 }
  0x22   :  { %p5693_p1 = pnand %p5692_p0, %p5686_p11 }
  0x24   :  { %5696 = shalt.err (!%p5693_p1)
}
  0x25   :  { %38 = dma.hbm_to_vmem [thread:$0]  %s7017_s2, 8192, %s5831_s30, [#allocation5], %s5749_s21, %s5749_s21, %s5750_s22  }
  0x26   :  { %s5751_s18 = smov [#allocation8]   ;;  %s5752_s19 = smov [#allocation9]  }
  0x27   :  { %s58_s12 = sshll.u32 %s5751_s18, 4  ;;  %s76_s20 = sshll.u32 %s5752_s19, 4  ;;  %s59_s12 = int_to_ptr.vmem [resolvable:$true] %s58_s12  ;;  %s5868_s20 = int_to_ptr.vmem [resolvable:$true] %s76_s20 }
  0x28   :  { %s5697_s25 = scalar_lea.hbm %s7020_s5, 8192 }
  0x29   :  { %p5698_p2 = scmp.ne.s32.totalorder %s7020_s5, %s5697_s25  ;;  %p5701_p3 = scmp.lt.u32.totalorder %s5697_s25, %s7020_s5 }
  0x2b   :  { %p5703_p4 = pnand %p5701_p3, %p5698_p2 }
  0x2d   :  { %5706 = shalt.err (!%p5703_p4)
}
  0x2e   :  { %s5707_s2 = scalar_lea.vmem %s59_s12, 8192  ;;  %p5712_p6 = scmp.lt.s32.totalorder %s59_s12, %s59_s12 }
  0x2f   :  { %p5708_p5 = scmp.ne.s32.totalorder %s59_s12, %s5707_s2  ;;  %p5713_p7 = scmp.lt.s32.totalorder %s5707_s2, %s5707_s2 }
  0x31   :  { %p5714_p8 = por %p5713_p7, %p5712_p6 }
  0x33   :  { %p5715_p9 = pnand %p5714_p8, %p5708_p5 }
  0x35   :  { %5718 = shalt.err (!%p5715_p9)
}
  0x36   :  { %64 = dma.hbm_to_vmem [thread:$0]  %s7020_s5, 8192, %s59_s12, [#allocation7], %s5749_s21, %s5749_s21, %s5750_s22  }
  0x37   :  { %s5719_s4 = scalar_lea.hbm %s7024_s9, 2048 }
  0x38   :  { %p5720_p10 = scmp.ne.s32.totalorder %s7024_s9, %s5719_s4  ;;  %p5723_p11 = scmp.lt.u32.totalorder %s5719_s4, %s7024_s9 }
  0x3a   :  { %p5725_p12 = pnand %p5723_p11, %p5720_p10 }
  0x3c   :  { %5728 = shalt.err (!%p5725_p12)
}
  0x3d   :  { %s5729_s24 = scalar_lea.vmem %s5868_s20, 2048  ;;  %p5734_p0 = scmp.lt.s32.totalorder %s5868_s20, %s5868_s20 }
  0x3e   :  { %p5730_p13 = scmp.ne.s32.totalorder %s5868_s20, %s5729_s24  ;;  %p5735_p1 = scmp.lt.s32.totalorder %s5729_s24, %s5729_s24 }
  0x40   :  { %p5736_p2 = por %p5735_p1, %p5734_p0 }
  0x42   :  { %p5737_p3 = pnand %p5736_p2, %p5730_p13 }
  0x44   :  { %5740 = shalt.err (!%p5737_p3)
}
  0x45   :  { %s5753_s5 = smov 128   ;;  %s5754_s21 = smov 8  }
  0x46   :  { %82 = dma.hbm_to_vmem [thread:$0]  %s7024_s9, 2048, %s5868_s20, [#allocation10], %s5753_s5, %s5753_s5, %s5754_s21  }
  0x47   :  { %5741 = dma.done.wait [#allocation5], 8192  }
  0x48   :  { %5742 = vsyncadd [#allocation5], 4294959104 }
  0x49   :  { %5743 = dma.done.wait [#allocation7], 16384  }
  0x4a   :  { %5744 = vsyncadd [#allocation7], 4294950912 }
  0x4b   :  { %5745 = dma.done.wait [#allocation10], 2048  }
  0x4c   :  { %5746 = vsyncadd [#allocation10], 4294965248  ;;  %v5755_v1 = vmov 0.0   ;;  %v238_v2 = vld [vmem:[%s7016_s1 + $0x8] sm:$0xff]  ;;  %v240_v4 = vld [vmem:[%s7016_s1 + $0x18] sm:$0xff]  ;;  %vm267_vm0 = vcmask 130048  }
  0x4d   :  { %356 = vmatprep.mubr.f32.mxu0 %v5755_v1  ;;  %469 = vmatprep.mubr.f32.mxu1 %v5755_v1  ;;  %v242_v3 = vld [vmem:[%s7016_s1 + $0x28] sm:$0xff]  ;;  %v244_v6 = vld [vmem:[%s7016_s1 + $0x38] sm:$0xff]  ;;  %v237_v7 = vld [vmem:[%s7016_s1] sm:$0xff]  ;;  %vm5757_vm1 = vmmov 0   ;;  %vm3853_vm2 = vcmask 7168  }
  0x4e   :  { %v4086_v5 = vpack.c.bf16 %v242_v3, %v238_v2  ;;  %v241_v8 = vld [vmem:[%s7016_s1 + $0x20] sm:$0xff]  ;;  %v4090_v9 = vpack.c.bf16 %v244_v6, %v240_v4  ;;  %v239_v11 = vld [vmem:[%s7016_s1 + $0x10] sm:$0xff]  ;;  %v230_v34 = vld [vmem:[%s7015_s0 + $0x8] sm:$0xff] }
  0x4f   :  { %v4088_v10 = vpack.c.bf16 %v241_v8, %v237_v7  ;;  %v243_v12 = vld [vmem:[%s7016_s1 + $0x30] sm:$0xff]  ;;  %v229_v13 = vld [vmem:[%s7015_s0] sm:$0xff]  ;;  %v232_v2 = vld [vmem:[%s7015_s0 + $0x18] sm:$0xff] }
  0x50   :  { %4087 = vmatprep.subr.bf16.mxu0 %v4086_v5  ;;  %v4092_v14 = vpack.c.bf16 %v243_v12, %v239_v11  ;;  %v102_v15 = vld [vmem:[#allocation4 + $0x8] sm:$0xff]  ;;  %v104_v17 = vld [vmem:[#allocation4 + $0x18] sm:$0xff]  ;;  %4091 = vmatprep.subr.bf16.mxu1 %v4090_v9  ;;  %v101_v20 = vld [vmem:[#allocation4] sm:$0xff] }
  0x51   :  { %v106_v16 = vld [vmem:[#allocation4 + $0x28] sm:$0xff]  ;;  %4089 = vmatpush1.bf16.msra.mxu0 %v4088_v10  ;;  %v108_v19 = vld [vmem:[#allocation4 + $0x38] sm:$0xff]  ;;  %v105_v21 = vld [vmem:[#allocation4 + $0x20] sm:$0xff] }
  0x52   :  { %v5931_v18 = vpack.c.bf16 %v106_v16, %v102_v15  ;;  %4093 = vmatpush1.bf16.msra.mxu1 %v4092_v14  ;;  %v5933_v22 = vpack.c.bf16 %v108_v19, %v104_v17  ;;  %v5935_v23 = vpack.c.bf16 %v105_v21, %v101_v20  ;;  %v103_v24 = vld [vmem:[#allocation4 + $0x10] sm:$0xff]  ;;  %v110_v27 = vld [vmem:[#allocation4 + $0x48] sm:$0xff]  ;;  %v112_v29 = vld [vmem:[#allocation4 + $0x58] sm:$0xff] }
  0x53   :  { %v107_v25 = vld [vmem:[#allocation4 + $0x30] sm:$0xff]  ;;  %v114_v28 = vld [vmem:[#allocation4 + $0x68] sm:$0xff]  ;;  %v116_v31 = vld [vmem:[#allocation4 + $0x78] sm:$0xff] }
  0x54   :  { %4095 = vmatprep.subr.bf16.mxu0 %v5931_v18  ;;  %v5938_v26 = vpack.c.bf16 %v107_v25, %v103_v24  ;;  %3862 = vmatmul.mubr.msk.f32.vlgmr.msra.gmra.mrb[0].mxu0 %vm267_vm0, %v229_v13  ;;  %v5942_v30 = vpack.c.bf16 %v114_v28, %v110_v27  ;;  %v109_v32 = vld [vmem:[#allocation4 + $0x40] sm:$0xff]  ;;  %v5949_v35 = vpack.c.bf16 %v116_v31, %v112_v29  ;;  %v111_v37 = vld [vmem:[#allocation4 + $0x50] sm:$0xff]  ;;  %v118_v40 = vld [vmem:[#allocation4 + $0x88] sm:$0xff] }
  0x55   :  { %4127 = vmatprep.subr.bf16.mxu1 %v5933_v22  ;;  %v113_v33 = vld [vmem:[#allocation4 + $0x60] sm:$0xff]  ;;  %3870 = vmatmul.mubr.msk.f32.vlgmr.msra.gmra.mrb[0].mxu1 %vm267_vm0, %v229_v13  ;;  %v115_v38 = vld [vmem:[#allocation4 + $0x70] sm:$0xff]  ;;  %v122_v41 = vld [vmem:[#allocation4 + $0xa8] sm:$0xff] }
  0x56   :  { %4097 = vmatpush1.bf16.msra.mxu0 %v5935_v23  ;;  %v5951_v36 = vpack.c.bf16 %v113_v33, %v109_v32  ;;  %4129 = vmatpush1.bf16.msra.mxu1 %v5938_v26  ;;  %v5955_v39 = vpack.c.bf16 %v115_v38, %v111_v37  ;;  %v120_v42 = vld [vmem:[#allocation4 + $0x98] sm:$0xff]  ;;  %v5959_v43 = vpack.c.bf16 %v122_v41, %v118_v40  ;;  %v117_v45 = vld [vmem:[#allocation4 + $0x80] sm:$0xff]  ;;  %v231_v47 = vld [vmem:[%s7015_s0 + $0x10] sm:$0xff] }
  0x57   :  { %362 = vmatprep.mubr.f32.mxu0 %v5755_v1  ;;  %475 = vmatprep.mubr.f32.mxu1 %v5755_v1  ;;  %v124_v44 = vld [vmem:[#allocation4 + $0xb8] sm:$0xff]  ;;  %v121_v46 = vld [vmem:[#allocation4 + $0xa0] sm:$0xff]  ;;  %v119_v49 = vld [vmem:[#allocation4 + $0x90] sm:$0xff] }
  0x58   :  { %4099 = vmatprep.subr.bf16.mxu0 %v5942_v30  ;;  %3863 = vmatmul.mubr.msk.f32.gmra.mrb[2].mxu0 %vm267_vm0, %v230_v34  ;;  %v5966_v48 = vpack.c.bf16 %v124_v44, %v120_v42  ;;  %v123_v50 = vld [vmem:[#allocation4 + $0xb0] sm:$0xff]  ;;  %v5970_v51 = vpack.c.bf16 %v121_v46, %v117_v45  ;;  %v126_v52 = vld [vmem:[#allocation4 + $0xc8] sm:$0xff]  ;;  %v128_v54 = vld [vmem:[#allocation4 + $0xd8] sm:$0xff] }
  0x59   :  { %4131 = vmatprep.subr.bf16.mxu1 %v5949_v35  ;;  %3871 = vmatmul.mubr.msk.f32.gmra.mrb[2].mxu1 %vm267_vm0, %v230_v34  ;;  %v130_v53 = vld [vmem:[#allocation4 + $0xe8] sm:$0xff]  ;;  %v5974_v55 = vpack.c.bf16 %v123_v50, %v119_v49  ;;  %v132_v56 = vld [vmem:[#allocation4 + $0xf8] sm:$0xff]  ;;  %v125_v57 = vld [vmem:[#allocation4 + $0xc0] sm:$0xff] }
  0x5a   :  { %4101 = vmatpush1.bf16.msra.mxu0 %v5951_v36  ;;  %4133 = vmatpush1.bf16.msra.mxu1 %v5955_v39  ;;  %v129_v58 = vld [vmem:[#allocation4 + $0xe0] sm:$0xff]  ;;  %v5978_v59 = vpack.c.bf16 %v130_v53, %v126_v52  ;;  %v127_v60 = vld [vmem:[#allocation4 + $0xd0] sm:$0xff]  ;;  %v5982_v62 = vpack.c.bf16 %v132_v56, %v128_v54  ;;  %v134_v63 = vld [vmem:[#allocation4 + $0x108] sm:$0xff] }
  0x5b   :  { %368 = vmatprep.mubr.f32.mxu0 %v5755_v1  ;;  %481 = vmatprep.mubr.f32.mxu1 %v5755_v1  ;;  %v131_v61 = vld [vmem:[#allocation4 + $0xf0] sm:$0xff]  ;;  %v138_v0 = vld [vmem:[#allocation4 + $0x128] sm:$0xff]  ;;  %v5989_v3 = vpack.c.bf16 %v129_v58, %v125_v57  ;;  %v136_v4 = vld [vmem:[#allocation4 + $0x118] sm:$0xff] }
  0x5c   :  { %4103 = vmatprep.subr.bf16.mxu0 %v5959_v43  ;;  %3864 = vmatmul.mubr.msk.f32.gmra.mrb[4].mxu0 %vm267_vm0, %v231_v47  ;;  %v140_v5 = vld [vmem:[#allocation4 + $0x138] sm:$0xff]  ;;  %v5993_v6 = vpack.c.bf16 %v131_v61, %v127_v60  ;;  %v133_v7 = vld [vmem:[#allocation4 + $0x100] sm:$0xff]  ;;  %v5997_v9 = vpack.c.bf16 %v138_v0, %v134_v63  ;;  %v135_v10 = vld [vmem:[#allocation4 + $0x110] sm:$0xff] }
  0x5d   :  { %4135 = vmatprep.subr.bf16.mxu1 %v5966_v48  ;;  %3872 = vmatmul.mubr.msk.f32.gmra.mrb[4].mxu1 %vm267_vm0, %v231_v47  ;;  %v137_v8 = vld [vmem:[#allocation4 + $0x120] sm:$0xff]  ;;  %v139_v11 = vld [vmem:[#allocation4 + $0x130] sm:$0xff]  ;;  %v6001_v12 = vpack.c.bf16 %v140_v5, %v136_v4  ;;  %v142_v13 = vld [vmem:[#allocation4 + $0x148] sm:$0xff] }
  0x5e   :  { %4105 = vmatpush1.bf16.msra.mxu0 %v5970_v51  ;;  %4137 = vmatpush1.bf16.msra.mxu1 %v5974_v55  ;;  %v146_v14 = vld [vmem:[#allocation4 + $0x168] sm:$0xff]  ;;  %v233_v15 = vld [vmem:[%s7015_s0 + $0x20] sm:$0xff]  ;;  %v6008_v16 = vpack.c.bf16 %v137_v8, %v133_v7  ;;  %v6012_v20 = vpack.c.bf16 %v139_v11, %v135_v10  ;;  %v143_v27 = vld [vmem:[#allocation4 + $0x150] sm:$0xff]  ;;  %v247_v8 = vlaneseq }
  0x5f   :  { %374 = vmatprep.mubr.f32.mxu0 %v5755_v1  ;;  %487 = vmatprep.mubr.f32.mxu1 %v5755_v1  ;;  %v144_v17 = vld [vmem:[#allocation4 + $0x158] sm:$0xff]  ;;  %v141_v21 = vld [vmem:[#allocation4 + $0x140] sm:$0xff]  ;;  %v6016_v25 = vpack.c.bf16 %v146_v14, %v142_v13  ;;  %v147_v28 = vld [vmem:[#allocation4 + $0x170] sm:$0xff] }
  0x60   :  { %4107 = vmatprep.subr.bf16.mxu0 %v5978_v59  ;;  %3865 = vmatmul.mubr.msk.f32.gmra.mrb[6].mxu0 %vm267_vm0, %v232_v2  ;;  %v148_v19 = vld [vmem:[#allocation4 + $0x178] sm:$0xff]  ;;  %v145_v24 = vld [vmem:[#allocation4 + $0x160] sm:$0xff]  ;;  %v150_v31 = vld [vmem:[#allocation4 + $0x188] sm:$0xff]  ;;  %v6031_v40 = vpack.c.bf16 %v147_v28, %v143_v27  ;;  %v6118_v10 = vshrl.u32 %v247_v8, 7 }
  0x61   :  { %4139 = vmatprep.subr.bf16.mxu1 %v5982_v62  ;;  %3873 = vmatmul.mubr.msk.f32.gmra.mrb[6].mxu1 %vm267_vm0, %v232_v2  ;;  %v6020_v29 = vpack.c.bf16 %v148_v19, %v144_v17  ;;  %v154_v32 = vld [vmem:[#allocation4 + $0x1a8] sm:$0xff]  ;;  %v6027_v34 = vpack.c.bf16 %v145_v24, %v141_v21  ;;  %v152_v37 = vld [vmem:[#allocation4 + $0x198] sm:$0xff]  ;;  %v149_v41 = vld [vmem:[#allocation4 + $0x180] sm:$0xff] }
  0x62   :  { %4109 = vmatpush1.bf16.msra.mxu0 %v5989_v3  ;;  %4141 = vmatpush1.bf16.msra.mxu1 %v5993_v6  ;;  %v234_v33 = vld [vmem:[%s7015_s0 + $0x28] sm:$0xff]  ;;  %v156_v38 = vld [vmem:[#allocation4 + $0x1b8] sm:$0xff]  ;;  %v6035_v44 = vpack.c.bf16 %v154_v32, %v150_v31  ;;  %v151_v45 = vld [vmem:[#allocation4 + $0x190] sm:$0xff]  ;;  %v249_v11 = vsub.s32 0, %v6118_v10  ;;  %v253_v14 = vsub.s32 1, %v6118_v10  ;;  %v261_v21 = vsub.s32 3, %v6118_v10 }
  0x63   :  { %380 = vmatprep.mubr.f32.mxu0 %v5755_v1  ;;  %493 = vmatprep.mubr.f32.mxu1 %v5755_v1  ;;  %v153_v42 = vld [vmem:[#allocation4 + $0x1a0] sm:$0xff]  ;;  %v155_v46 = vld [vmem:[#allocation4 + $0x1b0] sm:$0xff]  ;;  %v6039_v47 = vpack.c.bf16 %v156_v38, %v152_v37  ;;  %v158_v49 = vld [vmem:[#allocation4 + $0x1c8] sm:$0xff] }
  0x64   :  { %4111 = vmatprep.subr.bf16.mxu0 %v5997_v9  ;;  %3866 = vmatmul.mubr.msk.f32.gmra.mrb[8].mxu0 %vm267_vm0, %v233_v15  ;;  %v162_v50 = vld [vmem:[#allocation4 + $0x1e8] sm:$0xff]  ;;  %v6046_v53 = vpack.c.bf16 %v153_v42, %v149_v41  ;;  %v160_v54 = vld [vmem:[#allocation4 + $0x1d8] sm:$0xff]  ;;  %v6050_v57 = vpack.c.bf16 %v155_v46, %v151_v45  ;;  %v157_v58 = vld [vmem:[#allocation4 + $0x1c0] sm:$0xff]  ;;  %v257_v41 = vsub.s32 2, %v6118_v10 }
  0x65   :  { %4143 = vmatprep.subr.bf16.mxu1 %v6001_v12  ;;  %3874 = vmatmul.mubr.msk.f32.gmra.mrb[8].mxu1 %vm267_vm0, %v233_v15  ;;  %v235_v52 = vld [vmem:[%s7015_s0 + $0x30] sm:$0xff]  ;;  %v164_v56 = vld [vmem:[#allocation4 + $0x1f8] sm:$0xff]  ;;  %v161_v60 = vld [vmem:[#allocation4 + $0x1e0] sm:$0xff]  ;;  %v6054_v61 = vpack.c.bf16 %v162_v50, %v158_v49 }
  0x66   :  { %4113 = vmatpush1.bf16.msra.mxu0 %v6008_v16  ;;  %4145 = vmatpush1.bf16.msra.mxu1 %v6012_v20  ;;  %v159_v63 = vld [vmem:[#allocation4 + $0x1d0] sm:$0xff]  ;;  %v6058_v2 = vpack.c.bf16 %v164_v56, %v160_v54  ;;  %v6065_v5 = vpack.c.bf16 %v161_v60, %v157_v58  ;;  %v245_v13 = vld [vmem:[%s7018_s3] sm:$0xf] }
  0x67   :  { %386 = vmatprep.mubr.f32.mxu0 %v5755_v1  ;;  %499 = vmatprep.mubr.f32.mxu1 %v5755_v1  ;;  %v163_v0 = vld [vmem:[#allocation4 + $0x1f0] sm:$0xff]  ;;  %v6127_v15 = vrot.slane %v245_v13, %v249_v11  ;;  %v6131_v17 = vrot.slane %v245_v13, %v253_v14  ;;  %v6138_v38 = vrot.slane %v245_v13, %v261_v21 }
  0x68   :  { %4115 = vmatprep.subr.bf16.mxu0 %v6016_v25  ;;  %3867 = vmatmul.mubr.msk.f32.gmra.mrb[10].mxu0 %vm267_vm0, %v234_v33  ;;  %v236_v4 = vld [vmem:[%s7015_s0 + $0x38] sm:$0xff]  ;;  %v6069_v7 = vpack.c.bf16 %v163_v0, %v159_v63  ;;  %v6144_v45 = vrot.slane %v245_v13, %v257_v41 }
  0x69   :  { %4147 = vmatprep.subr.bf16.mxu1 %v6020_v29  ;;  %3875 = vmatmul.mubr.msk.f32.gmra.mrb[10].mxu1 %vm267_vm0, %v234_v33 }
  0x6a   :  { %4117 = vmatpush1.bf16.msra.mxu0 %v6027_v34  ;;  %4149 = vmatpush1.bf16.msra.mxu1 %v6031_v40 }
  0x6b   :  { %392 = vmatprep.mubr.f32.mxu0 %v5755_v1  ;;  %505 = vmatprep.mubr.f32.mxu1 %v5755_v1 }
  0x6c   :  { %4119 = vmatprep.subr.bf16.mxu0 %v6035_v44  ;;  %3868 = vmatmul.mubr.msk.f32.gmra.mrb[12].mxu0 %vm267_vm0, %v235_v52 }
  0x6d   :  { %4151 = vmatprep.subr.bf16.mxu1 %v6039_v47  ;;  %3876 = vmatmul.mubr.msk.f32.gmra.mrb[12].mxu1 %vm267_vm0, %v235_v52 }
  0x6e   :  { %4121 = vmatpush1.bf16.msra.mxu0 %v6046_v53  ;;  %4153 = vmatpush1.bf16.msra.mxu1 %v6050_v57 }
  0x6f   :  { %398 = vmatprep.mubr.f32.mxu0 %v5755_v1  ;;  %511 = vmatprep.mubr.f32.mxu1 %v5755_v1 }
  0x70   :  { %4123 = vmatprep.subr.bf16.mxu0 %v6054_v61  ;;  %3869 = vmatmul.mubr.msk.f32.gmra.mrb[14].mxu0 %vm267_vm0, %v236_v4 }
  0x71   :  { %4155 = vmatprep.subr.bf16.mxu1 %v6058_v2  ;;  %3877 = vmatmul.mubr.msk.f32.gmra.mrb[14].mxu1 %vm267_vm0, %v236_v4 }
  0x72   :  { %4125 = vmatpush1.bf16.msra.mxu0 %v6065_v5  ;;  %4157 = vmatpush1.bf16.msra.mxu1 %v6069_v7 }
  0x73   :  { %582 = vmatprep.mubr.f32.mxu0 %v5755_v1  ;;  %653 = vmatprep.mubr.f32.mxu1 %v5755_v1 }
  0x74   :  { %4159 = vmatprep.subr.bf16.mxu0 %v5931_v18  ;;  %4191 = vmatprep.subr.bf16.mxu1 %v5933_v22 }
  0x75   :  { %583 = vmatmul.mubr.f32.vlgmr.msra.gmra.mrb[0].mxu0 %v5755_v1  ;;  %654 = vmatmul.mubr.f32.vlgmr.msra.gmra.mrb[0].mxu1 %v5755_v1 }
  0x76   :  { %4161 = vmatpush1.bf16.msra.mxu0 %v5935_v23  ;;  %4193 = vmatpush1.bf16.msra.mxu1 %v5938_v26 }
  0x77   :  { %4163 = vmatprep.subr.bf16.mxu0 %v5942_v30  ;;  %4195 = vmatprep.subr.bf16.mxu1 %v5949_v35 }
  0x78   :  { %753 = vmatprep.mubr.f32.mxu0 %v5755_v1  ;;  %824 = vmatprep.mubr.f32.mxu1 %v5755_v1 }
  0x7a   :  { %4165 = vmatpush1.bf16.msra.mxu0 %v5951_v36  ;;  %4197 = vmatpush1.bf16.msra.mxu1 %v5955_v39 }
  0x7b   :  { %4167 = vmatprep.subr.bf16.mxu0 %v5959_v43  ;;  %4199 = vmatprep.subr.bf16.mxu1 %v5966_v48 }
  0x7e   :  { %4169 = vmatpush1.bf16.msra.mxu0 %v5970_v51  ;;  %4201 = vmatpush1.bf16.msra.mxu1 %v5974_v55 }
  0x7f   :  { %4171 = vmatprep.subr.bf16.mxu0 %v5978_v59  ;;  %4203 = vmatprep.subr.bf16.mxu1 %v5982_v62 }
  0x82   :  { %4173 = vmatpush1.bf16.msra.mxu0 %v5989_v3  ;;  %4205 = vmatpush1.bf16.msra.mxu1 %v5993_v6 }
  0x83   :  { %4175 = vmatprep.subr.bf16.mxu0 %v5997_v9  ;;  %4207 = vmatprep.subr.bf16.mxu1 %v6001_v12 }
  0x86   :  { %4177 = vmatpush1.bf16.msra.mxu0 %v6008_v16  ;;  %4209 = vmatpush1.bf16.msra.mxu1 %v6012_v20 }
  0x87   :  { %4179 = vmatprep.subr.bf16.mxu0 %v6016_v25  ;;  %4211 = vmatprep.subr.bf16.mxu1 %v6020_v29 }
  0x8a   :  { %4181 = vmatpush1.bf16.msra.mxu0 %v6027_v34  ;;  %4213 = vmatpush1.bf16.msra.mxu1 %v6031_v40 }
  0x8b   :  { %4183 = vmatprep.subr.bf16.mxu0 %v6035_v44  ;;  %4215 = vmatprep.subr.bf16.mxu1 %v6039_v47 }
  0x8e   :  { %4185 = vmatpush1.bf16.msra.mxu0 %v6046_v53  ;;  %4217 = vmatpush1.bf16.msra.mxu1 %v6050_v57 }
  0x8f   :  { %4187 = vmatprep.subr.bf16.mxu0 %v6054_v61  ;;  %4219 = vmatprep.subr.bf16.mxu1 %v6058_v2 }
  0x92   :  { %4189 = vmatpush1.bf16.msra.mxu0 %v6065_v5  ;;  %4221 = vmatpush1.bf16.msra.mxu1 %v6069_v7 }
  0x93   :  { %4223 = vmatprep.subr.bf16.mxu0 %v5931_v18  ;;  %4255 = vmatprep.subr.bf16.mxu1 %v5933_v22 }
 0x148   :  { %v584_v19 = vpop.f32.mrb[0].mxu0  ;;  %v655_v27 = vpop.f32.mrb[0].mxu1 }
 0x149   :  { %v5254_v24 = vadd.f32 %v584_v19, %v6127_v15  ;;  %v586_v28 = vpop.f32.mrb[1].mxu0  ;;  %v657_v32 = vpop.f32.mrb[1].mxu1  ;;  %v5270_v49 = vadd.f32 %v655_v27, %v6144_v45 }
 0x14a   :  { %v5255_v31 = vadd.f32 %v586_v28, %v6131_v17  ;;  %v5271_v42 = vadd.f32 %v657_v32, %v6138_v38 }
 0x14b   :  { %v3878_v33 = vmul.f32 -1.442695, %v5254_v24 }
 0x14c   :  { %v3879_v37 = vmul.f32 -1.442695, %v5255_v31  ;;  %v3880_v46 = vmul.f32 -1.442695, %v5271_v42 }
 0x14d   :  { %5393 = vpow2.f32 %v3878_v33 }
 0x14e   :  { %5395 = vpow2.f32 %v3879_v37 }
 0x14f   :  { %5397 = vpow2.f32 %v3880_v46 }
 0x150   :  { %5399 = vtanh.f32 %v5270_v49 }
 0x157   :  { %v5394_v50 = vpop.eup %5393 }
 0x158   :  { %v5396_v52 = vpop.eup %5395  ;;  %v667_v54 = vadd.f32 1.0, %v5394_v50 }
 0x159   :  { %v673_v56 = vadd.f32 1.0, %v5396_v52  ;;  %v5398_v58 = vpop.eup %5397 }
 0x15a   :  { %5401 = vrcp.f32 %v667_v54  ;;  %v5400_v60 = vpop.eup %5399  ;;  %v680_v8 = vadd.f32 1.0, %v5398_v58 }
 0x15b   :  { %5403 = vrcp.f32 %v673_v56 }
 0x15c   :  { %5405 = vrcp.f32 %v680_v8 }
 0x164   :  { %v5402_v63 = vpop.eup %5401 }
 0x165   :  { %v5404_v0 = vpop.eup %5403  ;;  %v684_v4 = vmul.f32 %v5402_v63, %v5400_v60 }
 0x166   :  { %v683_v19 = vmul.f32 0.0, %v5404_v0  ;;  %v5406_v24 = vpop.eup %5405 }
 0x168   :  { %v6147_v13 = vadd.f32 %v684_v4, %v683_v19 }
 0x16a   :  { %5407 = vtanh.f32 %v6147_v13 }
 0x174   :  { %v5408_v27 = vpop.eup %5407 }
 0x175   :  { %v6150_v28 = vmul.f32 %v5408_v27, %v5406_v24 }
 0x177   :  { %754 = vmatmul.mubr.f32.vlgmr.msra.gmra.mrb[2].mxu0 %v6150_v28  ;;  %825 = vmatmul.mubr.f32.vlgmr.msra.gmra.mrb[2].mxu1 %v6150_v28 }
 0x178   :  { %4225 = vmatpush1.bf16.msra.mxu0 %v5935_v23  ;;  %4257 = vmatpush1.bf16.msra.mxu1 %v5938_v26 }
 0x179   :  { %4227 = vmatprep.subr.bf16.mxu0 %v5942_v30  ;;  %4259 = vmatprep.subr.bf16.mxu1 %v5949_v35 }
 0x17a   :  { %924 = vmatprep.mubr.f32.mxu0 %v5755_v1  ;;  %995 = vmatprep.mubr.f32.mxu1 %v5755_v1 }
 0x17c   :  { %4229 = vmatpush1.bf16.msra.mxu0 %v5951_v36  ;;  %4261 = vmatpush1.bf16.msra.mxu1 %v5955_v39 }
 0x17d   :  { %4231 = vmatprep.subr.bf16.mxu0 %v5959_v43  ;;  %4263 = vmatprep.subr.bf16.mxu1 %v5966_v48 }
 0x180   :  { %4233 = vmatpush1.bf16.msra.mxu0 %v5970_v51  ;;  %4265 = vmatpush1.bf16.msra.mxu1 %v5974_v55 }
 0x181   :  { %4235 = vmatprep.subr.bf16.mxu0 %v5978_v59  ;;  %4267 = vmatprep.subr.bf16.mxu1 %v5982_v62 }
 0x184   :  { %4237 = vmatpush1.bf16.msra.mxu0 %v5989_v3  ;;  %4269 = vmatpush1.bf16.msra.mxu1 %v5993_v6 }
 0x185   :  { %4239 = vmatprep.subr.bf16.mxu0 %v5997_v9  ;;  %4271 = vmatprep.subr.bf16.mxu1 %v6001_v12 }
 0x188   :  { %4241 = vmatpush1.bf16.msra.mxu0 %v6008_v16  ;;  %4273 = vmatpush1.bf16.msra.mxu1 %v6012_v20 }
 0x189   :  { %4243 = vmatprep.subr.bf16.mxu0 %v6016_v25  ;;  %4275 = vmatprep.subr.bf16.mxu1 %v6020_v29 }
 0x18c   :  { %4245 = vmatpush1.bf16.msra.mxu0 %v6027_v34  ;;  %4277 = vmatpush1.bf16.msra.mxu1 %v6031_v40 }
 0x18d   :  { %4247 = vmatprep.subr.bf16.mxu0 %v6035_v44  ;;  %4279 = vmatprep.subr.bf16.mxu1 %v6039_v47 }
 0x190   :  { %4249 = vmatpush1.bf16.msra.mxu0 %v6046_v53  ;;  %4281 = vmatpush1.bf16.msra.mxu1 %v6050_v57 }
 0x191   :  { %4251 = vmatprep.subr.bf16.mxu0 %v6054_v61  ;;  %4283 = vmatprep.subr.bf16.mxu1 %v6058_v2 }
 0x194   :  { %4253 = vmatpush1.bf16.msra.mxu0 %v6065_v5  ;;  %4285 = vmatpush1.bf16.msra.mxu1 %v6069_v7 }
 0x195   :  { %4287 = vmatprep.subr.bf16.mxu0 %v5931_v18  ;;  %4319 = vmatprep.subr.bf16.mxu1 %v5933_v22 }
 0x24a   :  { %v755_v31 = vpop.f32.mrb[2].mxu0  ;;  %v826_v32 = vpop.f32.mrb[2].mxu1 }
 0x24b   :  { %v5256_v33 = vadd.f32 %v755_v31, %v6127_v15  ;;  %v757_v37 = vpop.f32.mrb[3].mxu0  ;;  %v828_v42 = vpop.f32.mrb[3].mxu1  ;;  %v5272_v56 = vadd.f32 %v826_v32, %v6144_v45 }
 0x24c   :  { %v5257_v46 = vadd.f32 %v757_v37, %v6131_v17  ;;  %v5273_v52 = vadd.f32 %v828_v42, %v6138_v38 }
 0x24d   :  { %v3881_v49 = vmul.f32 -1.442695, %v5256_v33 }
 0x24e   :  { %v3882_v50 = vmul.f32 -1.442695, %v5257_v46  ;;  %v3883_v54 = vmul.f32 -1.442695, %v5273_v52 }
 0x24f   :  { %5409 = vpow2.f32 %v3881_v49 }
 0x250   :  { %5411 = vpow2.f32 %v3882_v50 }
 0x251   :  { %5413 = vpow2.f32 %v3883_v54 }
 0x252   :  { %5415 = vtanh.f32 %v5272_v56 }
 0x259   :  { %v5410_v58 = vpop.eup %5409 }
 0x25a   :  { %v5412_v60 = vpop.eup %5411  ;;  %v838_v63 = vadd.f32 1.0, %v5410_v58 }
 0x25b   :  { %v844_v0 = vadd.f32 1.0, %v5412_v60  ;;  %v5414_v4 = vpop.eup %5413 }
 0x25c   :  { %5417 = vrcp.f32 %v838_v63  ;;  %v5416_v8 = vpop.eup %5415  ;;  %v851_v31 = vadd.f32 1.0, %v5414_v4 }
 0x25d   :  { %5419 = vrcp.f32 %v844_v0 }
 0x25e   :  { %5421 = vrcp.f32 %v851_v31 }
 0x266   :  { %v5418_v19 = vpop.eup %5417 }
 0x267   :  { %v5420_v24 = vpop.eup %5419  ;;  %v855_v27 = vmul.f32 %v5418_v19, %v5416_v8 }
 0x268   :  { %v854_v33 = vmul.f32 %v5420_v24, %v6147_v13  ;;  %v5422_v32 = vpop.eup %5421 }
 0x26a   :  { %v6193_v37 = vadd.f32 %v855_v27, %v854_v33 }
 0x26c   :  { %5423 = vtanh.f32 %v6193_v37 }
 0x276   :  { %v5424_v42 = vpop.eup %5423 }
 0x277   :  { %v6196_v46 = vmul.f32 %v5424_v42, %v5422_v32 }
 0x279   :  { %925 = vmatmul.mubr.f32.vlgmr.msra.gmra.mrb[4].mxu0 %v6196_v46  ;;  %996 = vmatmul.mubr.f32.vlgmr.msra.gmra.mrb[4].mxu1 %v6196_v46 }
 0x27a   :  { %4289 = vmatpush1.bf16.msra.mxu0 %v5935_v23  ;;  %4321 = vmatpush1.bf16.msra.mxu1 %v5938_v26 }
 0x27b   :  { %4291 = vmatprep.subr.bf16.mxu0 %v5942_v30  ;;  %4323 = vmatprep.subr.bf16.mxu1 %v5949_v35 }
 0x27c   :  { %1095 = vmatprep.mubr.f32.mxu0 %v5755_v1  ;;  %1166 = vmatprep.mubr.f32.mxu1 %v5755_v1 }
 0x27e   :  { %4293 = vmatpush1.bf16.msra.mxu0 %v5951_v36  ;;  %4325 = vmatpush1.bf16.msra.mxu1 %v5955_v39 }
 0x27f   :  { %4295 = vmatprep.subr.bf16.mxu0 %v5959_v43  ;;  %4327 = vmatprep.subr.bf16.mxu1 %v5966_v48 }
 0x282   :  { %4297 = vmatpush1.bf16.msra.mxu0 %v5970_v51  ;;  %4329 = vmatpush1.bf16.msra.mxu1 %v5974_v55 }
 0x283   :  { %4299 = vmatprep.subr.bf16.mxu0 %v5978_v59  ;;  %4331 = vmatprep.subr.bf16.mxu1 %v5982_v62 }
 0x286   :  { %4301 = vmatpush1.bf16.msra.mxu0 %v5989_v3  ;;  %4333 = vmatpush1.bf16.msra.mxu1 %v5993_v6 }
 0x287   :  { %4303 = vmatprep.subr.bf16.mxu0 %v5997_v9  ;;  %4335 = vmatprep.subr.bf16.mxu1 %v6001_v12 }
 0x28a   :  { %4305 = vmatpush1.bf16.msra.mxu0 %v6008_v16  ;;  %4337 = vmatpush1.bf16.msra.mxu1 %v6012_v20 }
 0x28b   :  { %4307 = vmatprep.subr.bf16.mxu0 %v6016_v25  ;;  %4339 = vmatprep.subr.bf16.mxu1 %v6020_v29 }
 0x28e   :  { %4309 = vmatpush1.bf16.msra.mxu0 %v6027_v34  ;;  %4341 = vmatpush1.bf16.msra.mxu1 %v6031_v40 }
 0x28f   :  { %4311 = vmatprep.subr.bf16.mxu0 %v6035_v44  ;;  %4343 = vmatprep.subr.bf16.mxu1 %v6039_v47 }
 0x292   :  { %4313 = vmatpush1.bf16.msra.mxu0 %v6046_v53  ;;  %4345 = vmatpush1.bf16.msra.mxu1 %v6050_v57 }
 0x293   :  { %4315 = vmatprep.subr.bf16.mxu0 %v6054_v61  ;;  %4347 = vmatprep.subr.bf16.mxu1 %v6058_v2 }
 0x296   :  { %4317 = vmatpush1.bf16.msra.mxu0 %v6065_v5  ;;  %4349 = vmatpush1.bf16.msra.mxu1 %v6069_v7 }
 0x297   :  { %4351 = vmatprep.subr.bf16.mxu0 %v5931_v18  ;;  %4383 = vmatprep.subr.bf16.mxu1 %v5933_v22 }
 0x34c   :  { %v926_v13 = vpop.f32.mrb[4].mxu0  ;;  %v997_v49 = vpop.f32.mrb[4].mxu1 }
 0x34d   :  { %v5258_v50 = vadd.f32 %v926_v13, %v6127_v15  ;;  %v928_v52 = vpop.f32.mrb[5].mxu0  ;;  %v999_v54 = vpop.f32.mrb[5].mxu1  ;;  %v5274_v4 = vadd.f32 %v997_v49, %v6144_v45 }
 0x34e   :  { %v5259_v56 = vadd.f32 %v928_v52, %v6131_v17  ;;  %v5275_v63 = vadd.f32 %v999_v54, %v6138_v38 }
 0x34f   :  { %v3884_v58 = vmul.f32 -1.442695, %v5258_v50 }
 0x350   :  { %v3885_v60 = vmul.f32 -1.442695, %v5259_v56  ;;  %v3886_v0 = vmul.f32 -1.442695, %v5275_v63 }
 0x351   :  { %5425 = vpow2.f32 %v3884_v58 }
 0x352   :  { %5427 = vpow2.f32 %v3885_v60 }
 0x353   :  { %5429 = vpow2.f32 %v3886_v0 }
 0x354   :  { %5431 = vtanh.f32 %v5274_v4 }
 0x35b   :  { %v5426_v8 = vpop.eup %5425 }
 0x35c   :  { %v5428_v19 = vpop.eup %5427  ;;  %v1009_v24 = vadd.f32 1.0, %v5426_v8 }
 0x35d   :  { %v1015_v27 = vadd.f32 1.0, %v5428_v19  ;;  %v5430_v31 = vpop.eup %5429 }
 0x35e   :  { %5433 = vrcp.f32 %v1009_v24  ;;  %v5432_v33 = vpop.eup %5431  ;;  %v1022_v50 = vadd.f32 1.0, %v5430_v31 }
 0x35f   :  { %5435 = vrcp.f32 %v1015_v27 }
 0x360   :  { %5437 = vrcp.f32 %v1022_v50 }
 0x368   :  { %v5434_v32 = vpop.eup %5433 }
 0x369   :  { %v5436_v42 = vpop.eup %5435  ;;  %v1026_v13 = vmul.f32 %v5434_v32, %v5432_v33 }
 0x36a   :  { %v1025_v52 = vmul.f32 %v5436_v42, %v6193_v37  ;;  %v5438_v49 = vpop.eup %5437 }
 0x36c   :  { %v6239_v54 = vadd.f32 %v1026_v13, %v1025_v52 }
 0x36e   :  { %5439 = vtanh.f32 %v6239_v54 }
 0x378   :  { %v5440_v56 = vpop.eup %5439 }
 0x379   :  { %v6242_v58 = vmul.f32 %v5440_v56, %v5438_v49 }
 0x37b   :  { %1096 = vmatmul.mubr.f32.vlgmr.msra.gmra.mrb[6].mxu0 %v6242_v58  ;;  %1167 = vmatmul.mubr.f32.vlgmr.msra.gmra.mrb[6].mxu1 %v6242_v58 }
 0x37c   :  { %4353 = vmatpush1.bf16.msra.mxu0 %v5935_v23  ;;  %4385 = vmatpush1.bf16.msra.mxu1 %v5938_v26 }
 0x37d   :  { %4355 = vmatprep.subr.bf16.mxu0 %v5942_v30  ;;  %4387 = vmatprep.subr.bf16.mxu1 %v5949_v35 }
 0x37e   :  { %1266 = vmatprep.mubr.f32.mxu0 %v5755_v1  ;;  %1337 = vmatprep.mubr.f32.mxu1 %v5755_v1 }
 0x380   :  { %4357 = vmatpush1.bf16.msra.mxu0 %v5951_v36  ;;  %4389 = vmatpush1.bf16.msra.mxu1 %v5955_v39 }
 0x381   :  { %4359 = vmatprep.subr.bf16.mxu0 %v5959_v43  ;;  %4391 = vmatprep.subr.bf16.mxu1 %v5966_v48 }
 0x384   :  { %4361 = vmatpush1.bf16.msra.mxu0 %v5970_v51  ;;  %4393 = vmatpush1.bf16.msra.mxu1 %v5974_v55 }
 0x385   :  { %4363 = vmatprep.subr.bf16.mxu0 %v5978_v59  ;;  %4395 = vmatprep.subr.bf16.mxu1 %v5982_v62 }
 0x388   :  { %4365 = vmatpush1.bf16.msra.mxu0 %v5989_v3  ;;  %4397 = vmatpush1.bf16.msra.mxu1 %v5993_v6 }
 0x389   :  { %4367 = vmatprep.subr.bf16.mxu0 %v5997_v9  ;;  %4399 = vmatprep.subr.bf16.mxu1 %v6001_v12 }
 0x38c   :  { %4369 = vmatpush1.bf16.msra.mxu0 %v6008_v16  ;;  %4401 = vmatpush1.bf16.msra.mxu1 %v6012_v20 }
 0x38d   :  { %4371 = vmatprep.subr.bf16.mxu0 %v6016_v25  ;;  %4403 = vmatprep.subr.bf16.mxu1 %v6020_v29 }
 0x390   :  { %4373 = vmatpush1.bf16.msra.mxu0 %v6027_v34  ;;  %4405 = vmatpush1.bf16.msra.mxu1 %v6031_v40 }
 0x391   :  { %4375 = vmatprep.subr.bf16.mxu0 %v6035_v44  ;;  %4407 = vmatprep.subr.bf16.mxu1 %v6039_v47 }
 0x394   :  { %4377 = vmatpush1.bf16.msra.mxu0 %v6046_v53  ;;  %4409 = vmatpush1.bf16.msra.mxu1 %v6050_v57 }
 0x395   :  { %4379 = vmatprep.subr.bf16.mxu0 %v6054_v61  ;;  %4411 = vmatprep.subr.bf16.mxu1 %v6058_v2 }
 0x398   :  { %4381 = vmatpush1.bf16.msra.mxu0 %v6065_v5  ;;  %4413 = vmatpush1.bf16.msra.mxu1 %v6069_v7 }
 0x399   :  { %4415 = vmatprep.subr.bf16.mxu0 %v5931_v18  ;;  %4447 = vmatprep.subr.bf16.mxu1 %v5933_v22 }
 0x44e   :  { %v1097_v37 = vpop.f32.mrb[6].mxu0  ;;  %v1168_v60 = vpop.f32.mrb[6].mxu1 }
 0x44f   :  { %v5260_v63 = vadd.f32 %v1097_v37, %v6127_v15  ;;  %v1099_v0 = vpop.f32.mrb[7].mxu0  ;;  %v1170_v4 = vpop.f32.mrb[7].mxu1  ;;  %v5276_v33 = vadd.f32 %v1168_v60, %v6144_v45 }
 0x450   :  { %v5261_v8 = vadd.f32 %v1099_v0, %v6131_v17  ;;  %v5277_v27 = vadd.f32 %v1170_v4, %v6138_v38 }
 0x451   :  { %v3887_v19 = vmul.f32 -1.442695, %v5260_v63 }
 0x452   :  { %v3888_v24 = vmul.f32 -1.442695, %v5261_v8  ;;  %v3889_v31 = vmul.f32 -1.442695, %v5277_v27 }
 0x453   :  { %5441 = vpow2.f32 %v3887_v19 }
 0x454   :  { %5443 = vpow2.f32 %v3888_v24 }
 0x455   :  { %5445 = vpow2.f32 %v3889_v31 }
 0x456   :  { %5447 = vtanh.f32 %v5276_v33 }
 0x45d   :  { %v5442_v32 = vpop.eup %5441 }
 0x45e   :  { %v5444_v42 = vpop.eup %5443  ;;  %v1180_v13 = vadd.f32 1.0, %v5442_v32 }
 0x45f   :  { %v1186_v50 = vadd.f32 1.0, %v5444_v42  ;;  %v5446_v52 = vpop.eup %5445 }
 0x460   :  { %5449 = vrcp.f32 %v1180_v13  ;;  %v5448_v49 = vpop.eup %5447  ;;  %v1193_v0 = vadd.f32 1.0, %v5446_v52 }
 0x461   :  { %5451 = vrcp.f32 %v1186_v50 }
 0x462   :  { %5453 = vrcp.f32 %v1193_v0 }
 0x46a   :  { %v5450_v56 = vpop.eup %5449 }
 0x46b   :  { %v5452_v37 = vpop.eup %5451  ;;  %v1197_v63 = vmul.f32 %v5450_v56, %v5448_v49 }
 0x46c   :  { %v1196_v8 = vmul.f32 %v5452_v37, %v6239_v54  ;;  %v5454_v60 = vpop.eup %5453 }
 0x46e   :  { %v6285_v4 = vadd.f32 %v1197_v63, %v1196_v8 }
 0x470   :  { %5455 = vtanh.f32 %v6285_v4 }
 0x47a   :  { %v5456_v19 = vpop.eup %5455 }
 0x47b   :  { %v6288_v24 = vmul.f32 %v5456_v19, %v5454_v60 }
 0x47d   :  { %1267 = vmatmul.mubr.f32.vlgmr.msra.gmra.mrb[8].mxu0 %v6288_v24  ;;  %1338 = vmatmul.mubr.f32.vlgmr.msra.gmra.mrb[8].mxu1 %v6288_v24 }
 0x47e   :  { %4417 = vmatpush1.bf16.msra.mxu0 %v5935_v23  ;;  %4449 = vmatpush1.bf16.msra.mxu1 %v5938_v26 }
 0x47f   :  { %4419 = vmatprep.subr.bf16.mxu0 %v5942_v30  ;;  %4451 = vmatprep.subr.bf16.mxu1 %v5949_v35 }
 0x480   :  { %1437 = vmatprep.mubr.f32.mxu0 %v5755_v1  ;;  %1508 = vmatprep.mubr.f32.mxu1 %v5755_v1 }
 0x482   :  { %4421 = vmatpush1.bf16.msra.mxu0 %v5951_v36  ;;  %4453 = vmatpush1.bf16.msra.mxu1 %v5955_v39 }
 0x483   :  { %4423 = vmatprep.subr.bf16.mxu0 %v5959_v43  ;;  %4455 = vmatprep.subr.bf16.mxu1 %v5966_v48 }
 0x486   :  { %4425 = vmatpush1.bf16.msra.mxu0 %v5970_v51  ;;  %4457 = vmatpush1.bf16.msra.mxu1 %v5974_v55 }
 0x487   :  { %4427 = vmatprep.subr.bf16.mxu0 %v5978_v59  ;;  %4459 = vmatprep.subr.bf16.mxu1 %v5982_v62 }
 0x48a   :  { %4429 = vmatpush1.bf16.msra.mxu0 %v5989_v3  ;;  %4461 = vmatpush1.bf16.msra.mxu1 %v5993_v6 }
 0x48b   :  { %4431 = vmatprep.subr.bf16.mxu0 %v5997_v9  ;;  %4463 = vmatprep.subr.bf16.mxu1 %v6001_v12 }
 0x48e   :  { %4433 = vmatpush1.bf16.msra.mxu0 %v6008_v16  ;;  %4465 = vmatpush1.bf16.msra.mxu1 %v6012_v20 }
 0x48f   :  { %4435 = vmatprep.subr.bf16.mxu0 %v6016_v25  ;;  %4467 = vmatprep.subr.bf16.mxu1 %v6020_v29 }
 0x492   :  { %4437 = vmatpush1.bf16.msra.mxu0 %v6027_v34  ;;  %4469 = vmatpush1.bf16.msra.mxu1 %v6031_v40 }
 0x493   :  { %4439 = vmatprep.subr.bf16.mxu0 %v6035_v44  ;;  %4471 = vmatprep.subr.bf16.mxu1 %v6039_v47 }
 0x496   :  { %4441 = vmatpush1.bf16.msra.mxu0 %v6046_v53  ;;  %4473 = vmatpush1.bf16.msra.mxu1 %v6050_v57 }
 0x497   :  { %4443 = vmatprep.subr.bf16.mxu0 %v6054_v61  ;;  %4475 = vmatprep.subr.bf16.mxu1 %v6058_v2 }
 0x49a   :  { %4445 = vmatpush1.bf16.msra.mxu0 %v6065_v5  ;;  %4477 = vmatpush1.bf16.msra.mxu1 %v6069_v7 }
 0x49b   :  { %4479 = vmatprep.subr.bf16.mxu0 %v5931_v18  ;;  %4511 = vmatprep.subr.bf16.mxu1 %v5933_v22 }
 0x550   :  { %v1268_v54 = vpop.f32.mrb[8].mxu0  ;;  %v1339_v27 = vpop.f32.mrb[8].mxu1 }
 0x551   :  { %v5262_v31 = vadd.f32 %v1268_v54, %v6127_v15  ;;  %v1270_v33 = vpop.f32.mrb[9].mxu0  ;;  %v1341_v32 = vpop.f32.mrb[9].mxu1  ;;  %v5278_v56 = vadd.f32 %v1339_v27, %v6144_v45 }
 0x552   :  { %v5263_v42 = vadd.f32 %v1270_v33, %v6131_v17  ;;  %v5279_v52 = vadd.f32 %v1341_v32, %v6138_v38 }
 0x553   :  { %v3890_v13 = vmul.f32 -1.442695, %v5262_v31 }
 0x554   :  { %v3891_v50 = vmul.f32 -1.442695, %v5263_v42  ;;  %v3892_v49 = vmul.f32 -1.442695, %v5279_v52 }
 0x555   :  { %5457 = vpow2.f32 %v3890_v13 }
 0x556   :  { %5459 = vpow2.f32 %v3891_v50 }
 0x557   :  { %5461 = vpow2.f32 %v3892_v49 }
 0x558   :  { %5463 = vtanh.f32 %v5278_v56 }
 0x55f   :  { %v5458_v37 = vpop.eup %5457 }
 0x560   :  { %v5460_v63 = vpop.eup %5459  ;;  %v1351_v0 = vadd.f32 1.0, %v5458_v37 }
 0x561   :  { %v1357_v8 = vadd.f32 1.0, %v5460_v63  ;;  %v5462_v60 = vpop.eup %5461 }
 0x562   :  { %5465 = vrcp.f32 %v1351_v0  ;;  %v5464_v19 = vpop.eup %5463  ;;  %v1364_v42 = vadd.f32 1.0, %v5462_v60 }
 0x563   :  { %5467 = vrcp.f32 %v1357_v8 }
 0x564   :  { %5469 = vrcp.f32 %v1364_v42 }
 0x56c   :  { %v5466_v54 = vpop.eup %5465 }
 0x56d   :  { %v5468_v31 = vpop.eup %5467  ;;  %v1368_v33 = vmul.f32 %v5466_v54, %v5464_v19 }
 0x56e   :  { %v1367_v13 = vmul.f32 %v5468_v31, %v6285_v4  ;;  %v5470_v27 = vpop.eup %5469 }
 0x570   :  { %v6331_v32 = vadd.f32 %v1368_v33, %v1367_v13 }
 0x572   :  { %5471 = vtanh.f32 %v6331_v32 }
 0x57c   :  { %v5472_v50 = vpop.eup %5471 }
 0x57d   :  { %v6334_v52 = vmul.f32 %v5472_v50, %v5470_v27 }
 0x57f   :  { %1438 = vmatmul.mubr.f32.vlgmr.msra.gmra.mrb[10].mxu0 %v6334_v52  ;;  %1509 = vmatmul.mubr.f32.vlgmr.msra.gmra.mrb[10].mxu1 %v6334_v52 }
 0x580   :  { %4481 = vmatpush1.bf16.msra.mxu0 %v5935_v23  ;;  %4513 = vmatpush1.bf16.msra.mxu1 %v5938_v26 }
 0x581   :  { %4483 = vmatprep.subr.bf16.mxu0 %v5942_v30  ;;  %4515 = vmatprep.subr.bf16.mxu1 %v5949_v35 }
 0x582   :  { %1608 = vmatprep.mubr.f32.mxu0 %v5755_v1  ;;  %1679 = vmatprep.mubr.f32.mxu1 %v5755_v1 }
 0x584   :  { %4485 = vmatpush1.bf16.msra.mxu0 %v5951_v36  ;;  %4517 = vmatpush1.bf16.msra.mxu1 %v5955_v39 }
 0x585   :  { %4487 = vmatprep.subr.bf16.mxu0 %v5959_v43  ;;  %4519 = vmatprep.subr.bf16.mxu1 %v5966_v48 }
 0x588   :  { %4489 = vmatpush1.bf16.msra.mxu0 %v5970_v51  ;;  %4521 = vmatpush1.bf16.msra.mxu1 %v5974_v55 }
 0x589   :  { %4491 = vmatprep.subr.bf16.mxu0 %v5978_v59  ;;  %4523 = vmatprep.subr.bf16.mxu1 %v5982_v62 }
 0x58c   :  { %4493 = vmatpush1.bf16.msra.mxu0 %v5989_v3  ;;  %4525 = vmatpush1.bf16.msra.mxu1 %v5993_v6 }
 0x58d   :  { %4495 = vmatprep.subr.bf16.mxu0 %v5997_v9  ;;  %4527 = vmatprep.subr.bf16.mxu1 %v6001_v12 }
 0x590   :  { %4497 = vmatpush1.bf16.msra.mxu0 %v6008_v16  ;;  %4529 = vmatpush1.bf16.msra.mxu1 %v6012_v20 }
 0x591   :  { %4499 = vmatprep.subr.bf16.mxu0 %v6016_v25  ;;  %4531 = vmatprep.subr.bf16.mxu1 %v6020_v29 }
 0x594   :  { %4501 = vmatpush1.bf16.msra.mxu0 %v6027_v34  ;;  %4533 = vmatpush1.bf16.msra.mxu1 %v6031_v40 }
 0x595   :  { %4503 = vmatprep.subr.bf16.mxu0 %v6035_v44  ;;  %4535 = vmatprep.subr.bf16.mxu1 %v6039_v47 }
 0x598   :  { %4505 = vmatpush1.bf16.msra.mxu0 %v6046_v53  ;;  %4537 = vmatpush1.bf16.msra.mxu1 %v6050_v57 }
 0x599   :  { %4507 = vmatprep.subr.bf16.mxu0 %v6054_v61  ;;  %4539 = vmatprep.subr.bf16.mxu1 %v6058_v2 }
 0x59c   :  { %4509 = vmatpush1.bf16.msra.mxu0 %v6065_v5  ;;  %4541 = vmatpush1.bf16.msra.mxu1 %v6069_v7 }
 0x59d   :  { %4543 = vmatprep.subr.bf16.mxu0 %v5931_v18  ;;  %4575 = vmatprep.subr.bf16.mxu1 %v5933_v22 }
 0x652   :  { %v1439_v4 = vpop.f32.mrb[10].mxu0  ;;  %v1510_v49 = vpop.f32.mrb[10].mxu1 }
 0x653   :  { %v5264_v56 = vadd.f32 %v1439_v4, %v6127_v15  ;;  %v1441_v37 = vpop.f32.mrb[11].mxu0  ;;  %v1512_v63 = vpop.f32.mrb[11].mxu1  ;;  %v5280_v31 = vadd.f32 %v1510_v49, %v6144_v45 }
 0x654   :  { %v5265_v0 = vadd.f32 %v1441_v37, %v6131_v17  ;;  %v5281_v19 = vadd.f32 %v1512_v63, %v6138_v38 }
 0x655   :  { %v3893_v8 = vmul.f32 -1.442695, %v5264_v56 }
 0x656   :  { %v3894_v60 = vmul.f32 -1.442695, %v5265_v0  ;;  %v3895_v54 = vmul.f32 -1.442695, %v5281_v19  ;;  %v1896_v19 = vld [vmem:[#allocation6 + $0x10] sm:$0xff] }
 0x657   :  { %5473 = vpow2.f32 %v3893_v8 }
 0x658   :  { %5475 = vpow2.f32 %v3894_v60 }
 0x659   :  { %5477 = vpow2.f32 %v3895_v54  ;;  %v1900_v54 = vld [vmem:[#allocation6 + $0x30] sm:$0xff] }
 0x65a   :  { %5479 = vtanh.f32 %v5280_v31  ;;  %v1903_v31 = vld [vmem:[#allocation6 + $0x48] sm:$0xff] }
 0x661   :  { %v5474_v18 = vpop.eup %5473 }
 0x662   :  { %v5476_v33 = vpop.eup %5475  ;;  %v1522_v22 = vadd.f32 1.0, %v5474_v18  ;;  %v1907_v18 = vld [vmem:[#allocation6 + $0x68] sm:$0xff] }
 0x663   :  { %v1528_v42 = vadd.f32 1.0, %v5476_v33  ;;  %v5478_v13 = vpop.eup %5477  ;;  %v1905_v33 = vld [vmem:[#allocation6 + $0x58] sm:$0xff] }
 0x664   :  { %5481 = vrcp.f32 %v1522_v22  ;;  %v5480_v27 = vpop.eup %5479  ;;  %v1535_v37 = vadd.f32 1.0, %v5478_v13  ;;  %v1909_v22 = vld [vmem:[#allocation6 + $0x78] sm:$0xff] }
 0x665   :  { %5483 = vrcp.f32 %v1528_v42 }
 0x666   :  { %5485 = vrcp.f32 %v1535_v37 }
 0x66e   :  { %v5482_v50 = vpop.eup %5481 }
 0x66f   :  { %v5484_v4 = vpop.eup %5483  ;;  %v1539_v56 = vmul.f32 %v5482_v50, %v5480_v27  ;;  %v4640_v50 = vpack.c.bf16 %v1900_v54, %v1896_v19  ;;  %v1926_v19 = vld [vmem:[#allocation6 + $0x100] sm:$0xff] }
 0x670   :  { %v1538_v0 = vmul.f32 %v5484_v4, %v6331_v32  ;;  %v5486_v49 = vpop.eup %5485  ;;  %v1898_v32 = vld [vmem:[#allocation6 + $0x20] sm:$0xff] }
 0x671   :  { %v1902_v4 = vld [vmem:[#allocation6 + $0x40] sm:$0xff] }
 0x672   :  { %v6377_v63 = vadd.f32 %v1539_v56, %v1538_v0  ;;  %v1906_v56 = vld [vmem:[#allocation6 + $0x60] sm:$0xff]  ;;  %v4610_v0 = vpack.c.bf16 %v1907_v18, %v1903_v31 }
 0x673   :  { %v1930_v54 = vld [vmem:[#allocation6 + $0x120] sm:$0xff] }
 0x674   :  { %5487 = vtanh.f32 %v6377_v63 }
 0x67e   :  { %v5488_v8 = vpop.eup %5487 }
 0x67f   :  { %v6380_v60 = vmul.f32 %v5488_v8, %v5486_v49  ;;  %v1904_v49 = vld [vmem:[#allocation6 + $0x50] sm:$0xff] }
 0x680   :  { %v1908_v8 = vld [vmem:[#allocation6 + $0x70] sm:$0xff] }
 0x681   :  { %1609 = vmatmul.mubr.f32.vlgmr.msra.gmra.mrb[12].mxu0 %v6380_v60  ;;  %1680 = vmatmul.mubr.f32.vlgmr.msra.gmra.mrb[12].mxu1 %v6380_v60 }
 0x682   :  { %4545 = vmatpush1.bf16.msra.mxu0 %v5935_v23  ;;  %4577 = vmatpush1.bf16.msra.mxu1 %v5938_v26  ;;  %v1895_v23 = vld [vmem:[#allocation6 + $0x8] sm:$0xff] }
 0x683   :  { %4547 = vmatprep.subr.bf16.mxu0 %v5942_v30  ;;  %4579 = vmatprep.subr.bf16.mxu1 %v5949_v35  ;;  %v1899_v26 = vld [vmem:[#allocation6 + $0x28] sm:$0xff]  ;;  %v1897_v30 = vld [vmem:[#allocation6 + $0x18] sm:$0xff] }
 0x684   :  { %1779 = vmatprep.mubr.f32.mxu0 %v5755_v1  ;;  %1850 = vmatprep.mubr.f32.mxu1 %v5755_v1  ;;  %v4606_v35 = vpack.c.bf16 %v1899_v26, %v1895_v23  ;;  %v1911_v23 = vld [vmem:[#allocation6 + $0x88] sm:$0xff] }
 0x685   :  { %v1915_v26 = vld [vmem:[#allocation6 + $0xa8] sm:$0xff] }
 0x686   :  { %4549 = vmatpush1.bf16.msra.mxu0 %v5951_v36  ;;  %4581 = vmatpush1.bf16.msra.mxu1 %v5955_v39  ;;  %v1901_v36 = vld [vmem:[#allocation6 + $0x38] sm:$0xff] }
 0x687   :  { %4551 = vmatprep.subr.bf16.mxu0 %v5959_v43  ;;  %4583 = vmatprep.subr.bf16.mxu1 %v5966_v48  ;;  %v4638_v39 = vpack.c.bf16 %v1901_v36, %v1897_v30  ;;  %v1913_v30 = vld [vmem:[#allocation6 + $0x98] sm:$0xff]  ;;  %v4612_v36 = vpack.c.bf16 %v1906_v56, %v1902_v4  ;;  %v4624_v4 = vpack.c.bf16 %v1930_v54, %v1926_v19  ;;  %v167_v54 = vld [vmem:[#allocation8 + $0x10] sm:$0xff] }
 0x68a   :  { %4553 = vmatpush1.bf16.msra.mxu0 %v5970_v51  ;;  %4585 = vmatpush1.bf16.msra.mxu1 %v5974_v55 }
 0x68b   :  { %4555 = vmatprep.subr.bf16.mxu0 %v5978_v59  ;;  %4587 = vmatprep.subr.bf16.mxu1 %v5982_v62 }
 0x68e   :  { %4557 = vmatpush1.bf16.msra.mxu0 %v5989_v3  ;;  %4589 = vmatpush1.bf16.msra.mxu1 %v5993_v6 }
 0x68f   :  { %4559 = vmatprep.subr.bf16.mxu0 %v5997_v9  ;;  %4591 = vmatprep.subr.bf16.mxu1 %v6001_v12 }
 0x692   :  { %4561 = vmatpush1.bf16.msra.mxu0 %v6008_v16  ;;  %4593 = vmatpush1.bf16.msra.mxu1 %v6012_v20 }
 0x693   :  { %4563 = vmatprep.subr.bf16.mxu0 %v6016_v25  ;;  %4595 = vmatprep.subr.bf16.mxu1 %v6020_v29 }
 0x696   :  { %4565 = vmatpush1.bf16.msra.mxu0 %v6027_v34  ;;  %4597 = vmatpush1.bf16.msra.mxu1 %v6031_v40 }
 0x697   :  { %4567 = vmatprep.subr.bf16.mxu0 %v6035_v44  ;;  %4599 = vmatprep.subr.bf16.mxu1 %v6039_v47 }
 0x69a   :  { %4569 = vmatpush1.bf16.msra.mxu0 %v6046_v53  ;;  %4601 = vmatpush1.bf16.msra.mxu1 %v6050_v57 }
 0x69b   :  { %4571 = vmatprep.subr.bf16.mxu0 %v6054_v61  ;;  %4603 = vmatprep.subr.bf16.mxu1 %v6058_v2 }
 0x69e   :  { %4573 = vmatpush1.bf16.msra.mxu0 %v6065_v5  ;;  %4605 = vmatpush1.bf16.msra.mxu1 %v6069_v7  ;;  %v1894_v7 = vld [vmem:[#allocation6] sm:$0xff] }
 0x69f   :  { %4607 = vmatprep.subr.bf16.mxu0 %v4606_v35  ;;  %4639 = vmatprep.subr.bf16.mxu1 %v4638_v39  ;;  %v4608_v27 = vpack.c.bf16 %v1898_v32, %v1894_v7  ;;  %v1917_v35 = vld [vmem:[#allocation6 + $0xb8] sm:$0xff]  ;;  %v4644_v39 = vpack.c.bf16 %v1908_v8, %v1904_v49 }
 0x754   :  { %v1610_v43 = vpop.f32.mrb[12].mxu0  ;;  %v1681_v48 = vpop.f32.mrb[12].mxu1 }
 0x755   :  { %v5266_v51 = vadd.f32 %v1610_v43, %v6127_v15  ;;  %v1612_v55 = vpop.f32.mrb[13].mxu0  ;;  %v1683_v59 = vpop.f32.mrb[13].mxu1  ;;  %v5282_v16 = vadd.f32 %v1681_v48, %v6144_v45  ;;  %v1910_v43 = vld [vmem:[#allocation6 + $0x80] sm:$0xff] }
 0x756   :  { %v5267_v62 = vadd.f32 %v1612_v55, %v6131_v17  ;;  %v5283_v9 = vadd.f32 %v1683_v59, %v6138_v38  ;;  %v1914_v48 = vld [vmem:[#allocation6 + $0xa0] sm:$0xff]  ;;  %v4646_v55 = vpack.c.bf16 %v1917_v35, %v1913_v30  ;;  %v1912_v59 = vld [vmem:[#allocation6 + $0x90] sm:$0xff]  ;;  %v1943_v30 = vld [vmem:[#allocation6 + $0x188] sm:$0xff] }
 0x757   :  { %v3896_v3 = vmul.f32 -1.442695, %v5266_v51  ;;  %v4614_v51 = vpack.c.bf16 %v1915_v26, %v1911_v23  ;;  %v1936_v23 = vld [vmem:[#allocation6 + $0x150] sm:$0xff]  ;;  %v1947_v35 = vld [vmem:[#allocation6 + $0x1a8] sm:$0xff] }
 0x758   :  { %v3897_v6 = vmul.f32 -1.442695, %v5267_v62  ;;  %v3898_v12 = vmul.f32 -1.442695, %v5283_v9  ;;  %v1916_v62 = vld [vmem:[#allocation6 + $0xb0] sm:$0xff]  ;;  %v1921_v9 = vld [vmem:[#allocation6 + $0xd8] sm:$0xff] }
 0x759   :  { %5489 = vpow2.f32 %v3896_v3  ;;  %v1919_v3 = vld [vmem:[#allocation6 + $0xc8] sm:$0xff]  ;;  %v1940_v26 = vld [vmem:[#allocation6 + $0x170] sm:$0xff] }
 0x75a   :  { %5491 = vpow2.f32 %v3897_v6  ;;  %v1923_v6 = vld [vmem:[#allocation6 + $0xe8] sm:$0xff] }
 0x75b   :  { %5493 = vpow2.f32 %v3898_v12  ;;  %v1925_v12 = vld [vmem:[#allocation6 + $0xf8] sm:$0xff] }
 0x75c   :  { %5495 = vtanh.f32 %v5282_v16  ;;  %v4616_v16 = vpack.c.bf16 %v1914_v48, %v1910_v43  ;;  %v4660_v48 = vpack.c.bf16 %v1940_v26, %v1936_v23  ;;  %v186_v23 = vld [vmem:[#allocation8 + $0xa8] sm:$0xff]  ;;  %v184_v26 = vld [vmem:[#allocation8 + $0x98] sm:$0xff] }
 0x763   :  { %v5490_v20 = vpop.eup %5489 }
 0x764   :  { %v5492_v25 = vpop.eup %5491  ;;  %v1693_v29 = vadd.f32 1.0, %v5490_v20  ;;  %v4648_v20 = vpack.c.bf16 %v1916_v62, %v1912_v59  ;;  %v4630_v59 = vpack.c.bf16 %v1947_v35, %v1943_v30  ;;  %v188_v35 = vld [vmem:[#allocation8 + $0xb8] sm:$0xff] }
 0x765   :  { %v1699_v34 = vadd.f32 1.0, %v5492_v25  ;;  %v5494_v40 = vpop.eup %5493  ;;  %v1918_v25 = vld [vmem:[#allocation6 + $0xc0] sm:$0xff] }
 0x766   :  { %5497 = vrcp.f32 %v1693_v29  ;;  %v5496_v44 = vpop.eup %5495  ;;  %v1706_v61 = vadd.f32 1.0, %v5494_v40  ;;  %v1922_v29 = vld [vmem:[#allocation6 + $0xe0] sm:$0xff]  ;;  %v4650_v40 = vpack.c.bf16 %v1925_v12, %v1921_v9  ;;  %v1951_v9 = vld [vmem:[#allocation6 + $0x1c8] sm:$0xff] }
 0x767   :  { %5499 = vrcp.f32 %v1699_v34  ;;  %v4618_v34 = vpack.c.bf16 %v1923_v6, %v1919_v3  ;;  %v4620_v7 = vpack.c.bf16 %v1922_v29, %v1918_v25  ;;  %v1944_v3 = vld [vmem:[#allocation6 + $0x190] sm:$0xff]  ;;  %v1955_v12 = vld [vmem:[#allocation6 + $0x1e8] sm:$0xff] }
 0x768   :  { %5501 = vrcp.f32 %v1706_v61  ;;  %v1929_v61 = vld [vmem:[#allocation6 + $0x118] sm:$0xff]  ;;  %v1948_v6 = vld [vmem:[#allocation6 + $0x1b0] sm:$0xff] }
 0x769   :  { %v4664_v29 = vpack.c.bf16 %v1948_v6, %v1944_v3  ;;  %v194_v3 = vld [vmem:[#allocation8 + $0xe8] sm:$0xff]  ;;  %v192_v6 = vld [vmem:[#allocation8 + $0xd8] sm:$0xff] }
 0x770   :  { %v5498_v47 = vpop.eup %5497 }
 0x771   :  { %v5500_v53 = vpop.eup %5499  ;;  %v1710_v57 = vmul.f32 %v5498_v47, %v5496_v44  ;;  %v1920_v44 = vld [vmem:[#allocation6 + $0xd0] sm:$0xff] }
 0x772   :  { %v1709_v2 = vmul.f32 %v5500_v53, %v6377_v63  ;;  %v5502_v42 = vpop.eup %5501  ;;  %v4642_v63 = vpack.c.bf16 %v1909_v22, %v1905_v33  ;;  %v1924_v47 = vld [vmem:[#allocation6 + $0xf0] sm:$0xff]  ;;  %v1927_v53 = vld [vmem:[#allocation6 + $0x108] sm:$0xff] }
 0x773   :  { %v4652_v32 = vpack.c.bf16 %v1924_v47, %v1920_v44  ;;  %v1928_v33 = vld [vmem:[#allocation6 + $0x110] sm:$0xff]  ;;  %v1954_v47 = vld [vmem:[#allocation6 + $0x1e0] sm:$0xff] }
 0x774   :  { %v6421_v5 = vadd.f32 %v1710_v57, %v1709_v2  ;;  %v1931_v57 = vld [vmem:[#allocation6 + $0x128] sm:$0xff]  ;;  %v1933_v2 = vld [vmem:[#allocation6 + $0x138] sm:$0xff]  ;;  %v1932_v22 = vld [vmem:[#allocation6 + $0x130] sm:$0xff] }
 0x775   :  { %v4622_v31 = vpack.c.bf16 %v1931_v57, %v1927_v53  ;;  %v4654_v18 = vpack.c.bf16 %v1933_v2, %v1929_v61  ;;  %v4656_v56 = vpack.c.bf16 %v1932_v22, %v1928_v33  ;;  %v1952_v53 = vld [vmem:[#allocation6 + $0x1d0] sm:$0xff]  ;;  %v178_v33 = vld [vmem:[#allocation8 + $0x68] sm:$0xff]  ;;  %v176_v22 = vld [vmem:[#allocation8 + $0x58] sm:$0xff] }
 0x776   :  { %5503 = vtanh.f32 %v6421_v5  ;;  %v1956_v57 = vld [vmem:[#allocation6 + $0x1f0] sm:$0xff] }
 0x777   :  { %v4668_v2 = vpack.c.bf16 %v1956_v57, %v1952_v53  ;;  %v202_v53 = vld [vmem:[#allocation8 + $0x128] sm:$0xff]  ;;  %v200_v57 = vld [vmem:[#allocation8 + $0x118] sm:$0xff] }
 0x780   :  { %v5504_v13 = vpop.eup %5503 }
 0x781   :  { %v6424_v37 = vmul.f32 %v5504_v13, %v5502_v42  ;;  %v1935_v42 = vld [vmem:[#allocation6 + $0x148] sm:$0xff] }
 0x782   :  { %v1939_v13 = vld [vmem:[#allocation6 + $0x168] sm:$0xff] }
 0x783   :  { %1780 = vmatmul.mubr.f32.vlgmr.msra.gmra.mrb[14].mxu0 %v6424_v37  ;;  %1851 = vmatmul.mubr.f32.vlgmr.msra.gmra.mrb[14].mxu1 %v6424_v37  ;;  %v4626_v49 = vpack.c.bf16 %v1939_v13, %v1935_v42  ;;  %v180_v13 = vld [vmem:[#allocation8 + $0x78] sm:$0xff] }
 0x784   :  { %4609 = vmatpush1.bf16.msra.mxu0 %v4608_v27  ;;  %4641 = vmatpush1.bf16.msra.mxu1 %v4640_v50  ;;  %v1937_v27 = vld [vmem:[#allocation6 + $0x158] sm:$0xff] }
 0x785   :  { %4611 = vmatprep.subr.bf16.mxu0 %v4610_v0  ;;  %4643 = vmatprep.subr.bf16.mxu1 %v4642_v63  ;;  %v1941_v50 = vld [vmem:[#allocation6 + $0x178] sm:$0xff]  ;;  %v1934_v0 = vld [vmem:[#allocation6 + $0x140] sm:$0xff] }
 0x786   :  { %2044 = vmatprep.mubr.f32.mxu0 %v5755_v1  ;;  %2157 = vmatprep.mubr.f32.mxu1 %v5755_v1  ;;  %v1938_v63 = vld [vmem:[#allocation6 + $0x160] sm:$0xff]  ;;  %v4658_v8 = vpack.c.bf16 %v1941_v50, %v1937_v27 }
 0x787   :  { %v4628_v43 = vpack.c.bf16 %v1938_v63, %v1934_v0  ;;  %v173_v27 = vld [vmem:[#allocation8 + $0x40] sm:$0xff]  ;;  %v175_v0 = vld [vmem:[#allocation8 + $0x50] sm:$0xff] }
 0x788   :  { %4613 = vmatpush1.bf16.msra.mxu0 %v4612_v36  ;;  %4645 = vmatpush1.bf16.msra.mxu1 %v4644_v39  ;;  %v1945_v36 = vld [vmem:[#allocation6 + $0x198] sm:$0xff]  ;;  %v177_v50 = vld [vmem:[#allocation8 + $0x60] sm:$0xff]  ;;  %v179_v63 = vld [vmem:[#allocation8 + $0x70] sm:$0xff] }
 0x789   :  { %4615 = vmatprep.subr.bf16.mxu0 %v4614_v51  ;;  %4647 = vmatprep.subr.bf16.mxu1 %v4646_v55  ;;  %v1949_v39 = vld [vmem:[#allocation6 + $0x1b8] sm:$0xff]  ;;  %v1942_v51 = vld [vmem:[#allocation6 + $0x180] sm:$0xff] }
 0x78a   :  { %v1946_v55 = vld [vmem:[#allocation6 + $0x1a0] sm:$0xff]  ;;  %v4662_v62 = vpack.c.bf16 %v1949_v39, %v1945_v36 }
 0x78b   :  { %v4632_v25 = vpack.c.bf16 %v1946_v55, %v1942_v51  ;;  %v181_v36 = vld [vmem:[#allocation8 + $0x80] sm:$0xff]  ;;  %v183_v51 = vld [vmem:[#allocation8 + $0x90] sm:$0xff] }
 0x78c   :  { %4617 = vmatpush1.bf16.msra.mxu0 %v4616_v16  ;;  %4649 = vmatpush1.bf16.msra.mxu1 %v4648_v20  ;;  %v1953_v16 = vld [vmem:[#allocation6 + $0x1d8] sm:$0xff]  ;;  %v185_v39 = vld [vmem:[#allocation8 + $0xa0] sm:$0xff]  ;;  %v187_v55 = vld [vmem:[#allocation8 + $0xb0] sm:$0xff] }
 0x78d   :  { %4619 = vmatprep.subr.bf16.mxu0 %v4618_v34  ;;  %4651 = vmatprep.subr.bf16.mxu1 %v4650_v40  ;;  %v1957_v20 = vld [vmem:[#allocation6 + $0x1f8] sm:$0xff]  ;;  %v1950_v34 = vld [vmem:[#allocation6 + $0x1c0] sm:$0xff]  ;;  %v4634_v40 = vpack.c.bf16 %v1955_v12, %v1951_v9 }
 0x78e   :  { %v4666_v44 = vpack.c.bf16 %v1957_v20, %v1953_v16  ;;  %v4636_v61 = vpack.c.bf16 %v1954_v47, %v1950_v34  ;;  %v196_v12 = vld [vmem:[#allocation8 + $0xf8] sm:$0xff]  ;;  %v189_v16 = vld [vmem:[#allocation8 + $0xc0] sm:$0xff]  ;;  %v191_v34 = vld [vmem:[#allocation8 + $0xd0] sm:$0xff] }
 0x78f   :  { %v193_v20 = vld [vmem:[#allocation8 + $0xe0] sm:$0xff] }
 0x790   :  { %4621 = vmatpush1.bf16.msra.mxu0 %v4620_v7  ;;  %4653 = vmatpush1.bf16.msra.mxu1 %v4652_v32  ;;  %v165_v7 = vld [vmem:[#allocation8] sm:$0xff] }
 0x791   :  { %4623 = vmatprep.subr.bf16.mxu0 %v4622_v31  ;;  %4655 = vmatprep.subr.bf16.mxu1 %v4654_v18  ;;  %v171_v31 = vld [vmem:[#allocation8 + $0x30] sm:$0xff]  ;;  %v174_v18 = vld [vmem:[#allocation8 + $0x48] sm:$0xff] }
 0x792   :  { %v6470_v42 = vpack.c.bf16 %v178_v33, %v174_v18 }
 0x794   :  { %4625 = vmatpush1.bf16.msra.mxu0 %v4624_v4  ;;  %4657 = vmatpush1.bf16.msra.mxu1 %v4656_v56  ;;  %v6472_v4 = vpack.c.bf16 %v180_v13, %v176_v22  ;;  %v6474_v56 = vpack.c.bf16 %v177_v50, %v173_v27  ;;  %v208_v22 = vld [vmem:[#allocation8 + $0x158] sm:$0xff]  ;;  %v205_v27 = vld [vmem:[#allocation8 + $0x140] sm:$0xff] }
 0x795   :  { %4627 = vmatprep.subr.bf16.mxu0 %v4626_v49  ;;  %4659 = vmatprep.subr.bf16.mxu1 %v4658_v8  ;;  %v6477_v49 = vpack.c.bf16 %v179_v63, %v175_v0  ;;  %v182_v8 = vld [vmem:[#allocation8 + $0x88] sm:$0xff]  ;;  %v212_v13 = vld [vmem:[#allocation8 + $0x178] sm:$0xff]  ;;  %v209_v0 = vld [vmem:[#allocation8 + $0x160] sm:$0xff] }
 0x796   :  { %v6482_v30 = vpack.c.bf16 %v186_v23, %v182_v8  ;;  %v6518_v50 = vpack.c.bf16 %v212_v13, %v208_v22  ;;  %v207_v63 = vld [vmem:[#allocation8 + $0x150] sm:$0xff]  ;;  %v6521_v23 = vpack.c.bf16 %v209_v0, %v205_v27 }
 0x797   :  { %v211_v8 = vld [vmem:[#allocation8 + $0x170] sm:$0xff] }
 0x798   :  { %4629 = vmatpush1.bf16.msra.mxu0 %v4628_v43  ;;  %4661 = vmatpush1.bf16.msra.mxu1 %v4660_v48  ;;  %v6484_v43 = vpack.c.bf16 %v188_v35, %v184_v26  ;;  %v6486_v48 = vpack.c.bf16 %v185_v39, %v181_v36  ;;  %v214_v26 = vld [vmem:[#allocation8 + $0x188] sm:$0xff]  ;;  %v216_v36 = vld [vmem:[#allocation8 + $0x198] sm:$0xff]  ;;  %v6525_v39 = vpack.c.bf16 %v211_v8, %v207_v63 }
 0x799   :  { %4631 = vmatprep.subr.bf16.mxu0 %v4630_v59  ;;  %4663 = vmatprep.subr.bf16.mxu1 %v4662_v62  ;;  %v6489_v59 = vpack.c.bf16 %v187_v55, %v183_v51  ;;  %v190_v62 = vld [vmem:[#allocation8 + $0xc8] sm:$0xff]  ;;  %v220_v55 = vld [vmem:[#allocation8 + $0x1b8] sm:$0xff] }
 0x79a   :  { %v6494_v9 = vpack.c.bf16 %v194_v3, %v190_v62  ;;  %v218_v35 = vld [vmem:[#allocation8 + $0x1a8] sm:$0xff]  ;;  %v213_v62 = vld [vmem:[#allocation8 + $0x180] sm:$0xff] }
 0x79b   :  { %v6527_v51 = vpack.c.bf16 %v218_v35, %v214_v26  ;;  %v217_v3 = vld [vmem:[#allocation8 + $0x1a0] sm:$0xff] }
 0x79c   :  { %4633 = vmatpush1.bf16.msra.mxu0 %v4632_v25  ;;  %4665 = vmatpush1.bf16.msra.mxu1 %v4664_v29  ;;  %v6496_v25 = vpack.c.bf16 %v196_v12, %v192_v6  ;;  %v6498_v29 = vpack.c.bf16 %v193_v20, %v189_v16  ;;  %v6530_v6 = vpack.c.bf16 %v220_v55, %v216_v36  ;;  %v215_v12 = vld [vmem:[#allocation8 + $0x190] sm:$0xff] }
 0x79d   :  { %4635 = vmatprep.subr.bf16.mxu0 %v4634_v40  ;;  %4667 = vmatprep.subr.bf16.mxu1 %v4666_v44  ;;  %v195_v40 = vld [vmem:[#allocation8 + $0xf0] sm:$0xff]  ;;  %v198_v44 = vld [vmem:[#allocation8 + $0x108] sm:$0xff]  ;;  %v6533_v20 = vpack.c.bf16 %v217_v3, %v213_v62 }
 0x79e   :  { %v6501_v47 = vpack.c.bf16 %v195_v40, %v191_v34  ;;  %v219_v16 = vld [vmem:[#allocation8 + $0x1b0] sm:$0xff]  ;;  %v222_v40 = vld [vmem:[#allocation8 + $0x1c8] sm:$0xff] }
 0x79f   :  { %v6537_v34 = vpack.c.bf16 %v219_v16, %v215_v12 }
 0x7a0   :  { %4637 = vmatpush1.bf16.msra.mxu0 %v4636_v61  ;;  %4669 = vmatpush1.bf16.msra.mxu1 %v4668_v2  ;;  %v204_v61 = vld [vmem:[#allocation8 + $0x138] sm:$0xff]  ;;  %v6505_v2 = vpack.c.bf16 %v202_v53, %v198_v44  ;;  %v226_v44 = vld [vmem:[#allocation8 + $0x1e8] sm:$0xff] }
 0x7a1   :  { %v224_v53 = vld [vmem:[#allocation8 + $0x1d8] sm:$0xff] }
 0x7a3   :  { %2045 = vmatmul.mubr.f32.vlgmr.msra.gmra.mrb[16].mxu0 %v6150_v28  ;;  %2158 = vmatmul.mubr.f32.vlgmr.msra.gmra.mrb[16].mxu1 %v6150_v28  ;;  %v166_v28 = vld [vmem:[#allocation8 + $0x8] sm:$0xff] }
 0x7a4   :  { %2050 = vmatprep.mubr.f32.mxu0 %v5755_v1  ;;  %2163 = vmatprep.mubr.f32.mxu1 %v5755_v1 }
 0x7a7   :  { %2051 = vmatmul.mubr.f32.gmra.mrb[18].mxu0 %v6196_v46  ;;  %2164 = vmatmul.mubr.f32.gmra.mrb[18].mxu1 %v6196_v46  ;;  %v170_v46 = vld [vmem:[#allocation8 + $0x28] sm:$0xff] }
 0x7a8   :  { %2056 = vmatprep.mubr.f32.mxu0 %v5755_v1  ;;  %2169 = vmatprep.mubr.f32.mxu1 %v5755_v1 }
 0x7ab   :  { %2057 = vmatmul.mubr.f32.gmra.mrb[20].mxu0 %v6242_v58  ;;  %2170 = vmatmul.mubr.f32.gmra.mrb[20].mxu1 %v6242_v58  ;;  %v168_v58 = vld [vmem:[#allocation8 + $0x18] sm:$0xff] }
 0x7ac   :  { %2062 = vmatprep.mubr.f32.mxu0 %v5755_v1  ;;  %2175 = vmatprep.mubr.f32.mxu1 %v5755_v1 }
 0x7af   :  { %2063 = vmatmul.mubr.f32.gmra.mrb[22].mxu0 %v6288_v24  ;;  %2176 = vmatmul.mubr.f32.gmra.mrb[22].mxu1 %v6288_v24  ;;  %v6458_v24 = vpack.c.bf16 %v170_v46, %v166_v28  ;;  %v6507_v28 = vpack.c.bf16 %v204_v61, %v200_v57  ;;  %v197_v46 = vld [vmem:[#allocation8 + $0x100] sm:$0xff]  ;;  %v6542_v57 = vpack.c.bf16 %v226_v44, %v222_v40  ;;  %v228_v61 = vld [vmem:[#allocation8 + $0x1f8] sm:$0xff] }
 0x7b0   :  { %2068 = vmatprep.mubr.f32.mxu0 %v5755_v1  ;;  %2181 = vmatprep.mubr.f32.mxu1 %v5755_v1 }
 0x7b1   :  { %4671 = vmatprep.subr.bf16.mxu0 %v6458_v24 }
 0x7b3   :  { %2069 = vmatmul.mubr.f32.gmra.mrb[24].mxu0 %v6334_v52  ;;  %2182 = vmatmul.mubr.f32.gmra.mrb[24].mxu1 %v6334_v52  ;;  %v172_v52 = vld [vmem:[#allocation8 + $0x38] sm:$0xff] }
 0x7b4   :  { %2074 = vmatprep.mubr.f32.mxu0 %v5755_v1  ;;  %2187 = vmatprep.mubr.f32.mxu1 %v5755_v1  ;;  %v6460_v32 = vpack.c.bf16 %v172_v52, %v168_v58  ;;  %v201_v58 = vld [vmem:[#allocation8 + $0x120] sm:$0xff]  ;;  %v199_v52 = vld [vmem:[#allocation8 + $0x110] sm:$0xff] }
 0x7b6   :  { %4703 = vmatprep.subr.bf16.mxu1 %v6460_v32 }
 0x7b7   :  { %2075 = vmatmul.mubr.f32.gmra.mrb[26].mxu0 %v6380_v60  ;;  %2188 = vmatmul.mubr.f32.gmra.mrb[26].mxu1 %v6380_v60  ;;  %v169_v60 = vld [vmem:[#allocation8 + $0x20] sm:$0xff] }
 0x7b8   :  { %2080 = vmatprep.mubr.f32.mxu0 %v5755_v1  ;;  %2193 = vmatprep.mubr.f32.mxu1 %v5755_v1  ;;  %v6462_v19 = vpack.c.bf16 %v169_v60, %v165_v7  ;;  %v6510_v7 = vpack.c.bf16 %v201_v58, %v197_v46  ;;  %v203_v60 = vld [vmem:[#allocation8 + $0x130] sm:$0xff]  ;;  %v221_v46 = vld [vmem:[#allocation8 + $0x1c0] sm:$0xff] }
 0x7b9   :  { %v6514_v18 = vpack.c.bf16 %v203_v60, %v199_v52  ;;  %v225_v58 = vld [vmem:[#allocation8 + $0x1e0] sm:$0xff]  ;;  %v6544_v52 = vpack.c.bf16 %v228_v61, %v224_v53 }
 0x7ba   :  { %4673 = vmatpush1.bf16.msra.mxu0 %v6462_v19  ;;  %v6546_v60 = vpack.c.bf16 %v225_v58, %v221_v46 }
 0x7bb   :  { %2081 = vmatmul.mubr.f32.gmra.mrb[28].mxu0 %v6424_v37  ;;  %2194 = vmatmul.mubr.f32.gmra.mrb[28].mxu1 %v6424_v37  ;;  %v6465_v37 = vpack.c.bf16 %v171_v31, %v167_v54  ;;  %v206_v54 = vld [vmem:[#allocation8 + $0x148] sm:$0xff] }
 0x7bc   :  { %2086 = vmatprep.mubr.f32.mxu0 %v5755_v1  ;;  %2199 = vmatprep.mubr.f32.mxu1 %v5755_v1  ;;  %v210_v31 = vld [vmem:[#allocation8 + $0x168] sm:$0xff] }
 0x7bd   :  { %4705 = vmatpush1.bf16.msra.mxu1 %v6465_v37  ;;  %4675 = vmatprep.subr.bf16.mxu0 %v6470_v42  ;;  %v6516_v33 = vpack.c.bf16 %v210_v31, %v206_v54  ;;  %v223_v54 = vld [vmem:[#allocation8 + $0x1d0] sm:$0xff] }
 0x7be   :  { %4707 = vmatprep.subr.bf16.mxu1 %v6472_v4  ;;  %4677 = vmatpush1.bf16.msra.mxu0 %v6474_v56  ;;  %v227_v31 = vld [vmem:[#allocation8 + $0x1f0] sm:$0xff] }
 0x7bf   :  { %4679 = vmatprep.subr.bf16.mxu0 %v6482_v30  ;;  %v6549_v22 = vpack.c.bf16 %v227_v31, %v223_v54 }
 0x7c1   :  { %4709 = vmatpush1.bf16.msra.mxu1 %v6477_v49 }
 0x7c2   :  { %4711 = vmatprep.subr.bf16.mxu1 %v6484_v43  ;;  %4681 = vmatpush1.bf16.msra.mxu0 %v6486_v48 }
 0x7c3   :  { %4683 = vmatprep.subr.bf16.mxu0 %v6494_v9 }
 0x7c5   :  { %4713 = vmatpush1.bf16.msra.mxu1 %v6489_v59 }
 0x7c6   :  { %4715 = vmatprep.subr.bf16.mxu1 %v6496_v25  ;;  %4685 = vmatpush1.bf16.msra.mxu0 %v6498_v29 }
 0x7c7   :  { %4687 = vmatprep.subr.bf16.mxu0 %v6505_v2 }
 0x7c9   :  { %4717 = vmatpush1.bf16.msra.mxu1 %v6501_v47 }
 0x7ca   :  { %4719 = vmatprep.subr.bf16.mxu1 %v6507_v28  ;;  %4689 = vmatpush1.bf16.msra.mxu0 %v6510_v7 }
 0x7cb   :  { %4691 = vmatprep.subr.bf16.mxu0 %v6516_v33 }
 0x7cd   :  { %4721 = vmatpush1.bf16.msra.mxu1 %v6514_v18 }
 0x7ce   :  { %4723 = vmatprep.subr.bf16.mxu1 %v6518_v50  ;;  %4693 = vmatpush1.bf16.msra.mxu0 %v6521_v23 }
 0x7cf   :  { %4695 = vmatprep.subr.bf16.mxu0 %v6527_v51 }
 0x7d1   :  { %4725 = vmatpush1.bf16.msra.mxu1 %v6525_v39 }
 0x7d2   :  { %4727 = vmatprep.subr.bf16.mxu1 %v6530_v6  ;;  %4697 = vmatpush1.bf16.msra.mxu0 %v6533_v20 }
 0x7d3   :  { %4699 = vmatprep.subr.bf16.mxu0 %v6542_v57 }
 0x7d5   :  { %4729 = vmatpush1.bf16.msra.mxu1 %v6537_v34 }
 0x7d6   :  { %4731 = vmatprep.subr.bf16.mxu1 %v6544_v52  ;;  %4701 = vmatpush1.bf16.msra.mxu0 %v6546_v60 }
 0x7d7   :  { %4735 = vmatprep.subr.bf16.mxu0 %v6458_v24 }
 0x7d9   :  { %4733 = vmatpush1.bf16.msra.mxu1 %v6549_v22 }
 0x7da   :  { %4767 = vmatprep.subr.bf16.mxu1 %v6460_v32 }
 0x856   :  { %v1781_v13 = vpop.f32.mrb[14].mxu0  ;;  %v1852_v27 = vpop.f32.mrb[14].mxu1 }
 0x857   :  { %v5268_v0 = vadd.f32 %v1781_v13, %v6127_v15  ;;  %v1783_v63 = vpop.f32.mrb[15].mxu0  ;;  %v1854_v8 = vpop.f32.mrb[15].mxu1  ;;  %v5284_v3 = vadd.f32 %v1852_v27, %v6144_v45 }
 0x858   :  { %v5269_v26 = vadd.f32 %v1783_v63, %v6131_v17  ;;  %v5285_v55 = vadd.f32 %v1854_v8, %v6138_v38 }
 0x859   :  { %v3899_v35 = vmul.f32 -1.442695, %v5268_v0 }
 0x85a   :  { %v3900_v36 = vmul.f32 -1.442695, %v5269_v26  ;;  %v3901_v62 = vmul.f32 -1.442695, %v5285_v55 }
 0x85b   :  { %5505 = vpow2.f32 %v3899_v35 }
 0x85c   :  { %5507 = vpow2.f32 %v3900_v36 }
 0x85d   :  { %5509 = vpow2.f32 %v3901_v62 }
 0x85e   :  { %5511 = vtanh.f32 %v5284_v3 }
 0x865   :  { %v5506_v12 = vpop.eup %5505 }
 0x866   :  { %v5508_v16 = vpop.eup %5507  ;;  %v1864_v40 = vadd.f32 1.0, %v5506_v12 }
 0x867   :  { %v1870_v44 = vadd.f32 1.0, %v5508_v16  ;;  %v5510_v15 = vpop.eup %5509 }
 0x868   :  { %5513 = vrcp.f32 %v1864_v40  ;;  %v5512_v53 = vpop.eup %5511  ;;  %v1877_v58 = vadd.f32 1.0, %v5510_v15 }
 0x869   :  { %5515 = vrcp.f32 %v1870_v44 }
 0x86a   :  { %5517 = vrcp.f32 %v1877_v58 }
 0x872   :  { %v5514_v17 = vpop.eup %5513 }
 0x873   :  { %v5516_v61 = vpop.eup %5515  ;;  %v1881_v46 = vmul.f32 %v5514_v17, %v5512_v53 }
 0x874   :  { %v1880_v54 = vmul.f32 %v5516_v61, %v6421_v5  ;;  %v5518_v45 = vpop.eup %5517  ;;  %v1958_v5 = vld [vmem:[%s7021_s6] sm:$0xf] }
 0x875   :  { %v6604_v27 = vrot.slane %v1958_v5, %v249_v11  ;;  %v6608_v0 = vrot.slane %v1958_v5, %v253_v14  ;;  %v6614_v12 = vrot.slane %v1958_v5, %v261_v21  ;;  %v6619_v14 = vrot.slane %v1958_v5, %v257_v41 }
 0x876   :  { %v1882_v38 = vadd.f32 %v1881_v46, %v1880_v54 }
 0x878   :  { %5519 = vtanh.f32 %v1882_v38 }
 0x882   :  { %v5520_v31 = vpop.eup %5519 }
 0x883   :  { %v1884_v13 = vmul.f32 %v5520_v31, %v5518_v45 }
 0x885   :  { %2087 = vmatmul.mubr.f32.gmra.mrb[30].mxu0 %v1884_v13  ;;  %2200 = vmatmul.mubr.f32.gmra.mrb[30].mxu1 %v1884_v13 }
 0x886   :  { %2270 = vmatprep.mubr.f32.mxu0 %v5755_v1  ;;  %2341 = vmatprep.mubr.f32.mxu1 %v5755_v1 }
 0x889   :  { %2271 = vmatmul.mubr.f32.vlgmr.msra.gmra.mrb[16].mxu0 %v5755_v1  ;;  %2342 = vmatmul.mubr.f32.vlgmr.msra.gmra.mrb[16].mxu1 %v5755_v1 }
 0x88a   :  { %4737 = vmatpush1.bf16.msra.mxu0 %v6462_v19  ;;  %4769 = vmatpush1.bf16.msra.mxu1 %v6465_v37 }
 0x88b   :  { %4739 = vmatprep.subr.bf16.mxu0 %v6470_v42  ;;  %4771 = vmatprep.subr.bf16.mxu1 %v6472_v4 }
 0x88c   :  { %2440 = vmatprep.mubr.f32.mxu0 %v5755_v1  ;;  %2511 = vmatprep.mubr.f32.mxu1 %v5755_v1 }
 0x88e   :  { %4741 = vmatpush1.bf16.msra.mxu0 %v6474_v56  ;;  %4773 = vmatpush1.bf16.msra.mxu1 %v6477_v49 }
 0x88f   :  { %4743 = vmatprep.subr.bf16.mxu0 %v6482_v30  ;;  %4775 = vmatprep.subr.bf16.mxu1 %v6484_v43 }
 0x892   :  { %4745 = vmatpush1.bf16.msra.mxu0 %v6486_v48  ;;  %4777 = vmatpush1.bf16.msra.mxu1 %v6489_v59 }
 0x893   :  { %4747 = vmatprep.subr.bf16.mxu0 %v6494_v9  ;;  %4779 = vmatprep.subr.bf16.mxu1 %v6496_v25 }
 0x896   :  { %4749 = vmatpush1.bf16.msra.mxu0 %v6498_v29  ;;  %4781 = vmatpush1.bf16.msra.mxu1 %v6501_v47 }
 0x897   :  { %4751 = vmatprep.subr.bf16.mxu0 %v6505_v2  ;;  %4783 = vmatprep.subr.bf16.mxu1 %v6507_v28 }
 0x89a   :  { %4753 = vmatpush1.bf16.msra.mxu0 %v6510_v7  ;;  %4785 = vmatpush1.bf16.msra.mxu1 %v6514_v18 }
 0x89b   :  { %4755 = vmatprep.subr.bf16.mxu0 %v6516_v33  ;;  %4787 = vmatprep.subr.bf16.mxu1 %v6518_v50 }
 0x89e   :  { %4757 = vmatpush1.bf16.msra.mxu0 %v6521_v23  ;;  %4789 = vmatpush1.bf16.msra.mxu1 %v6525_v39 }
 0x89f   :  { %4759 = vmatprep.subr.bf16.mxu0 %v6527_v51  ;;  %4791 = vmatprep.subr.bf16.mxu1 %v6530_v6 }
 0x8a2   :  { %4761 = vmatpush1.bf16.msra.mxu0 %v6533_v20  ;;  %4793 = vmatpush1.bf16.msra.mxu1 %v6537_v34 }
 0x8a3   :  { %4763 = vmatprep.subr.bf16.mxu0 %v6542_v57  ;;  %4795 = vmatprep.subr.bf16.mxu1 %v6544_v52 }
 0x8a6   :  { %4765 = vmatpush1.bf16.msra.mxu0 %v6546_v60  ;;  %4797 = vmatpush1.bf16.msra.mxu1 %v6549_v22 }
 0x8a7   :  { %4799 = vmatprep.subr.bf16.mxu0 %v6458_v24  ;;  %4831 = vmatprep.subr.bf16.mxu1 %v6460_v32 }
 0x95c   :  { %v2272_v63 = vpop.f32.mrb[16].mxu0  ;;  %v2343_v8 = vpop.f32.mrb[16].mxu1 }
 0x95d   :  { %v5286_v26 = vadd.f32 %v2272_v63, %v6604_v27  ;;  %v2274_v35 = vpop.f32.mrb[17].mxu0  ;;  %v2345_v36 = vpop.f32.mrb[17].mxu1  ;;  %v5302_v40 = vadd.f32 %v2343_v8, %v6619_v14 }
 0x95e   :  { %v5287_v55 = vadd.f32 %v2274_v35, %v6608_v0  ;;  %v5303_v11 = vadd.f32 %v2345_v36, %v6614_v12 }
 0x95f   :  { %v3902_v62 = vmul.f32 -1.442695, %v5286_v26 }
 0x960   :  { %v3903_v3 = vmul.f32 -1.442695, %v5287_v55  ;;  %v3904_v16 = vmul.f32 -1.442695, %v5303_v11 }
 0x961   :  { %5521 = vpow2.f32 %v3902_v62 }
 0x962   :  { %5523 = vpow2.f32 %v3903_v3 }
 0x963   :  { %5525 = vpow2.f32 %v3904_v16 }
 0x964   :  { %5527 = vtanh.f32 %v5302_v40 }
 0x96b   :  { %v5522_v44 = vpop.eup %5521 }
 0x96c   :  { %v5524_v15 = vpop.eup %5523  ;;  %v2355_v53 = vadd.f32 1.0, %v5522_v44 }
 0x96d   :  { %v2361_v17 = vadd.f32 1.0, %v5524_v15  ;;  %v5526_v21 = vpop.eup %5525 }
 0x96e   :  { %5529 = vrcp.f32 %v2355_v53  ;;  %v5528_v61 = vpop.eup %5527  ;;  %v2368_v38 = vadd.f32 1.0, %v5526_v21 }
 0x96f   :  { %5531 = vrcp.f32 %v2361_v17 }
 0x970   :  { %5533 = vrcp.f32 %v2368_v38 }
 0x978   :  { %v5530_v46 = vpop.eup %5529 }
 0x979   :  { %v5532_v58 = vpop.eup %5531  ;;  %v2372_v54 = vmul.f32 %v5530_v46, %v5528_v61 }
 0x97a   :  { %v2371_v10 = vmul.f32 0.0, %v5532_v58  ;;  %v5534_v45 = vpop.eup %5533 }
 0x97c   :  { %v6622_v41 = vadd.f32 %v2372_v54, %v2371_v10 }
 0x97e   :  { %5535 = vtanh.f32 %v6622_v41 }
 0x988   :  { %v5536_v31 = vpop.eup %5535 }
 0x989   :  { %v2375_v13 = vmul.f32 %v5536_v31, %v5534_v45 }
 0x98b   :  { %2441 = vmatmul.mubr.f32.vlgmr.msra.gmra.mrb[18].mxu0 %v2375_v13  ;;  %2512 = vmatmul.mubr.f32.vlgmr.msra.gmra.mrb[18].mxu1 %v2375_v13 }
 0x98c   :  { %4801 = vmatpush1.bf16.msra.mxu0 %v6462_v19  ;;  %4833 = vmatpush1.bf16.msra.mxu1 %v6465_v37 }
 0x98d   :  { %4803 = vmatprep.subr.bf16.mxu0 %v6470_v42  ;;  %4835 = vmatprep.subr.bf16.mxu1 %v6472_v4 }
 0x98e   :  { %2610 = vmatprep.mubr.f32.mxu0 %v5755_v1  ;;  %2681 = vmatprep.mubr.f32.mxu1 %v5755_v1 }
 0x990   :  { %4805 = vmatpush1.bf16.msra.mxu0 %v6474_v56  ;;  %4837 = vmatpush1.bf16.msra.mxu1 %v6477_v49 }
 0x991   :  { %4807 = vmatprep.subr.bf16.mxu0 %v6482_v30  ;;  %4839 = vmatprep.subr.bf16.mxu1 %v6484_v43 }
 0x994   :  { %4809 = vmatpush1.bf16.msra.mxu0 %v6486_v48  ;;  %4841 = vmatpush1.bf16.msra.mxu1 %v6489_v59 }
 0x995   :  { %4811 = vmatprep.subr.bf16.mxu0 %v6494_v9  ;;  %4843 = vmatprep.subr.bf16.mxu1 %v6496_v25 }
 0x998   :  { %4813 = vmatpush1.bf16.msra.mxu0 %v6498_v29  ;;  %4845 = vmatpush1.bf16.msra.mxu1 %v6501_v47 }
 0x999   :  { %4815 = vmatprep.subr.bf16.mxu0 %v6505_v2  ;;  %4847 = vmatprep.subr.bf16.mxu1 %v6507_v28 }
 0x99c   :  { %4817 = vmatpush1.bf16.msra.mxu0 %v6510_v7  ;;  %4849 = vmatpush1.bf16.msra.mxu1 %v6514_v18 }
 0x99d   :  { %4819 = vmatprep.subr.bf16.mxu0 %v6516_v33  ;;  %4851 = vmatprep.subr.bf16.mxu1 %v6518_v50 }
 0x9a0   :  { %4821 = vmatpush1.bf16.msra.mxu0 %v6521_v23  ;;  %4853 = vmatpush1.bf16.msra.mxu1 %v6525_v39 }
 0x9a1   :  { %4823 = vmatprep.subr.bf16.mxu0 %v6527_v51  ;;  %4855 = vmatprep.subr.bf16.mxu1 %v6530_v6 }
 0x9a4   :  { %4825 = vmatpush1.bf16.msra.mxu0 %v6533_v20  ;;  %4857 = vmatpush1.bf16.msra.mxu1 %v6537_v34 }
 0x9a5   :  { %4827 = vmatprep.subr.bf16.mxu0 %v6542_v57  ;;  %4859 = vmatprep.subr.bf16.mxu1 %v6544_v52 }
 0x9a8   :  { %4829 = vmatpush1.bf16.msra.mxu0 %v6546_v60  ;;  %4861 = vmatpush1.bf16.msra.mxu1 %v6549_v22 }
 0x9a9   :  { %4863 = vmatprep.subr.bf16.mxu0 %v6458_v24  ;;  %4895 = vmatprep.subr.bf16.mxu1 %v6460_v32 }
 0xa5e   :  { %v2442_v5 = vpop.f32.mrb[18].mxu0  ;;  %v2513_v63 = vpop.f32.mrb[18].mxu1 }
 0xa5f   :  { %v5288_v8 = vadd.f32 %v2442_v5, %v6604_v27  ;;  %v2444_v26 = vpop.f32.mrb[19].mxu0  ;;  %v2515_v35 = vpop.f32.mrb[19].mxu1  ;;  %v5304_v16 = vadd.f32 %v2513_v63, %v6619_v14 }
 0xa60   :  { %v5289_v36 = vadd.f32 %v2444_v26, %v6608_v0  ;;  %v5305_v3 = vadd.f32 %v2515_v35, %v6614_v12 }
 0xa61   :  { %v3905_v55 = vmul.f32 -1.442695, %v5288_v8 }
 0xa62   :  { %v3906_v62 = vmul.f32 -1.442695, %v5289_v36  ;;  %v3907_v11 = vmul.f32 -1.442695, %v5305_v3 }
 0xa63   :  { %5537 = vpow2.f32 %v3905_v55 }
 0xa64   :  { %5539 = vpow2.f32 %v3906_v62 }
 0xa65   :  { %5541 = vpow2.f32 %v3907_v11 }
 0xa66   :  { %5543 = vtanh.f32 %v5304_v16 }
 0xa6d   :  { %v5538_v40 = vpop.eup %5537 }
 0xa6e   :  { %v5540_v44 = vpop.eup %5539  ;;  %v2525_v15 = vadd.f32 1.0, %v5538_v40 }
 0xa6f   :  { %v2531_v53 = vadd.f32 1.0, %v5540_v44  ;;  %v5542_v17 = vpop.eup %5541 }
 0xa70   :  { %5545 = vrcp.f32 %v2525_v15  ;;  %v5544_v21 = vpop.eup %5543  ;;  %v2538_v54 = vadd.f32 1.0, %v5542_v17 }
 0xa71   :  { %5547 = vrcp.f32 %v2531_v53 }
 0xa72   :  { %5549 = vrcp.f32 %v2538_v54 }
 0xa7a   :  { %v5546_v61 = vpop.eup %5545 }
 0xa7b   :  { %v5548_v46 = vpop.eup %5547  ;;  %v2542_v58 = vmul.f32 %v5546_v61, %v5544_v21 }
 0xa7c   :  { %v2541_v38 = vmul.f32 %v5548_v46, %v6622_v41  ;;  %v5550_v45 = vpop.eup %5549 }
 0xa7e   :  { %v6664_v10 = vadd.f32 %v2542_v58, %v2541_v38 }
 0xa80   :  { %5551 = vtanh.f32 %v6664_v10 }
 0xa8a   :  { %v5552_v31 = vpop.eup %5551 }
 0xa8b   :  { %v2545_v13 = vmul.f32 %v5552_v31, %v5550_v45 }
 0xa8d   :  { %2611 = vmatmul.mubr.f32.vlgmr.msra.gmra.mrb[20].mxu0 %v2545_v13  ;;  %2682 = vmatmul.mubr.f32.vlgmr.msra.gmra.mrb[20].mxu1 %v2545_v13 }
 0xa8e   :  { %4865 = vmatpush1.bf16.msra.mxu0 %v6462_v19  ;;  %4897 = vmatpush1.bf16.msra.mxu1 %v6465_v37 }
 0xa8f   :  { %4867 = vmatprep.subr.bf16.mxu0 %v6470_v42  ;;  %4899 = vmatprep.subr.bf16.mxu1 %v6472_v4 }
 0xa90   :  { %2780 = vmatprep.mubr.f32.mxu0 %v5755_v1  ;;  %2851 = vmatprep.mubr.f32.mxu1 %v5755_v1 }
 0xa92   :  { %4869 = vmatpush1.bf16.msra.mxu0 %v6474_v56  ;;  %4901 = vmatpush1.bf16.msra.mxu1 %v6477_v49 }
 0xa93   :  { %4871 = vmatprep.subr.bf16.mxu0 %v6482_v30  ;;  %4903 = vmatprep.subr.bf16.mxu1 %v6484_v43 }
 0xa96   :  { %4873 = vmatpush1.bf16.msra.mxu0 %v6486_v48  ;;  %4905 = vmatpush1.bf16.msra.mxu1 %v6489_v59 }
 0xa97   :  { %4875 = vmatprep.subr.bf16.mxu0 %v6494_v9  ;;  %4907 = vmatprep.subr.bf16.mxu1 %v6496_v25 }
 0xa9a   :  { %4877 = vmatpush1.bf16.msra.mxu0 %v6498_v29  ;;  %4909 = vmatpush1.bf16.msra.mxu1 %v6501_v47 }
 0xa9b   :  { %4879 = vmatprep.subr.bf16.mxu0 %v6505_v2  ;;  %4911 = vmatprep.subr.bf16.mxu1 %v6507_v28 }
 0xa9e   :  { %4881 = vmatpush1.bf16.msra.mxu0 %v6510_v7  ;;  %4913 = vmatpush1.bf16.msra.mxu1 %v6514_v18 }
 0xa9f   :  { %4883 = vmatprep.subr.bf16.mxu0 %v6516_v33  ;;  %4915 = vmatprep.subr.bf16.mxu1 %v6518_v50 }
 0xaa2   :  { %4885 = vmatpush1.bf16.msra.mxu0 %v6521_v23  ;;  %4917 = vmatpush1.bf16.msra.mxu1 %v6525_v39 }
 0xaa3   :  { %4887 = vmatprep.subr.bf16.mxu0 %v6527_v51  ;;  %4919 = vmatprep.subr.bf16.mxu1 %v6530_v6 }
 0xaa6   :  { %4889 = vmatpush1.bf16.msra.mxu0 %v6533_v20  ;;  %4921 = vmatpush1.bf16.msra.mxu1 %v6537_v34 }
 0xaa7   :  { %4891 = vmatprep.subr.bf16.mxu0 %v6542_v57  ;;  %4923 = vmatprep.subr.bf16.mxu1 %v6544_v52 }
 0xaaa   :  { %4893 = vmatpush1.bf16.msra.mxu0 %v6546_v60  ;;  %4925 = vmatpush1.bf16.msra.mxu1 %v6549_v22 }
 0xaab   :  { %4927 = vmatprep.subr.bf16.mxu0 %v6458_v24  ;;  %4959 = vmatprep.subr.bf16.mxu1 %v6460_v32 }
 0xb60   :  { %v2612_v41 = vpop.f32.mrb[20].mxu0  ;;  %v2683_v5 = vpop.f32.mrb[20].mxu1 }
 0xb61   :  { %v5290_v63 = vadd.f32 %v2612_v41, %v6604_v27  ;;  %v2614_v8 = vpop.f32.mrb[21].mxu0  ;;  %v2685_v26 = vpop.f32.mrb[21].mxu1  ;;  %v5306_v11 = vadd.f32 %v2683_v5, %v6619_v14 }
 0xb62   :  { %v5291_v35 = vadd.f32 %v2614_v8, %v6608_v0  ;;  %v5307_v62 = vadd.f32 %v2685_v26, %v6614_v12 }
 0xb63   :  { %v3908_v36 = vmul.f32 -1.442695, %v5290_v63 }
 0xb64   :  { %v3909_v55 = vmul.f32 -1.442695, %v5291_v35  ;;  %v3910_v3 = vmul.f32 -1.442695, %v5307_v62 }
 0xb65   :  { %5553 = vpow2.f32 %v3908_v36 }
 0xb66   :  { %5555 = vpow2.f32 %v3909_v55 }
 0xb67   :  { %5557 = vpow2.f32 %v3910_v3 }
 0xb68   :  { %5559 = vtanh.f32 %v5306_v11 }
 0xb6f   :  { %v5554_v16 = vpop.eup %5553 }
 0xb70   :  { %v5556_v40 = vpop.eup %5555  ;;  %v2695_v44 = vadd.f32 1.0, %v5554_v16 }
 0xb71   :  { %v2701_v15 = vadd.f32 1.0, %v5556_v40  ;;  %v5558_v53 = vpop.eup %5557 }
 0xb72   :  { %5561 = vrcp.f32 %v2695_v44  ;;  %v5560_v17 = vpop.eup %5559  ;;  %v2708_v58 = vadd.f32 1.0, %v5558_v53 }
 0xb73   :  { %5563 = vrcp.f32 %v2701_v15 }
 0xb74   :  { %5565 = vrcp.f32 %v2708_v58 }
 0xb7c   :  { %v5562_v21 = vpop.eup %5561 }
 0xb7d   :  { %v5564_v61 = vpop.eup %5563  ;;  %v2712_v46 = vmul.f32 %v5562_v21, %v5560_v17 }
 0xb7e   :  { %v2711_v54 = vmul.f32 %v5564_v61, %v6664_v10  ;;  %v5566_v45 = vpop.eup %5565 }
 0xb80   :  { %v6706_v38 = vadd.f32 %v2712_v46, %v2711_v54 }
 0xb82   :  { %5567 = vtanh.f32 %v6706_v38 }
 0xb8c   :  { %v5568_v31 = vpop.eup %5567 }
 0xb8d   :  { %v2715_v13 = vmul.f32 %v5568_v31, %v5566_v45 }
 0xb8f   :  { %2781 = vmatmul.mubr.f32.vlgmr.msra.gmra.mrb[22].mxu0 %v2715_v13  ;;  %2852 = vmatmul.mubr.f32.vlgmr.msra.gmra.mrb[22].mxu1 %v2715_v13 }
 0xb90   :  { %4929 = vmatpush1.bf16.msra.mxu0 %v6462_v19  ;;  %4961 = vmatpush1.bf16.msra.mxu1 %v6465_v37 }
 0xb91   :  { %4931 = vmatprep.subr.bf16.mxu0 %v6470_v42  ;;  %4963 = vmatprep.subr.bf16.mxu1 %v6472_v4 }
 0xb92   :  { %2950 = vmatprep.mubr.f32.mxu0 %v5755_v1  ;;  %3021 = vmatprep.mubr.f32.mxu1 %v5755_v1 }
 0xb94   :  { %4933 = vmatpush1.bf16.msra.mxu0 %v6474_v56  ;;  %4965 = vmatpush1.bf16.msra.mxu1 %v6477_v49 }
 0xb95   :  { %4935 = vmatprep.subr.bf16.mxu0 %v6482_v30  ;;  %4967 = vmatprep.subr.bf16.mxu1 %v6484_v43 }
 0xb98   :  { %4937 = vmatpush1.bf16.msra.mxu0 %v6486_v48  ;;  %4969 = vmatpush1.bf16.msra.mxu1 %v6489_v59 }
 0xb99   :  { %4939 = vmatprep.subr.bf16.mxu0 %v6494_v9  ;;  %4971 = vmatprep.subr.bf16.mxu1 %v6496_v25 }
 0xb9c   :  { %4941 = vmatpush1.bf16.msra.mxu0 %v6498_v29  ;;  %4973 = vmatpush1.bf16.msra.mxu1 %v6501_v47 }
 0xb9d   :  { %4943 = vmatprep.subr.bf16.mxu0 %v6505_v2  ;;  %4975 = vmatprep.subr.bf16.mxu1 %v6507_v28 }
 0xba0   :  { %4945 = vmatpush1.bf16.msra.mxu0 %v6510_v7  ;;  %4977 = vmatpush1.bf16.msra.mxu1 %v6514_v18 }
 0xba1   :  { %4947 = vmatprep.subr.bf16.mxu0 %v6516_v33  ;;  %4979 = vmatprep.subr.bf16.mxu1 %v6518_v50 }
 0xba4   :  { %4949 = vmatpush1.bf16.msra.mxu0 %v6521_v23  ;;  %4981 = vmatpush1.bf16.msra.mxu1 %v6525_v39 }
 0xba5   :  { %4951 = vmatprep.subr.bf16.mxu0 %v6527_v51  ;;  %4983 = vmatprep.subr.bf16.mxu1 %v6530_v6 }
 0xba8   :  { %4953 = vmatpush1.bf16.msra.mxu0 %v6533_v20  ;;  %4985 = vmatpush1.bf16.msra.mxu1 %v6537_v34 }
 0xba9   :  { %4955 = vmatprep.subr.bf16.mxu0 %v6542_v57  ;;  %4987 = vmatprep.subr.bf16.mxu1 %v6544_v52 }
 0xbac   :  { %4957 = vmatpush1.bf16.msra.mxu0 %v6546_v60  ;;  %4989 = vmatpush1.bf16.msra.mxu1 %v6549_v22 }
 0xbad   :  { %4991 = vmatprep.subr.bf16.mxu0 %v6458_v24  ;;  %5023 = vmatprep.subr.bf16.mxu1 %v6460_v32 }
 0xc62   :  { %v2782_v10 = vpop.f32.mrb[22].mxu0  ;;  %v2853_v41 = vpop.f32.mrb[22].mxu1 }
 0xc63   :  { %v5292_v5 = vadd.f32 %v2782_v10, %v6604_v27  ;;  %v2784_v63 = vpop.f32.mrb[23].mxu0  ;;  %v2855_v8 = vpop.f32.mrb[23].mxu1  ;;  %v5308_v3 = vadd.f32 %v2853_v41, %v6619_v14 }
 0xc64   :  { %v5293_v26 = vadd.f32 %v2784_v63, %v6608_v0  ;;  %v5309_v55 = vadd.f32 %v2855_v8, %v6614_v12 }
 0xc65   :  { %v3911_v35 = vmul.f32 -1.442695, %v5292_v5 }
 0xc66   :  { %v3912_v36 = vmul.f32 -1.442695, %v5293_v26  ;;  %v3913_v62 = vmul.f32 -1.442695, %v5309_v55 }
 0xc67   :  { %5569 = vpow2.f32 %v3911_v35 }
 0xc68   :  { %5571 = vpow2.f32 %v3912_v36 }
 0xc69   :  { %5573 = vpow2.f32 %v3913_v62 }
 0xc6a   :  { %5575 = vtanh.f32 %v5308_v3 }
 0xc71   :  { %v5570_v11 = vpop.eup %5569 }
 0xc72   :  { %v5572_v16 = vpop.eup %5571  ;;  %v2865_v40 = vadd.f32 1.0, %v5570_v11 }
 0xc73   :  { %v2871_v44 = vadd.f32 1.0, %v5572_v16  ;;  %v5574_v15 = vpop.eup %5573 }
 0xc74   :  { %5577 = vrcp.f32 %v2865_v40  ;;  %v5576_v53 = vpop.eup %5575  ;;  %v2878_v46 = vadd.f32 1.0, %v5574_v15 }
 0xc75   :  { %5579 = vrcp.f32 %v2871_v44 }
 0xc76   :  { %5581 = vrcp.f32 %v2878_v46 }
 0xc7e   :  { %v5578_v17 = vpop.eup %5577 }
 0xc7f   :  { %v5580_v21 = vpop.eup %5579  ;;  %v2882_v61 = vmul.f32 %v5578_v17, %v5576_v53 }
 0xc80   :  { %v2881_v58 = vmul.f32 %v5580_v21, %v6706_v38  ;;  %v5582_v45 = vpop.eup %5581 }
 0xc82   :  { %v6748_v54 = vadd.f32 %v2882_v61, %v2881_v58 }
 0xc84   :  { %5583 = vtanh.f32 %v6748_v54 }
 0xc8e   :  { %v5584_v31 = vpop.eup %5583 }
 0xc8f   :  { %v2885_v13 = vmul.f32 %v5584_v31, %v5582_v45 }
 0xc91   :  { %2951 = vmatmul.mubr.f32.vlgmr.msra.gmra.mrb[24].mxu0 %v2885_v13  ;;  %3022 = vmatmul.mubr.f32.vlgmr.msra.gmra.mrb[24].mxu1 %v2885_v13 }
 0xc92   :  { %4993 = vmatpush1.bf16.msra.mxu0 %v6462_v19  ;;  %5025 = vmatpush1.bf16.msra.mxu1 %v6465_v37 }
 0xc93   :  { %4995 = vmatprep.subr.bf16.mxu0 %v6470_v42  ;;  %5027 = vmatprep.subr.bf16.mxu1 %v6472_v4 }
 0xc94   :  { %3120 = vmatprep.mubr.f32.mxu0 %v5755_v1  ;;  %3191 = vmatprep.mubr.f32.mxu1 %v5755_v1 }
 0xc96   :  { %4997 = vmatpush1.bf16.msra.mxu0 %v6474_v56  ;;  %5029 = vmatpush1.bf16.msra.mxu1 %v6477_v49 }
 0xc97   :  { %4999 = vmatprep.subr.bf16.mxu0 %v6482_v30  ;;  %5031 = vmatprep.subr.bf16.mxu1 %v6484_v43 }
 0xc9a   :  { %5001 = vmatpush1.bf16.msra.mxu0 %v6486_v48  ;;  %5033 = vmatpush1.bf16.msra.mxu1 %v6489_v59 }
 0xc9b   :  { %5003 = vmatprep.subr.bf16.mxu0 %v6494_v9  ;;  %5035 = vmatprep.subr.bf16.mxu1 %v6496_v25 }
 0xc9e   :  { %5005 = vmatpush1.bf16.msra.mxu0 %v6498_v29  ;;  %5037 = vmatpush1.bf16.msra.mxu1 %v6501_v47 }
 0xc9f   :  { %5007 = vmatprep.subr.bf16.mxu0 %v6505_v2  ;;  %5039 = vmatprep.subr.bf16.mxu1 %v6507_v28 }
 0xca2   :  { %5009 = vmatpush1.bf16.msra.mxu0 %v6510_v7  ;;  %5041 = vmatpush1.bf16.msra.mxu1 %v6514_v18 }
 0xca3   :  { %5011 = vmatprep.subr.bf16.mxu0 %v6516_v33  ;;  %5043 = vmatprep.subr.bf16.mxu1 %v6518_v50 }
 0xca6   :  { %5013 = vmatpush1.bf16.msra.mxu0 %v6521_v23  ;;  %5045 = vmatpush1.bf16.msra.mxu1 %v6525_v39 }
 0xca7   :  { %5015 = vmatprep.subr.bf16.mxu0 %v6527_v51  ;;  %5047 = vmatprep.subr.bf16.mxu1 %v6530_v6 }
 0xcaa   :  { %5017 = vmatpush1.bf16.msra.mxu0 %v6533_v20  ;;  %5049 = vmatpush1.bf16.msra.mxu1 %v6537_v34 }
 0xcab   :  { %5019 = vmatprep.subr.bf16.mxu0 %v6542_v57  ;;  %5051 = vmatprep.subr.bf16.mxu1 %v6544_v52 }
 0xcae   :  { %5021 = vmatpush1.bf16.msra.mxu0 %v6546_v60  ;;  %5053 = vmatpush1.bf16.msra.mxu1 %v6549_v22 }
 0xcaf   :  { %5055 = vmatprep.subr.bf16.mxu0 %v6458_v24  ;;  %5087 = vmatprep.subr.bf16.mxu1 %v6460_v32 }
 0xd64   :  { %v2952_v38 = vpop.f32.mrb[24].mxu0  ;;  %v3023_v10 = vpop.f32.mrb[24].mxu1 }
 0xd65   :  { %v5294_v41 = vadd.f32 %v2952_v38, %v6604_v27  ;;  %v2954_v5 = vpop.f32.mrb[25].mxu0  ;;  %v3025_v63 = vpop.f32.mrb[25].mxu1  ;;  %v5310_v62 = vadd.f32 %v3023_v10, %v6619_v14 }
 0xd66   :  { %v5295_v8 = vadd.f32 %v2954_v5, %v6608_v0  ;;  %v5311_v36 = vadd.f32 %v3025_v63, %v6614_v12 }
 0xd67   :  { %v3914_v26 = vmul.f32 -1.442695, %v5294_v41 }
 0xd68   :  { %v3915_v35 = vmul.f32 -1.442695, %v5295_v8  ;;  %v3916_v55 = vmul.f32 -1.442695, %v5311_v36 }
 0xd69   :  { %5585 = vpow2.f32 %v3914_v26 }
 0xd6a   :  { %5587 = vpow2.f32 %v3915_v35 }
 0xd6b   :  { %5589 = vpow2.f32 %v3916_v55 }
 0xd6c   :  { %5591 = vtanh.f32 %v5310_v62 }
 0xd73   :  { %v5586_v3 = vpop.eup %5585 }
 0xd74   :  { %v5588_v11 = vpop.eup %5587  ;;  %v3035_v16 = vadd.f32 1.0, %v5586_v3 }
 0xd75   :  { %v3041_v40 = vadd.f32 1.0, %v5588_v11  ;;  %v5590_v44 = vpop.eup %5589 }
 0xd76   :  { %5593 = vrcp.f32 %v3035_v16  ;;  %v5592_v15 = vpop.eup %5591  ;;  %v3048_v61 = vadd.f32 1.0, %v5590_v44 }
 0xd77   :  { %5595 = vrcp.f32 %v3041_v40 }
 0xd78   :  { %5597 = vrcp.f32 %v3048_v61 }
 0xd80   :  { %v5594_v53 = vpop.eup %5593 }
 0xd81   :  { %v5596_v17 = vpop.eup %5595  ;;  %v3052_v21 = vmul.f32 %v5594_v53, %v5592_v15 }
 0xd82   :  { %v3051_v46 = vmul.f32 %v5596_v17, %v6748_v54  ;;  %v5598_v45 = vpop.eup %5597 }
 0xd84   :  { %v6790_v58 = vadd.f32 %v3052_v21, %v3051_v46 }
 0xd86   :  { %5599 = vtanh.f32 %v6790_v58 }
 0xd90   :  { %v5600_v31 = vpop.eup %5599 }
 0xd91   :  { %v3055_v13 = vmul.f32 %v5600_v31, %v5598_v45  ;;  %v3569_v31 = vld [vmem:[%s7022_s7 + $0x18] sm:$0xff] }
 0xd93   :  { %3121 = vmatmul.mubr.f32.vlgmr.msra.gmra.mrb[26].mxu0 %v3055_v13  ;;  %3192 = vmatmul.mubr.f32.vlgmr.msra.gmra.mrb[26].mxu1 %v3055_v13 }
 0xd94   :  { %5057 = vmatpush1.bf16.msra.mxu0 %v6462_v19  ;;  %5089 = vmatpush1.bf16.msra.mxu1 %v6465_v37 }
 0xd95   :  { %5059 = vmatprep.subr.bf16.mxu0 %v6470_v42  ;;  %5091 = vmatprep.subr.bf16.mxu1 %v6472_v4 }
 0xd96   :  { %3290 = vmatprep.mubr.f32.mxu0 %v5755_v1  ;;  %3361 = vmatprep.mubr.f32.mxu1 %v5755_v1 }
 0xd98   :  { %5061 = vmatpush1.bf16.msra.mxu0 %v6474_v56  ;;  %5093 = vmatpush1.bf16.msra.mxu1 %v6477_v49 }
 0xd99   :  { %5063 = vmatprep.subr.bf16.mxu0 %v6482_v30  ;;  %5095 = vmatprep.subr.bf16.mxu1 %v6484_v43 }
 0xd9c   :  { %5065 = vmatpush1.bf16.msra.mxu0 %v6486_v48  ;;  %5097 = vmatpush1.bf16.msra.mxu1 %v6489_v59 }
 0xd9d   :  { %5067 = vmatprep.subr.bf16.mxu0 %v6494_v9  ;;  %5099 = vmatprep.subr.bf16.mxu1 %v6496_v25 }
 0xda0   :  { %5069 = vmatpush1.bf16.msra.mxu0 %v6498_v29  ;;  %5101 = vmatpush1.bf16.msra.mxu1 %v6501_v47 }
 0xda1   :  { %5071 = vmatprep.subr.bf16.mxu0 %v6505_v2  ;;  %5103 = vmatprep.subr.bf16.mxu1 %v6507_v28 }
 0xda4   :  { %5073 = vmatpush1.bf16.msra.mxu0 %v6510_v7  ;;  %5105 = vmatpush1.bf16.msra.mxu1 %v6514_v18 }
 0xda5   :  { %5075 = vmatprep.subr.bf16.mxu0 %v6516_v33  ;;  %5107 = vmatprep.subr.bf16.mxu1 %v6518_v50 }
 0xda8   :  { %5077 = vmatpush1.bf16.msra.mxu0 %v6521_v23  ;;  %5109 = vmatpush1.bf16.msra.mxu1 %v6525_v39 }
 0xda9   :  { %5079 = vmatprep.subr.bf16.mxu0 %v6527_v51  ;;  %5111 = vmatprep.subr.bf16.mxu1 %v6530_v6 }
 0xdac   :  { %5081 = vmatpush1.bf16.msra.mxu0 %v6533_v20  ;;  %5113 = vmatpush1.bf16.msra.mxu1 %v6537_v34 }
 0xdad   :  { %5083 = vmatprep.subr.bf16.mxu0 %v6542_v57  ;;  %5115 = vmatprep.subr.bf16.mxu1 %v6544_v52 }
 0xdb0   :  { %5085 = vmatpush1.bf16.msra.mxu0 %v6546_v60  ;;  %5117 = vmatpush1.bf16.msra.mxu1 %v6549_v22 }
 0xdb1   :  { %5119 = vmatprep.subr.bf16.mxu0 %v6458_v24  ;;  %5151 = vmatprep.subr.bf16.mxu1 %v6460_v32 }
 0xe66   :  { %v3122_v54 = vpop.f32.mrb[26].mxu0  ;;  %v3193_v38 = vpop.f32.mrb[26].mxu1 }
 0xe67   :  { %v5296_v10 = vadd.f32 %v3122_v54, %v6604_v27  ;;  %v3124_v41 = vpop.f32.mrb[27].mxu0  ;;  %v3195_v5 = vpop.f32.mrb[27].mxu1  ;;  %v5312_v55 = vadd.f32 %v3193_v38, %v6619_v14  ;;  %v3570_v54 = vld [vmem:[%s7022_s7 + $0x20] sm:$0xff]  ;;  %v3571_v38 = vld [vmem:[%s7022_s7 + $0x28] sm:$0xff] }
 0xe68   :  { %v5297_v63 = vadd.f32 %v3124_v41, %v6608_v0  ;;  %v5313_v35 = vadd.f32 %v3195_v5, %v6614_v12  ;;  %v3572_v41 = vld [vmem:[%s7022_s7 + $0x30] sm:$0xff]  ;;  %v3573_v5 = vld [vmem:[%s7022_s7 + $0x38] sm:$0xff] }
 0xe69   :  { %v3917_v8 = vmul.f32 -1.442695, %v5296_v10  ;;  %v5189_v10 = vpack.c.bf16 %v3571_v38, %v3570_v54 }
 0xe6a   :  { %v3918_v26 = vmul.f32 -1.442695, %v5297_v63  ;;  %v3919_v36 = vmul.f32 -1.442695, %v5313_v35  ;;  %v5192_v63 = vpack.c.bf16 %v3573_v5, %v3572_v41  ;;  %v3674_v5 = vld [vmem:[#allocation9 + $0x70] sm:$0xff] }
 0xe6b   :  { %5601 = vpow2.f32 %v3917_v8  ;;  %v3574_v8 = vld [vmem:[%s7022_s7 + $0x40] sm:$0xff] }
 0xe6c   :  { %5603 = vpow2.f32 %v3918_v26  ;;  %v3575_v26 = vld [vmem:[%s7022_s7 + $0x48] sm:$0xff] }
 0xe6d   :  { %5605 = vpow2.f32 %v3919_v36  ;;  %v5195_v35 = vpack.c.bf16 %v3575_v26, %v3574_v8  ;;  %v3576_v36 = vld [vmem:[%s7022_s7 + $0x50] sm:$0xff]  ;;  %v3754_v26 = vld [vmem:[%s7026_s11] sm:$0xff] }
 0xe6e   :  { %5607 = vtanh.f32 %v5312_v55  ;;  %v3577_v55 = vld [vmem:[%s7022_s7 + $0x58] sm:$0xff] }
 0xe75   :  { %v5602_v24 = vpop.eup %5601 }
 0xe76   :  { %v5604_v62 = vpop.eup %5603  ;;  %v3205_v32 = vadd.f32 1.0, %v5602_v24  ;;  %v3578_v24 = vld [vmem:[%s7022_s7 + $0x60] sm:$0xff] }
 0xe77   :  { %v3211_v3 = vadd.f32 1.0, %v5604_v62  ;;  %v5606_v11 = vpop.eup %5605  ;;  %v5198_v62 = vpack.c.bf16 %v3577_v55, %v3576_v36 }
 0xe78   :  { %5609 = vrcp.f32 %v3205_v32  ;;  %v5608_v16 = vpop.eup %5607  ;;  %v3218_v53 = vadd.f32 1.0, %v5606_v11  ;;  %v3579_v32 = vld [vmem:[%s7022_s7 + $0x68] sm:$0xff]  ;;  %v3580_v11 = vld [vmem:[%s7022_s7 + $0x70] sm:$0xff] }
 0xe79   :  { %5611 = vrcp.f32 %v3211_v3  ;;  %v5201_v3 = vpack.c.bf16 %v3579_v32, %v3578_v24  ;;  %v3758_v24 = vld [vmem:[%s7026_s11 + $0x20] sm:$0xff] }
 0xe7a   :  { %5613 = vrcp.f32 %v3218_v53  ;;  %v3662_v53 = vld [vmem:[#allocation9 + $0x10] sm:$0xff] }
 0xe82   :  { %v5610_v40 = vpop.eup %5609 }
 0xe83   :  { %v5612_v44 = vpop.eup %5611  ;;  %v3222_v15 = vmul.f32 %v5610_v40, %v5608_v16  ;;  %v3581_v16 = vld [vmem:[%s7022_s7 + $0x78] sm:$0xff] }
 0xe84   :  { %v3221_v17 = vmul.f32 %v5612_v44, %v6790_v58  ;;  %v5614_v61 = vpop.eup %5613  ;;  %v3568_v58 = vld [vmem:[%s7022_s7 + $0x10] sm:$0xff]  ;;  %v5204_v40 = vpack.c.bf16 %v3581_v16, %v3580_v11  ;;  %v3660_v44 = vld [vmem:[#allocation9] sm:$0xff]  ;;  %v3761_v11 = vld [vmem:[%s7026_s11 + $0x38] sm:$0xff] }
 0xe85   :  { %v5186_v13 = vpack.c.bf16 %v3569_v31, %v3568_v58 }
 0xe86   :  { %v6832_v21 = vadd.f32 %v3222_v15, %v3221_v17  ;;  %v3661_v15 = vld [vmem:[#allocation9 + $0x8] sm:$0xff] }
 0xe87   :  { %v5207_v17 = vpack.c.bf16 %v3661_v15, %v3660_v44  ;;  %v3763_v44 = vld [vmem:[%s7026_s11 + $0x48] sm:$0xff] }
 0xe88   :  { %5615 = vtanh.f32 %v6832_v21 }
 0xe92   :  { %v5616_v46 = vpop.eup %5615 }
 0xe93   :  { %v3225_v45 = vmul.f32 %v5616_v46, %v5614_v61  ;;  %v3664_v46 = vld [vmem:[#allocation9 + $0x20] sm:$0xff] }
 0xe95   :  { %3291 = vmatmul.mubr.f32.vlgmr.msra.gmra.mrb[28].mxu0 %v3225_v45  ;;  %3362 = vmatmul.mubr.f32.vlgmr.msra.gmra.mrb[28].mxu1 %v3225_v45  ;;  %v3665_v45 = vld [vmem:[#allocation9 + $0x28] sm:$0xff] }
 0xe96   :  { %5121 = vmatpush1.bf16.msra.mxu0 %v6462_v19  ;;  %5153 = vmatpush1.bf16.msra.mxu1 %v6465_v37 }
 0xe97   :  { %5123 = vmatprep.subr.bf16.mxu0 %v6470_v42  ;;  %5155 = vmatprep.subr.bf16.mxu1 %v6472_v4 }
 0xe98   :  { %3460 = vmatprep.mubr.f32.mxu0 %v5755_v1  ;;  %3531 = vmatprep.mubr.f32.mxu1 %v5755_v1 }
 0xe9a   :  { %5125 = vmatpush1.bf16.msra.mxu0 %v6474_v56  ;;  %5157 = vmatpush1.bf16.msra.mxu1 %v6477_v49 }
 0xe9b   :  { %5127 = vmatprep.subr.bf16.mxu0 %v6482_v30  ;;  %5159 = vmatprep.subr.bf16.mxu1 %v6484_v43 }
 0xe9e   :  { %5129 = vmatpush1.bf16.msra.mxu0 %v6486_v48  ;;  %5161 = vmatpush1.bf16.msra.mxu1 %v6489_v59 }
 0xe9f   :  { %5131 = vmatprep.subr.bf16.mxu0 %v6494_v9  ;;  %5163 = vmatprep.subr.bf16.mxu1 %v6496_v25 }
 0xea2   :  { %5133 = vmatpush1.bf16.msra.mxu0 %v6498_v29  ;;  %5165 = vmatpush1.bf16.msra.mxu1 %v6501_v47 }
 0xea3   :  { %5135 = vmatprep.subr.bf16.mxu0 %v6505_v2  ;;  %5167 = vmatprep.subr.bf16.mxu1 %v6507_v28 }
 0xea6   :  { %5137 = vmatpush1.bf16.msra.mxu0 %v6510_v7  ;;  %5169 = vmatpush1.bf16.msra.mxu1 %v6514_v18 }
 0xea7   :  { %5139 = vmatprep.subr.bf16.mxu0 %v6516_v33  ;;  %5171 = vmatprep.subr.bf16.mxu1 %v6518_v50 }
 0xeaa   :  { %5141 = vmatpush1.bf16.msra.mxu0 %v6521_v23  ;;  %5173 = vmatpush1.bf16.msra.mxu1 %v6525_v39 }
 0xeab   :  { %5143 = vmatprep.subr.bf16.mxu0 %v6527_v51  ;;  %5175 = vmatprep.subr.bf16.mxu1 %v6530_v6 }
 0xeae   :  { %5145 = vmatpush1.bf16.msra.mxu0 %v6533_v20  ;;  %5177 = vmatpush1.bf16.msra.mxu1 %v6537_v34 }
 0xeaf   :  { %5147 = vmatprep.subr.bf16.mxu0 %v6542_v57  ;;  %5179 = vmatprep.subr.bf16.mxu1 %v6544_v52  ;;  %v3566_v57 = vld [vmem:[%s7022_s7] sm:$0xff]  ;;  %v3567_v52 = vld [vmem:[%s7022_s7 + $0x8] sm:$0xff] }
 0xeb2   :  { %5149 = vmatpush1.bf16.msra.mxu0 %v6546_v60  ;;  %5181 = vmatpush1.bf16.msra.mxu1 %v6549_v22  ;;  %v5183_v60 = vpack.c.bf16 %v3567_v52, %v3566_v57  ;;  %v5756_v22 = vmov 0.0|0.0  }
 0xeb3   :  { %5182 = vmatprep.subr.bf16.mxu0 %v5756_v22  ;;  %5206 = vmatprep.subr.bf16.mxu1 %v5756_v22 }
 0xf68   :  { %v3292_v19 = vpop.f32.mrb[28].mxu0  ;;  %v3363_v37 = vpop.f32.mrb[28].mxu1 }
 0xf69   :  { %v5298_v42 = vadd.f32 %v3292_v19, %v6604_v27  ;;  %v3294_v4 = vpop.f32.mrb[29].mxu0  ;;  %v3365_v56 = vpop.f32.mrb[29].mxu1  ;;  %v5314_v9 = vadd.f32 %v3363_v37, %v6619_v14  ;;  %v5213_v19 = vpack.c.bf16 %v3665_v45, %v3664_v46  ;;  %v3666_v37 = vld [vmem:[#allocation9 + $0x30] sm:$0xff]  ;;  %v3767_v46 = vld [vmem:[%s7026_s11 + $0x68] sm:$0xff] }
 0xf6a   :  { %v5299_v49 = vadd.f32 %v3294_v4, %v6608_v0  ;;  %v5315_v48 = vadd.f32 %v3365_v56, %v6614_v12  ;;  %v3668_v56 = vld [vmem:[#allocation9 + $0x40] sm:$0xff] }
 0xf6b   :  { %v3920_v30 = vmul.f32 -1.442695, %v5298_v42  ;;  %v3667_v42 = vld [vmem:[#allocation9 + $0x38] sm:$0xff] }
 0xf6c   :  { %v3921_v43 = vmul.f32 -1.442695, %v5299_v49  ;;  %v3922_v59 = vmul.f32 -1.442695, %v5315_v48  ;;  %v5216_v4 = vpack.c.bf16 %v3667_v42, %v3666_v37  ;;  %v3669_v49 = vld [vmem:[#allocation9 + $0x48] sm:$0xff]  ;;  %v3671_v48 = vld [vmem:[#allocation9 + $0x58] sm:$0xff] }
 0xf6d   :  { %5617 = vpow2.f32 %v3920_v30  ;;  %v5219_v30 = vpack.c.bf16 %v3669_v49, %v3668_v56  ;;  %v3768_v49 = vld [vmem:[%s7026_s11 + $0x70] sm:$0xff] }
 0xf6e   :  { %5619 = vpow2.f32 %v3921_v43  ;;  %v3670_v43 = vld [vmem:[#allocation9 + $0x50] sm:$0xff] }
 0xf6f   :  { %5621 = vpow2.f32 %v3922_v59  ;;  %v5222_v59 = vpack.c.bf16 %v3671_v48, %v3670_v43 }
 0xf70   :  { %5623 = vtanh.f32 %v5314_v9  ;;  %v3672_v9 = vld [vmem:[#allocation9 + $0x60] sm:$0xff] }
 0xf77   :  { %v5618_v25 = vpop.eup %5617 }
 0xf78   :  { %v5620_v29 = vpop.eup %5619  ;;  %v3375_v47 = vadd.f32 1.0, %v5618_v25  ;;  %v3673_v25 = vld [vmem:[#allocation9 + $0x68] sm:$0xff] }
 0xf79   :  { %v3381_v2 = vadd.f32 1.0, %v5620_v29  ;;  %v5622_v28 = vpop.eup %5621  ;;  %v5225_v29 = vpack.c.bf16 %v3673_v25, %v3672_v9 }
 0xf7a   :  { %5625 = vrcp.f32 %v3375_v47  ;;  %v5624_v7 = vpop.eup %5623  ;;  %v3388_v23 = vadd.f32 1.0, %v5622_v28 }
 0xf7b   :  { %5627 = vrcp.f32 %v3381_v2 }
 0xf7c   :  { %5629 = vrcp.f32 %v3388_v23 }
 0xf84   :  { %v5626_v18 = vpop.eup %5625 }
 0xf85   :  { %v5628_v33 = vpop.eup %5627  ;;  %v3392_v50 = vmul.f32 %v5626_v18, %v5624_v7 }
 0xf86   :  { %v3391_v39 = vmul.f32 %v5628_v33, %v6832_v21  ;;  %v5630_v6 = vpop.eup %5629  ;;  %v3663_v21 = vld [vmem:[#allocation9 + $0x18] sm:$0xff] }
 0xf87   :  { %v5210_v61 = vpack.c.bf16 %v3663_v21, %v3662_v53  ;;  %v3764_v53 = vld [vmem:[%s7026_s11 + $0x50] sm:$0xff] }
 0xf88   :  { %v6872_v51 = vadd.f32 %v3392_v50, %v3391_v39 }
 0xf8a   :  { %5631 = vtanh.f32 %v6872_v51 }
 0xf94   :  { %v5632_v20 = vpop.eup %5631 }
 0xf95   :  { %v3395_v34 = vmul.f32 %v5632_v20, %v5630_v6 }
 0xf97   :  { %3461 = vmatmul.mubr.f32.vlgmr.msra.gmra.mrb[30].mxu0 %v3395_v34  ;;  %3532 = vmatmul.mubr.f32.vlgmr.msra.gmra.mrb[30].mxu1 %v3395_v34 }
 0xf98   :  { %5184 = vmatpush3.bf16.msra.mxu0 %v5183_v60  ;;  %4013 = vmatprep.mubr.msk.f32.mxu0 %vm5757_vm1, %v5755_v1 }
 0xf99   :  { %5185 = vmatprep.subr.bf16.mxu0 %v5756_v22  ;;  %4048 = vmatprep.mubr.msk.f32.mxu1 %vm5757_vm1, %v5755_v1 }
 0xf9a   :  { %5208 = vmatpush3.bf16.msra.mxu1 %v5207_v17  ;;  %v3765_v17 = vld [vmem:[%s7026_s11 + $0x58] sm:$0xff] }
 0xf9b   :  { %5209 = vmatprep.subr.bf16.mxu1 %v5756_v22  ;;  %v5246_v21 = vpack.c.bf16 %v3765_v17, %v3764_v53 }
 0xf9c   :  { %5187 = vmatpush3.bf16.msra.mxu0 %v5186_v13 }
 0xf9d   :  { %5188 = vmatprep.subr.bf16.mxu0 %v5756_v22 }
 0xf9e   :  { %5211 = vmatpush3.bf16.msra.mxu1 %v5210_v61  ;;  %v3766_v61 = vld [vmem:[%s7026_s11 + $0x60] sm:$0xff] }
 0xf9f   :  { %5212 = vmatprep.subr.bf16.mxu1 %v5756_v22  ;;  %v5249_v45 = vpack.c.bf16 %v3767_v46, %v3766_v61 }
 0xfa0   :  { %5190 = vmatpush3.bf16.msra.mxu0 %v5189_v10 }
 0xfa1   :  { %5191 = vmatprep.subr.bf16.mxu0 %v5756_v22 }
 0xfa2   :  { %5214 = vmatpush3.bf16.msra.mxu1 %v5213_v19  ;;  %v3926_v19 = vld [vmem:[%s7023_s8] ss:$0 sm:$0xff] }
 0xfa3   :  { %5215 = vmatprep.subr.bf16.mxu1 %v5756_v22 }
 0xfa4   :  { %5193 = vmatpush3.bf16.msra.mxu0 %v5192_v63  ;;  %v3675_v63 = vld [vmem:[#allocation9 + $0x78] sm:$0xff] }
 0xfa5   :  { %5194 = vmatprep.subr.bf16.mxu0 %v5756_v22  ;;  %v5228_v8 = vpack.c.bf16 %v3675_v63, %v3674_v5 }
 0xfa6   :  { %5217 = vmatpush3.bf16.msra.mxu1 %v5216_v4 }
 0xfa7   :  { %5218 = vmatprep.subr.bf16.mxu1 %v5756_v22 }
 0xfa8   :  { %5196 = vmatpush3.bf16.msra.mxu0 %v5195_v35  ;;  %v3756_v35 = vld [vmem:[%s7026_s11 + $0x10] sm:$0xff] }
 0xfa9   :  { %5197 = vmatprep.subr.bf16.mxu0 %v5756_v22 }
 0xfaa   :  { %5220 = vmatpush3.bf16.msra.mxu1 %v5219_v30  ;;  %v3769_v30 = vld [vmem:[%s7026_s11 + $0x78] sm:$0xff] }
 0xfab   :  { %5221 = vmatprep.subr.bf16.mxu1 %v5756_v22  ;;  %v5252_v43 = vpack.c.bf16 %v3769_v30, %v3768_v49 }
 0xfac   :  { %5199 = vmatpush3.bf16.msra.mxu0 %v5198_v62  ;;  %v3759_v62 = vld [vmem:[%s7026_s11 + $0x28] sm:$0xff] }
 0xfad   :  { %5200 = vmatprep.subr.bf16.mxu0 %v5756_v22  ;;  %v5237_v32 = vpack.c.bf16 %v3759_v62, %v3758_v24 }
 0xfae   :  { %5223 = vmatpush3.bf16.msra.mxu1 %v5222_v59 }
 0xfaf   :  { %5224 = vmatprep.subr.bf16.mxu1 %v5756_v22 }
 0xfb0   :  { %5202 = vmatpush3.bf16.msra.mxu0 %v5201_v3  ;;  %v3760_v3 = vld [vmem:[%s7026_s11 + $0x30] sm:$0xff] }
 0xfb1   :  { %5203 = vmatprep.subr.bf16.mxu0 %v5756_v22  ;;  %v5240_v16 = vpack.c.bf16 %v3761_v11, %v3760_v3 }
 0xfb2   :  { %5226 = vmatpush3.bf16.msra.mxu1 %v5225_v29  ;;  %v3928_v29 = vld [vmem:[#allocation3] ss:$0 sm:$0xff] }
 0xfb3   :  { %5227 = vmatprep.subr.bf16.mxu1 %v5756_v22 }
 0xfb4   :  { %5205 = vmatpush3.bf16.msra.mxu0 %v5204_v40  ;;  %v3762_v40 = vld [vmem:[%s7026_s11 + $0x40] sm:$0xff] }
 0xfb5   :  { %5230 = vmatprep.subr.bf16.mxu0 %v5756_v22  ;;  %v5243_v15 = vpack.c.bf16 %v3763_v44, %v3762_v40 }
 0xfb6   :  { %5229 = vmatpush3.bf16.msra.mxu1 %v5228_v8 }
0x106a   :  { %v3462_v47 = vpop.f32.mrb[30].mxu0  ;;  %v3533_v2 = vpop.f32.mrb[30].mxu1 }
0x106b   :  { %v5300_v28 = vadd.f32 %v3462_v47, %v6604_v27  ;;  %v3464_v7 = vpop.f32.mrb[31].mxu0  ;;  %v3535_v18 = vpop.f32.mrb[31].mxu1  ;;  %v5316_v20 = vadd.f32 %v3533_v2, %v6619_v14 }
0x106c   :  { %v5301_v33 = vadd.f32 %v3464_v7, %v6608_v0  ;;  %v5317_v39 = vadd.f32 %v3535_v18, %v6614_v12 }
0x106d   :  { %v3923_v50 = vmul.f32 -1.442695, %v5300_v28 }
0x106e   :  { %v3924_v23 = vmul.f32 -1.442695, %v5301_v33  ;;  %v3925_v6 = vmul.f32 -1.442695, %v5317_v39 }
0x106f   :  { %5633 = vpow2.f32 %v3923_v50 }
0x1070   :  { %5635 = vpow2.f32 %v3924_v23 }
0x1071   :  { %5637 = vpow2.f32 %v3925_v6 }
0x1072   :  { %5639 = vtanh.f32 %v5316_v20 }
0x1079   :  { %v5634_v34 = vpop.eup %5633 }
0x107a   :  { %v5636_v57 = vpop.eup %5635  ;;  %v3545_v52 = vadd.f32 1.0, %v5634_v34 }
0x107b   :  { %v3551_v60 = vadd.f32 1.0, %v5636_v57  ;;  %v5638_v27 = vpop.eup %5637 }
0x107c   :  { %5641 = vrcp.f32 %v3545_v52  ;;  %v5640_v58 = vpop.eup %5639  ;;  %v3558_v54 = vadd.f32 1.0, %v5638_v27 }
0x107d   :  { %5643 = vrcp.f32 %v3551_v60 }
0x107e   :  { %5645 = vrcp.f32 %v3558_v54 }
0x1086   :  { %v5642_v0 = vpop.eup %5641 }
0x1087   :  { %v5644_v31 = vpop.eup %5643  ;;  %v3562_v13 = vmul.f32 %v5642_v0, %v5640_v58 }
0x1088   :  { %v3561_v38 = vmul.f32 %v5644_v31, %v6872_v51  ;;  %v5646_v14 = vpop.eup %5645  ;;  %v3755_v51 = vld [vmem:[%s7026_s11 + $0x8] sm:$0xff] }
0x1089   :  { %v5231_v36 = vpack.c.bf16 %v3755_v51, %v3754_v26 }
0x108a   :  { %v3563_v12 = vadd.f32 %v3562_v13, %v3561_v38 }
0x108c   :  { %5647 = vtanh.f32 %v3563_v12 }
0x1096   :  { %v5648_v10 = vpop.eup %5647 }
0x1097   :  { %v3565_v41 = vmul.f32 %v5648_v10, %v5646_v14 }
0x1099   :  { %4014 = vmatmul.mubr.f32.vlgmr.msra.gmra.mrb[32].mxu0 %v3565_v41 }
0x109a   :  { %4083 = vmatprep.mubr.msk.f32.mxu0 %vm5757_vm1, %v5755_v1  ;;  %v3757_v1 = vld [vmem:[%s7026_s11 + $0x18] sm:$0xff]  ;;  %5232 = vmatpush3.bf16.msra.mxu0 %v5231_v36 }
0x109b   :  { %v5234_v55 = vpack.c.bf16 %v3757_v1, %v3756_v35  ;;  %5233 = vmatprep.subr.bf16.mxu0 %v5756_v22 }
0x109e   :  { %5235 = vmatpush3.bf16.msra.mxu0 %v5234_v55 }
0x109f   :  { %5236 = vmatprep.subr.bf16.mxu0 %v5756_v22 }
0x10a2   :  { %5238 = vmatpush3.bf16.msra.mxu0 %v5237_v32 }
0x10a3   :  { %5239 = vmatprep.subr.bf16.mxu0 %v5756_v22 }
0x10a6   :  { %5241 = vmatpush3.bf16.msra.mxu0 %v5240_v16 }
0x10a7   :  { %5242 = vmatprep.subr.bf16.mxu0 %v5756_v22 }
0x10aa   :  { %5244 = vmatpush3.bf16.msra.mxu0 %v5243_v15 }
0x10ab   :  { %5245 = vmatprep.subr.bf16.mxu0 %v5756_v22 }
0x10ae   :  { %5247 = vmatpush3.bf16.msra.mxu0 %v5246_v21 }
0x10af   :  { %5248 = vmatprep.subr.bf16.mxu0 %v5756_v22 }
0x10b2   :  { %5250 = vmatpush3.bf16.msra.mxu0 %v5249_v45 }
0x10b3   :  { %5251 = vmatprep.subr.bf16.mxu0 %v5756_v22  ;;  %v3927_v22 = vld [vmem:[%s7025_s10] ss:$0 sm:$0xff] }
0x10b6   :  { %5253 = vmatpush3.bf16.msra.mxu0 %v5252_v43 }
0x116c   :  { %v3655_v37 = vpop.f32.mrb[32].mxu0 }
0x116d   :  { %v3656_v42 = vadd.f32 %v3926_v19, %v3655_v37  ;;  %v4015_v4 = vpop.f32.mrb[33].mxu0 }
0x116f   :  { %v3659_v56 = vmax.f32 %v3656_v42, 0.0 }
0x1171   :  { %4049 = vmatmul.mubr.f32.vlgmr.msra.gmra.mrb[32].mxu1 %v3659_v56 }
0x1244   :  { %v3749_v48 = vpop.f32.mrb[32].mxu1 }
0x1245   :  { %v3750_v59 = vadd.f32 %v3927_v22, %v3749_v48  ;;  %v4050_v9 = vpop.f32.mrb[33].mxu1 }
0x1247   :  { %v3753_v25 = vmax.f32 %v3750_v59, 0.0 }
0x1249   :  { %4084 = vmatmul.mubr.f32.vlgmr.msra.gmra.mrb[34].mxu0 %v3753_v25 }
0x131c   :  { %v3843_v47 = vpop.f32.mrb[34].mxu0 }
0x131d   :  { %v3844_v2 = vadd.f32 %v3928_v29, %v3843_v47  ;;  %v4085_v28 = vpop.f32.mrb[35].mxu0 }
0x131f   :  { %v3929_v7 = vmul.f32 -1.442695, %v3844_v2 }
0x1321   :  { %5649 = vpow2.f32 %v3929_v7 }
0x132b   :  { %v5650_v18 = vpop.eup %5649 }
0x132c   :  { %v3850_v33 = vadd.f32 1.0, %v5650_v18 }
0x132e   :  { %5651 = vrcp.f32 %v3850_v33 }
0x1338   :  { %v5652_v50 = vpop.eup %5651 }
0x1339   :  { %3854 = vst.msk [vmem:[%s7028_s13] sm:$0xff] %vm3853_vm2, %v5652_v50 }
0x133a   :  { %3859 = vsyncpa [#allocation5], 1 }
0x133b   :  { %3860 = vsyncpa [#allocation7], 1 }
0x133c   :  { %3861 = vsyncpa [#allocation10], 1 }

</bundles_post_ra>
